<compile_context>
chip_gen: v6e
topology: v6e:2x2x1
jax: 0.10.0
libtpu: 0.0.40
codegen_flags: <defaults>
</compile_context>

<pallas_src>
import jax
import jax.numpy as jnp
from jax import lax
from jax.experimental import pallas as pl
from jax.experimental.pallas import tpu as pltpu

SMOOTH = 6.0          # module hyper-parameter (re_feats has no learned weights)
LEAKY_SLOPE = 0.1
EPS = 1e-8


def _round_up(v, m):
    return -(-v // m) * m


def _supports_bf16_eup():
    """True on chips with a bf16 transcendental unit (v6e / v7x); False on v5e and older."""
    try:
        kind = jax.devices()[0].device_kind.lower()
    except Exception:
        return False
    if "tpu" not in kind:
        return False
    for old in ("v2", "v3", "v4", "v5"):
        if old in kind:
            return False
    return True


def _side_compute(x, y, n_valid, bf16_exp, out_dtype):
    """softmax(l2norm_rows(LeakyReLU(x @ y.T)) * SMOOTH, -1) @ y for one row tile of x."""
    ny_pad = y.shape[0]

    # scores = x @ y.T : rhs contracted on its feature dim (the standard attention q@k.T
    # pattern, handled by the MXU's transposed-operand push — no recurring XLU transpose;
    # passing a pre-transposed copy of y would double the resident VMEM we just halved).
    s = lax.dot_general(x, y, dimension_numbers=(((1,), (1,)), ((), ())),
                        preferred_element_type=jnp.float32)          # (tm, ny_pad) f32

    # LeakyReLU(0.1) on the VPU (f32).
    lk = jnp.where(s >= 0, s, LEAKY_SLOPE * s)

    # Row L2-norm and the SMOOTH scale folded into ONE per-row rsqrt (single EUP op).
    sumsq = jnp.sum(lk * lk, axis=-1, keepdims=True)                  # (tm, 1)
    z = lk * (SMOOTH * lax.rsqrt(sumsq + EPS))                        # |z| <= SMOOTH = 6

    # Softmax.  Max-subtraction dropped: the row L2-norm bounds |z| <= 6, so exp cannot
    # overflow.  bf16 exp ~doubles EUP throughput on v6e/v7x (the binding unit for small
    # D); the row-sum and normalisation stay f32.
    e = jnp.exp(z.astype(jnp.bfloat16)).astype(jnp.float32) if bf16_exp else jnp.exp(z)
    if n_valid != ny_pad:
        # Padded y rows give exp(0) = 1: they MUST be masked out of the distribution.
        col = lax.broadcasted_iota(jnp.int32, e.shape, 1)
        e = jnp.where(col < n_valid, e, 0.0)
    p = e * pl.reciprocal(jnp.sum(e, axis=-1, keepdims=True), approx=True)

    # Reconstruction on the MXU; probabilities cast to y's (bf16) dtype, f32 accumulation.
    out = jnp.dot(p.astype(y.dtype), y, preferred_element_type=jnp.float32)
    return out.astype(out_dtype)


def re_feats(im, aud, *, tile_rows=128, compute_dtype=jnp.bfloat16, bf16_exp=None):
    """Pallas implementation of re_feats.forward. im: (N_im, D), aud: (N_aud, D)."""
    n_im, d = im.shape
    n_aud, d2 = aud.shape
    assert d == d2, "feature dims must match"
    assert n_im > 0 and n_aud > 0

    # Output dtype deliberately follows the (promoted) input dtype, like PyTorch.
    out_dtype = jnp.promote_types(im.dtype, aud.dtype)
    cdt = jnp.dtype(compute_dtype) if compute_dtype is not None else jnp.dtype(out_dtype)
    if bf16_exp is None:
        bf16_exp = _supports_bf16_eup()

    # Lane-dense feature dim and lane-dense score columns (multiples of 128).
    d_pad = _round_up(d, 128)
    n_aud_res = _round_up(n_aud, 128)
    n_im_res = _round_up(n_im, 128)

    # Row tile: multiple of 8 (sublane). 128 keeps the (tm, Ny) f32 temporaries small
    # enough for v5e's scoped VMEM while still feeding the MXU well.
    tm = _round_up(min(tile_rows, max(n_im, n_aud)), 8)
    n_im_rows = _round_up(n_im, tm)
    n_aud_rows = _round_up(n_aud, tm)
    im_tiles = n_im_rows // tm
    aud_tiles = n_aud_rows // tm
    grid = (im_tiles + aud_tiles,)   # >= 2 steps -> both v7x TensorCores occupied

    def pad2(a, rows, cols):
        r, c = a.shape
        if r != rows or c != cols:
            a = jnp.pad(a, ((0, rows - r), (0, cols - c)))
        return a.astype(cdt)

    # Streamed operand: row tiles of [im ; aud] (each side padded to a tile multiple).
    # Zero padding is exact: padded feature cols contribute 0 to scores and give 0 output
    # cols; padded score columns are masked in-kernel; padded rows are sliced off below.
    x_cat = jnp.concatenate([pad2(im, n_im_rows, d_pad), pad2(aud, n_aud_rows, d_pad)], 0)
    aud_res = pad2(aud, n_aud_res, d_pad)      # resident "y" for the im side
    im_res = pad2(im, n_im_res, d_pad)         # resident "y" for the aud side

    def kernel(x_ref, aud_ref, im_ref, out_ref):
        x = x_ref[...]
        is_im_side = pl.program_id(0) < im_tiles

        @pl.when(is_im_side)
        def _():
            out_ref[...] = _side_compute(x, aud_ref[...], n_aud, bf16_exp, out_ref.dtype)

        @pl.when(jnp.logical_not(is_im_side))
        def _():
            out_ref[...] = _side_compute(x, im_ref[...], n_im, bf16_exp, out_ref.dtype)

    # Rough VMEM budget: resident y's (x2 in case the single-buffer request is not
    # honoured) + double-buffered x/out tiles + f32 score/exp temporaries with margin.
    # TODO(synk): for very large Ny (>~8-16K rows) switch to an online-softmax loop over
    # Ny chunks instead of materialising the full (tm, Ny) f32 scores.
    itemsize = jnp.dtype(cdt).itemsize
    est = (2 * (n_aud_res + n_im_res) * d_pad * itemsize
           + 2 * tm * d_pad * (itemsize + jnp.dtype(out_dtype).itemsize)
           + 3 * tm * max(n_aud_res, n_im_res) * 4)
    vmem_limit = max(32 << 20, min(int(1.25 * est) + (2 << 20), 48 << 20))

    def build(single_buffer_resident):
        res_kw = {"pipeline_mode": pl.Buffered(1)} if single_buffer_resident else {}
        return pl.pallas_call(
            kernel,
            out_shape=jax.ShapeDtypeStruct((n_im_rows + n_aud_rows, d_pad), out_dtype),
            grid=grid,
            in_specs=[
                pl.BlockSpec((tm, d_pad), lambda i: (i, 0)),            # row tile of [im;aud]
                # Constant index_map -> fetched once; single-buffered to halve VMEM use.
                pl.BlockSpec((n_aud_res, d_pad), lambda i: (0, 0), **res_kw),
                pl.BlockSpec((n_im_res, d_pad), lambda i: (0, 0), **res_kw),
            ],
            out_specs=pl.BlockSpec((tm, d_pad), lambda i: (i, 0)),
            compiler_params=pltpu.CompilerParams(
                dimension_semantics=("parallel",),                      # megacore sharding
                vmem_limit_bytes=vmem_limit),
        )

    try:
        out = build(True)(x_cat, aud_res, im_res)
    except Exception:
        # Pallas builds without single-buffer support: fall back to default buffering.
        out = build(False)(x_cat, aud_res, im_res)

    im_rec = out[:n_im, :d]
    aud_rec = out[n_im_rows:n_im_rows + n_aud, :d]
    return im_rec, aud_rec


def _re_feats_ref(im, aud):
    """Pure-JAX f32 reference mirroring the PyTorch forward, for correctness check."""
    im = im.astype(jnp.float32)
    aud = aud.astype(jnp.float32)
    scores = im @ aud.T
    lk = jnp.where(scores >= 0, scores, LEAKY_SLOPE * scores)
    s1, s2 = lk, lk.T
    s1 = s1 / (jnp.sqrt(jnp.sum(s1 ** 2, axis=1, keepdims=True)) + EPS)
    s2 = s2 / (jnp.sqrt(jnp.sum(s2 ** 2, axis=1, keepdims=True)) + EPS)
    s1 = jax.nn.softmax(s1 * SMOOTH, axis=-1)
    s2 = jax.nn.softmax(s2 * SMOOTH, axis=-1)
    return s1 @ aud, s2 @ im


if __name__ == "__main__":
    key = jax.random.PRNGKey(0)
    k1, k2 = jax.random.split(key)
    # Deliberately NOT multiples of 8/128: exercises row/feature padding and the
    # padded-score-column masking path on both sides.
    n_im, n_aud, d = 200, 120, 96
    im = jax.random.normal(k1, (n_im, d), dtype=jnp.float32)
    aud = jax.random.normal(k2, (n_aud, d), dtype=jnp.float32)
    # As in the original pipeline, inputs are typically pre-L2-normalized features.
    im = im / jnp.linalg.norm(im, axis=1, keepdims=True)
    aud = aud / jnp.linalg.norm(aud, axis=1, keepdims=True)

    im_rec, aud_rec = re_feats(im, aud)
    jax.block_until_ready((im_rec, aud_rec))

    im_ref, aud_ref = _re_feats_ref(im, aud)
    assert im_rec.shape == (n_im, d) and aud_rec.shape == (n_aud, d)
    # Tolerance accounts for the deliberate bf16 MXU operands / bf16 EUP exp and the
    # approximate softmax-denominator reciprocal, compared against a pure-f32 reference.
    assert jnp.allclose(im_rec, im_ref, atol=1e-2, rtol=1e-2), \
        float(jnp.max(jnp.abs(im_rec - im_ref)))
    assert jnp.allclose(aud_rec, aud_ref, atol=1e-2, rtol=1e-2), \
        float(jnp.max(jnp.abs(aud_rec - aud_ref)))
    print("KERNEL_OK")
</pallas_src>

<mosaic_0001>
module attributes {stable_mosaic.version = 11 : i64} {
  func.func @kernel(%arg0: i32, %arg1: memref<128x128xbf16, #tpu.memory_space<vmem>>, %arg2: memref<128x128xbf16, #tpu.memory_space<vmem>>, %arg3: memref<256x128xbf16, #tpu.memory_space<vmem>>, %arg4: memref<128x128xf32, #tpu.memory_space<vmem>>) attributes {dimension_semantics = [#tpu.dimension_semantics<parallel>], iteration_bounds = array<i64: 3>, scalar_prefetch = 0 : i64, scratch_operands = 0 : i64, tpu.core_type = #tpu.core_type<tc>, window_params = [{transform_indices = @transform_0, window_bounds = array<i64: 128, 128>}, {pipeline_mode = #tpu.pipeline_mode<synchronous>, transform_indices = @transform_1, window_bounds = array<i64: 128, 128>}, {pipeline_mode = #tpu.pipeline_mode<synchronous>, transform_indices = @transform_2, window_bounds = array<i64: 256, 128>}, {transform_indices = @transform_3, window_bounds = array<i64: 128, 128>}]} {
    %c0 = arith.constant 0 : index
    %c0_0 = arith.constant 0 : index
    %0 = vector.load %arg1[%c0, %c0_0] : memref<128x128xbf16, #tpu.memory_space<vmem>>, vector<128x128xbf16>
    %c2_i32 = arith.constant 2 : i32
    %1 = arith.cmpi slt, %arg0, %c2_i32 : i32
    %2 = arith.extui %1 : i1 to i32
    %c0_i32 = arith.constant 0 : i32
    %3 = arith.cmpi ne, %2, %c0_i32 : i32
    scf.if %3 {
      %c0_2 = arith.constant 0 : index
      %c0_3 = arith.constant 0 : index
      %7 = vector.load %arg2[%c0_2, %c0_3] : memref<128x128xbf16, #tpu.memory_space<vmem>>, vector<128x128xbf16>
      %cst = arith.constant dense<0.000000e+00> : vector<128x128xf32>
      %8 = tpu.matmul %0, %7, %cst {dimension_numbers = #tpu.dot_dimension_numbers<[1], [1], [0], [0], [0, 0, 1, 0], [], []>} : vector<128x128xbf16>, vector<128x128xbf16>, vector<128x128xf32> -> vector<128x128xf32>
      %cst_4 = arith.constant 0.000000e+00 : f32
      %9 = vector.broadcast %cst_4 : f32 to vector<128x128xf32>
      %10 = arith.cmpf oge, %8, %9 : vector<128x128xf32>
      %cst_5 = arith.constant 1.000000e-01 : f32
      %11 = vector.broadcast %cst_5 : f32 to vector<128x128xf32>
      %12 = arith.mulf %11, %8 : vector<128x128xf32>
      %13 = arith.select %10, %8, %12 : vector<128x128xi1>, vector<128x128xf32>
      %14 = arith.mulf %13, %13 : vector<128x128xf32>
      %cst_6 = arith.constant dense<0.000000e+00> : vector<128xf32>
      %15 = vector.multi_reduction <add>, %14, %cst_6 [1] : vector<128x128xf32> to vector<128xf32>
      %16 = vector.shape_cast %15 : vector<128xf32> to vector<128x1xf32>
      %cst_7 = arith.constant 9.99999993E-9 : f32
      %17 = vector.broadcast %cst_7 : f32 to vector<128x1xf32>
      %18 = arith.addf %16, %17 : vector<128x1xf32>
      %19 = math.rsqrt %18 : vector<128x1xf32>
      %cst_8 = arith.constant 6.000000e+00 : f32
      %20 = vector.broadcast %cst_8 : f32 to vector<128x1xf32>
      %21 = arith.mulf %20, %19 : vector<128x1xf32>
      %22 = vector.broadcast %21 : vector<128x1xf32> to vector<128x128xf32>
      %23 = arith.mulf %13, %22 : vector<128x128xf32>
      %24 = math.exp %23 : vector<128x128xf32>
      %25 = tpu.iota {dimensions = array<i32: 1>} : vector<128x128xi32>
      %c120_i32 = arith.constant 120 : i32
      %26 = vector.broadcast %c120_i32 : i32 to vector<128x128xi32>
      %27 = arith.cmpi slt, %25, %26 : vector<128x128xi32>
      %cst_9 = arith.constant 0.000000e+00 : f32
      %28 = vector.broadcast %cst_9 : f32 to vector<128x128xf32>
      %29 = arith.select %27, %24, %28 : vector<128x128xi1>, vector<128x128xf32>
      %cst_10 = arith.constant dense<0.000000e+00> : vector<128xf32>
      %30 = vector.multi_reduction <add>, %29, %cst_10 [1] : vector<128x128xf32> to vector<128xf32>
      %31 = vector.shape_cast %30 : vector<128xf32> to vector<128x1xf32>
      %32 = tpu.reciprocal %31 {approx = true} : vector<128x1xf32> -> vector<128x1xf32>
      %33 = vector.broadcast %32 : vector<128x1xf32> to vector<128x128xf32>
      %34 = arith.mulf %29, %33 : vector<128x128xf32>
      %35 = arith.truncf %34 : vector<128x128xf32> to vector<128x128xbf16>
      %cst_11 = arith.constant dense<0.000000e+00> : vector<128x128xf32>
      %36 = tpu.matmul %35, %7, %cst_11 {dimension_numbers = #tpu.dot_dimension_numbers<[1], [0], [0], [1], [0, 0, 1, 1], [], []>} : vector<128x128xbf16>, vector<128x128xbf16>, vector<128x128xf32> -> vector<128x128xf32>
      %c0_12 = arith.constant 0 : index
      %c0_13 = arith.constant 0 : index
      %37 = vector.load %arg4[%c0_12, %c0_13] : memref<128x128xf32, #tpu.memory_space<vmem>>, vector<128x128xf32>
      tpu.vector_store %arg4[%c0_12, %c0_13], %36 {strides = array<i32>} : memref<128x128xf32, #tpu.memory_space<vmem>>, vector<128x128xf32>,
    } else {
    }
    %true = arith.constant true
    %4 = arith.xori %1, %true : i1
    %5 = arith.extui %4 : i1 to i32
    %c0_i32_1 = arith.constant 0 : i32
    %6 = arith.cmpi ne, %5, %c0_i32_1 : i32
    scf.if %6 {
      %c0_2 = arith.constant 0 : index
      %c0_3 = arith.constant 0 : index
      %7 = vector.load %arg3[%c0_2, %c0_3] : memref<256x128xbf16, #tpu.memory_space<vmem>>, vector<256x128xbf16>
      %cst = arith.constant dense<0.000000e+00> : vector<128x256xf32>
      %8 = tpu.matmul %0, %7, %cst {dimension_numbers = #tpu.dot_dimension_numbers<[1], [1], [0], [0], [0, 0, 1, 0], [], []>} : vector<128x128xbf16>, vector<256x128xbf16>, vector<128x256xf32> -> vector<128x256xf32>
      %cst_4 = arith.constant 0.000000e+00 : f32
      %9 = vector.broadcast %cst_4 : f32 to vector<128x256xf32>
      %10 = arith.cmpf oge, %8, %9 : vector<128x256xf32>
      %cst_5 = arith.constant 1.000000e-01 : f32
      %11 = vector.broadcast %cst_5 : f32 to vector<128x256xf32>
      %12 = arith.mulf %11, %8 : vector<128x256xf32>
      %13 = arith.select %10, %8, %12 : vector<128x256xi1>, vector<128x256xf32>
      %14 = arith.mulf %13, %13 : vector<128x256xf32>
      %cst_6 = arith.constant dense<0.000000e+00> : vector<128xf32>
      %15 = vector.multi_reduction <add>, %14, %cst_6 [1] : vector<128x256xf32> to vector<128xf32>
      %16 = vector.shape_cast %15 : vector<128xf32> to vector<128x1xf32>
      %cst_7 = arith.constant 9.99999993E-9 : f32
      %17 = vector.broadcast %cst_7 : f32 to vector<128x1xf32>
      %18 = arith.addf %16, %17 : vector<128x1xf32>
      %19 = math.rsqrt %18 : vector<128x1xf32>
      %cst_8 = arith.constant 6.000000e+00 : f32
      %20 = vector.broadcast %cst_8 : f32 to vector<128x1xf32>
      %21 = arith.mulf %20, %19 : vector<128x1xf32>
      %22 = vector.broadcast %21 : vector<128x1xf32> to vector<128x256xf32>
      %23 = arith.mulf %13, %22 : vector<128x256xf32>
      %24 = math.exp %23 : vector<128x256xf32>
      %25 = tpu.iota {dimensions = array<i32: 1>} : vector<128x256xi32>
      %c200_i32 = arith.constant 200 : i32
      %26 = vector.broadcast %c200_i32 : i32 to vector<128x256xi32>
      %27 = arith.cmpi slt, %25, %26 : vector<128x256xi32>
      %cst_9 = arith.constant 0.000000e+00 : f32
      %28 = vector.broadcast %cst_9 : f32 to vector<128x256xf32>
      %29 = arith.select %27, %24, %28 : vector<128x256xi1>, vector<128x256xf32>
      %cst_10 = arith.constant dense<0.000000e+00> : vector<128xf32>
      %30 = vector.multi_reduction <add>, %29, %cst_10 [1] : vector<128x256xf32> to vector<128xf32>
      %31 = vector.shape_cast %30 : vector<128xf32> to vector<128x1xf32>
      %32 = tpu.reciprocal %31 {approx = true} : vector<128x1xf32> -> vector<128x1xf32>
      %33 = vector.broadcast %32 : vector<128x1xf32> to vector<128x256xf32>
      %34 = arith.mulf %29, %33 : vector<128x256xf32>
      %35 = arith.truncf %34 : vector<128x256xf32> to vector<128x256xbf16>
      %cst_11 = arith.constant dense<0.000000e+00> : vector<128x128xf32>
      %36 = tpu.matmul %35, %7, %cst_11 {dimension_numbers = #tpu.dot_dimension_numbers<[1], [0], [0], [1], [0, 0, 1, 1], [], []>} : vector<128x256xbf16>, vector<256x128xbf16>, vector<128x128xf32> -> vector<128x128xf32>
      %c0_12 = arith.constant 0 : index
      %c0_13 = arith.constant 0 : index
      %37 = vector.load %arg4[%c0_12, %c0_13] : memref<128x128xf32, #tpu.memory_space<vmem>>, vector<128x128xf32>
      tpu.vector_store %arg4[%c0_12, %c0_13], %36 {strides = array<i32>} : memref<128x128xf32, #tpu.memory_space<vmem>>, vector<128x128xf32>,
    } else {
    }
    return
  }
  func.func @transform_0(%arg0: i32) -> (i32, i32) {
    %c0_i32 = arith.constant 0 : i32
    %c0_i32_0 = arith.constant 0 : i32
    return %arg0, %c0_i32 : i32, i32
  }
  func.func @transform_1(%arg0: i32) -> (i32, i32) {
    %c0_i32 = arith.constant 0 : i32
    %c0_i32_0 = arith.constant 0 : i32
    %c0_i32_1 = arith.constant 0 : i32
    return %c0_i32, %c0_i32_0 : i32, i32
  }
  func.func @transform_2(%arg0: i32) -> (i32, i32) {
    %c0_i32 = arith.constant 0 : i32
    %c0_i32_0 = arith.constant 0 : i32
    %c0_i32_1 = arith.constant 0 : i32
    return %c0_i32, %c0_i32_0 : i32, i32
  }
  func.func @transform_3(%arg0: i32) -> (i32, i32) {
    %c0_i32 = arith.constant 0 : i32
    %c0_i32_0 = arith.constant 0 : i32
    return %arg0, %c0_i32 : i32, i32
  }
}

module attributes {stable_mosaic.version = 11 : i64} {
  func.func @kernel(%arg0: i32, %arg1: memref<128x128xbf16, #tpu.memory_space<vmem>>, %arg2: memref<128x128xbf16, #tpu.memory_space<vmem>>, %arg3: memref<256x128xbf16, #tpu.memory_space<vmem>>, %arg4: memref<128x128xf32, #tpu.memory_space<vmem>>) attributes {dimension_semantics = [#tpu.dimension_semantics<parallel>], iteration_bounds = array<i64: 3>, scalar_prefetch = 0 : i64, scratch_operands = 0 : i64, tpu.core_type = #tpu.core_type<tc>, window_params = [{transform_indices = @transform_0, window_bounds = array<i64: 128, 128>}, {pipeline_mode = #tpu.pipeline_mode<synchronous>, transform_indices = @transform_1, window_bounds = array<i64: 128, 128>}, {pipeline_mode = #tpu.pipeline_mode<synchronous>, transform_indices = @transform_2, window_bounds = array<i64: 256, 128>}, {transform_indices = @transform_3, window_bounds = array<i64: 128, 128>}]} {
    %c0 = arith.constant 0 : index
    %c0_0 = arith.constant 0 : index
    %0 = vector.load %arg1[%c0, %c0_0] : memref<128x128xbf16, #tpu.memory_space<vmem>>, vector<128x128xbf16>
    %c2_i32 = arith.constant 2 : i32
    %1 = arith.cmpi slt, %arg0, %c2_i32 : i32
    %2 = arith.extui %1 : i1 to i32
    %c0_i32 = arith.constant 0 : i32
    %3 = arith.cmpi ne, %2, %c0_i32 : i32
    scf.if %3 {
      %c0_2 = arith.constant 0 : index
      %c0_3 = arith.constant 0 : index
      %7 = vector.load %arg2[%c0_2, %c0_3] : memref<128x128xbf16, #tpu.memory_space<vmem>>, vector<128x128xbf16>
      %cst = arith.constant dense<0.000000e+00> : vector<128x128xf32>
      %8 = tpu.matmul %0, %7, %cst {dimension_numbers = #tpu.dot_dimension_numbers<[1], [1], [0], [0], [0, 0, 1, 0], [], []>} : vector<128x128xbf16>, vector<128x128xbf16>, vector<128x128xf32> -> vector<128x128xf32>
      %cst_4 = arith.constant 0.000000e+00 : f32
      %9 = vector.broadcast %cst_4 : f32 to vector<128x128xf32>
      %10 = arith.cmpf oge, %8, %9 : vector<128x128xf32>
      %cst_5 = arith.constant 1.000000e-01 : f32
      %11 = vector.broadcast %cst_5 : f32 to vector<128x128xf32>
      %12 = arith.mulf %11, %8 : vector<128x128xf32>
      %13 = arith.select %10, %8, %12 : vector<128x128xi1>, vector<128x128xf32>
      %14 = arith.mulf %13, %13 : vector<128x128xf32>
      %cst_6 = arith.constant dense<0.000000e+00> : vector<128xf32>
      %15 = vector.multi_reduction <add>, %14, %cst_6 [1] : vector<128x128xf32> to vector<128xf32>
      %16 = vector.shape_cast %15 : vector<128xf32> to vector<128x1xf32>
      %cst_7 = arith.constant 9.99999993E-9 : f32
      %17 = vector.broadcast %cst_7 : f32 to vector<128x1xf32>
      %18 = arith.addf %16, %17 : vector<128x1xf32>
      %19 = math.rsqrt %18 : vector<128x1xf32>
      %cst_8 = arith.constant 6.000000e+00 : f32
      %20 = vector.broadcast %cst_8 : f32 to vector<128x1xf32>
      %21 = arith.mulf %20, %19 : vector<128x1xf32>
      %22 = vector.broadcast %21 : vector<128x1xf32> to vector<128x128xf32>
      %23 = arith.mulf %13, %22 : vector<128x128xf32>
      %24 = math.exp %23 : vector<128x128xf32>
      %25 = tpu.iota {dimensions = array<i32: 1>} : vector<128x128xi32>
      %c120_i32 = arith.constant 120 : i32
      %26 = vector.broadcast %c120_i32 : i32 to vector<128x128xi32>
      %27 = arith.cmpi slt, %25, %26 : vector<128x128xi32>
      %cst_9 = arith.constant 0.000000e+00 : f32
      %28 = vector.broadcast %cst_9 : f32 to vector<128x128xf32>
      %29 = arith.select %27, %24, %28 : vector<128x128xi1>, vector<128x128xf32>
      %cst_10 = arith.constant dense<0.000000e+00> : vector<128xf32>
      %30 = vector.multi_reduction <add>, %29, %cst_10 [1] : vector<128x128xf32> to vector<128xf32>
      %31 = vector.shape_cast %30 : vector<128xf32> to vector<128x1xf32>
      %32 = tpu.reciprocal %31 {approx = true} : vector<128x1xf32> -> vector<128x1xf32>
      %33 = vector.broadcast %32 : vector<128x1xf32> to vector<128x128xf32>
      %34 = arith.mulf %29, %33 : vector<128x128xf32>
      %35 = arith.truncf %34 : vector<128x128xf32> to vector<128x128xbf16>
      %cst_11 = arith.constant dense<0.000000e+00> : vector<128x128xf32>
      %36 = tpu.matmul %35, %7, %cst_11 {dimension_numbers = #tpu.dot_dimension_numbers<[1], [0], [0], [1], [0, 0, 1, 1], [], []>} : vector<128x128xbf16>, vector<128x128xbf16>, vector<128x128xf32> -> vector<128x128xf32>
      %c0_12 = arith.constant 0 : index
      %c0_13 = arith.constant 0 : index
      %37 = vector.load %arg4[%c0_12, %c0_13] : memref<128x128xf32, #tpu.memory_space<vmem>>, vector<128x128xf32>
      tpu.vector_store %arg4[%c0_12, %c0_13], %36 {strides = array<i32>} : memref<128x128xf32, #tpu.memory_space<vmem>>, vector<128x128xf32>,
    } else {
    }
    %true = arith.constant true
    %4 = arith.xori %1, %true : i1
    %5 = arith.extui %4 : i1 to i32
    %c0_i32_1 = arith.constant 0 : i32
    %6 = arith.cmpi ne, %5, %c0_i32_1 : i32
    scf.if %6 {
      %c0_2 = arith.constant 0 : index
      %c0_3 = arith.constant 0 : index
      %7 = vector.load %arg3[%c0_2, %c0_3] : memref<256x128xbf16, #tpu.memory_space<vmem>>, vector<256x128xbf16>
      %cst = arith.constant dense<0.000000e+00> : vector<128x256xf32>
      %8 = tpu.matmul %0, %7, %cst {dimension_numbers = #tpu.dot_dimension_numbers<[1], [1], [0], [0], [0, 0, 1, 0], [], []>} : vector<128x128xbf16>, vector<256x128xbf16>, vector<128x256xf32> -> vector<128x256xf32>
      %cst_4 = arith.constant 0.000000e+00 : f32
      %9 = vector.broadcast %cst_4 : f32 to vector<128x256xf32>
      %10 = arith.cmpf oge, %8, %9 : vector<128x256xf32>
      %cst_5 = arith.constant 1.000000e-01 : f32
      %11 = vector.broadcast %cst_5 : f32 to vector<128x256xf32>
      %12 = arith.mulf %11, %8 : vector<128x256xf32>
      %13 = arith.select %10, %8, %12 : vector<128x256xi1>, vector<128x256xf32>
      %14 = arith.mulf %13, %13 : vector<128x256xf32>
      %cst_6 = arith.constant dense<0.000000e+00> : vector<128xf32>
      %15 = vector.multi_reduction <add>, %14, %cst_6 [1] : vector<128x256xf32> to vector<128xf32>
      %16 = vector.shape_cast %15 : vector<128xf32> to vector<128x1xf32>
      %cst_7 = arith.constant 9.99999993E-9 : f32
      %17 = vector.broadcast %cst_7 : f32 to vector<128x1xf32>
      %18 = arith.addf %16, %17 : vector<128x1xf32>
      %19 = math.rsqrt %18 : vector<128x1xf32>
      %cst_8 = arith.constant 6.000000e+00 : f32
      %20 = vector.broadcast %cst_8 : f32 to vector<128x1xf32>
      %21 = arith.mulf %20, %19 : vector<128x1xf32>
      %22 = vector.broadcast %21 : vector<128x1xf32> to vector<128x256xf32>
      %23 = arith.mulf %13, %22 : vector<128x256xf32>
      %24 = math.exp %23 : vector<128x256xf32>
      %25 = tpu.iota {dimensions = array<i32: 1>} : vector<128x256xi32>
      %c200_i32 = arith.constant 200 : i32
      %26 = vector.broadcast %c200_i32 : i32 to vector<128x256xi32>
      %27 = arith.cmpi slt, %25, %26 : vector<128x256xi32>
      %cst_9 = arith.constant 0.000000e+00 : f32
      %28 = vector.broadcast %cst_9 : f32 to vector<128x256xf32>
      %29 = arith.select %27, %24, %28 : vector<128x256xi1>, vector<128x256xf32>
      %cst_10 = arith.constant dense<0.000000e+00> : vector<128xf32>
      %30 = vector.multi_reduction <add>, %29, %cst_10 [1] : vector<128x256xf32> to vector<128xf32>
      %31 = vector.shape_cast %30 : vector<128xf32> to vector<128x1xf32>
      %32 = tpu.reciprocal %31 {approx = true} : vector<128x1xf32> -> vector<128x1xf32>
      %33 = vector.broadcast %32 : vector<128x1xf32> to vector<128x256xf32>
      %34 = arith.mulf %29, %33 : vector<128x256xf32>
      %35 = arith.truncf %34 : vector<128x256xf32> to vector<128x256xbf16>
      %cst_11 = arith.constant dense<0.000000e+00> : vector<128x128xf32>
      %36 = tpu.matmul %35, %7, %cst_11 {dimension_numbers = #tpu.dot_dimension_numbers<[1], [0], [0], [1], [0, 0, 1, 1], [], []>} : vector<128x256xbf16>, vector<256x128xbf16>, vector<128x128xf32> -> vector<128x128xf32>
      %c0_12 = arith.constant 0 : index
      %c0_13 = arith.constant 0 : index
      %37 = vector.load %arg4[%c0_12, %c0_13] : memref<128x128xf32, #tpu.memory_space<vmem>>, vector<128x128xf32>
      tpu.vector_store %arg4[%c0_12, %c0_13], %36 {strides = array<i32>} : memref<128x128xf32, #tpu.memory_space<vmem>>, vector<128x128xf32>,
    } else {
    }
    return
  }
  func.func @transform_0(%arg0: i32) -> (i32, i32) {
    %c0_i32 = arith.constant 0 : i32
    %c0_i32_0 = arith.constant 0 : i32
    return %arg0, %c0_i32 : i32, i32
  }
  func.func @transform_1(%arg0: i32) -> (i32, i32) {
    %c0_i32 = arith.constant 0 : i32
    %c0_i32_0 = arith.constant 0 : i32
    %c0_i32_1 = arith.constant 0 : i32
    return %c0_i32, %c0_i32_0 : i32, i32
  }
  func.func @transform_2(%arg0: i32) -> (i32, i32) {
    %c0_i32 = arith.constant 0 : i32
    %c0_i32_0 = arith.constant 0 : i32
    %c0_i32_1 = arith.constant 0 : i32
    return %c0_i32, %c0_i32_0 : i32, i32
  }
  func.func @transform_3(%arg0: i32) -> (i32, i32) {
    %c0_i32 = arith.constant 0 : i32
    %c0_i32_0 = arith.constant 0 : i32
    return %arg0, %c0_i32 : i32, i32
  }
}

</mosaic_0001>

<bundles_post_ra>
// kernel: tpu_custom_call.1
= control target key start
LH: loop header
LB: loop body
LE: loop exit
PB: predicated region body
PF: predicated region fallthrough
CT: control target
= control target key end

     0   :  { %8 = vsyncpa [#allocation3], 0  ;;  %s3377_s0 = inlined_call_operand.hbm [shape: bf16[384,128], index: 0, kind: input, shape index: {}]   ;;  %s3378_s1 = inlined_call_operand.hbm [shape: bf16[128,128], index: 1, kind: input, shape index: {}]   ;;  %s3379_s2 = inlined_call_operand.hbm [shape: bf16[256,128], index: 2, kind: input, shape index: {}]   ;;  %s3380_s3 = inlined_call_operand.hbm [shape: f32[384,128], index: 3, kind: output, shape index: {}]  }
   0x1   :  { %10 = vsyncpa [#allocation3 + $0x1], 0 }
   0x2   :  { %11 = vsyncpa [#allocation6], 0 }
   0x3   :  { %12 = vsyncpa [#allocation4], 0 }
   0x4   :  { %14 = vsyncpa [#allocation4 + $0x1], 0  ;;  %s2578_s12 = smov 0   ;;  %s2580_s13 = smov 0  }
   0x5   :  { %s2582_s14 = smov 0   ;;  %s2584_s15 = smov 0  }
   0x6 LB: > { %s2599_s16 = sadd.s32 4294967295, %s2548_s15   ;;  %s1827_s17 = sadd.s32 4294967294, %s2548_s15   ;;  %s2548_s15 = sphi %s2584_s15, %s3400_s15   ;;  %s2544_s14 = sphi %s2582_s14, %s3399_s14   ;;  %s2540_s13 = sphi %s2580_s13, %s3398_s13   ;;  %s2536_s12 = sphi %s2578_s12, %s3397_s12  }
   0x7   : > { %p40_p0 = scmp.ne.s32.totalorder %s2540_s13, %s2536_s12  ;;  %p3381_p1 = scmp.eq.s32.totalorder %s2599_s16, 0 }
   0x8   : > { %p106_p2 = scmp.eq.s32.totalorder %s2599_s16, 2  ;;  %p112_p3 = scmp.eq.s32.totalorder %s1827_s17, 2 }
   0x9   : > { %p2608_p4 = por %p3381_p1, %p40_p0  ;;  %p1828_p5 = scmp.ge.s32.totalorder %s2548_s15, 1 }
   0xa   : > { %p2613_p6 = por %p112_p3, %p40_p0  ;;  %p119_p7 = scmp.lt.s32.totalorder %s2548_s15, 4 }
   0xb   : > { %s3385_s18 = scalar_select %p2608_p4, 1, 0 }
   0xc   : > { %s3386_s19 = scalar_select %p2613_p6, 1, 0 }
   0xd   : > { %p2618_p8 = pnand %p1828_p5, %p119_p7  ;;  %s2550_s21 = smov [#allocation5]  }
   0xe   : > { %s131_s22 = sshll.u32 %s2550_s21, 4  ;;  %s2551_s24 = smov [#allocation7]   ;;  %s132_s22 = int_to_ptr.vmem [resolvable:$true] %s131_s22 }
   0xf   : > { %s3387_s20 = scalar_select %p2618_p8, 1, 0 }
  0x10   : > { %p2093_p9 = pneg %p2618_p8  ;;  %s144_s25 = sshll.u32 %s2551_s24, 4  ;;  %s145_s25 = int_to_ptr.vmem [resolvable:$true] %s144_s25 }
  0x11   : > { %s2411_s26 = scalar_lea.vmem %s132_s22, 1024  ;;  %p2419_p3 = scmp.lt.s32.totalorder %s132_s22, %s132_s22 }
  0x12   : > { %p2626_p10 = pnand %p2093_p9, %p3381_p1  ;;  %p2412_p12 = scmp.ne.s32.totalorder %s132_s22, %s2411_s26 }
  0x13   : > { %p2420_p5 = scmp.lt.s32.totalorder %s2411_s26, %s2411_s26 }
  0x14   : > { %p2402_p11 = pneg %p2626_p10 }
  0x15   : > { %p2421_p7 = por %p2420_p5, %p2419_p3 }
  0x16   : > { %p2414_p13 = pnand %p2412_p12, %p2402_p11 }
  0x18   : > { %p2415_p0 = pneg %p2414_p13 }
  0x1a   : > { %p2422_p9 = pnand %p2421_p7, %p2415_p0 }
  0x1c   : > { %2425 = shalt.err (!%p2422_p9)
}
  0x1d   : > { %s2552_s27 = smov 64   ;;  %s2553_s28 = smov 4  }
  0x1e   : > { %2096 = dma.hbm_to_vmem [thread:$0]  (!%p2626_p10), %s3378_s1, 1024, %s132_s22, [#allocation6], %s2552_s27, %s2552_s27, %s2553_s28  }
  0x1f   : > { %s2437_s4 = scalar_lea.vmem %s145_s25, 2048  ;;  %p2445_p0 = scmp.lt.s32.totalorder %s145_s25, %s145_s25 }
  0x20   : > { %p2438_p12 = scmp.ne.s32.totalorder %s145_s25, %s2437_s4  ;;  %p2446_p5 = scmp.lt.s32.totalorder %s2437_s4, %s2437_s4 }
  0x22   : > { %p2440_p13 = pnand %p2438_p12, %p2402_p11  ;;  %p2447_p7 = por %p2446_p5, %p2445_p0 }
  0x24   : > { %p2441_p3 = pneg %p2440_p13 }
  0x26   : > { %p2448_p9 = pnand %p2447_p7, %p2441_p3 }
  0x28   : > { %2451 = shalt.err (!%p2448_p9)
}
  0x29   : > { %2099 = dma.hbm_to_vmem [thread:$0]  (!%p2626_p10), %s3379_s2, 2048, %s145_s25, [#allocation6], %s2552_s27, %s2552_s27, %s2553_s28  }
  0x2a   : > { %s2655_s7 = sadd.s32 1, %s2548_s15   ;;  %s27_s8 = sadd.s32 1, %s2544_s14 }
  0x2b   : > { %s24_s9 = ssub.s32 %s2548_s15, %s2655_s7  ;;  %p34_p11 = scmp.ne.s32.totalorder %s2544_s14, %s2540_s13 }
  0x2c   : > { %p25_p12 = scmp.eq.s32.totalorder %s24_s9, 0  ;;  %p35_p13 = scmp.eq.s32.totalorder %s2548_s15, 0 }
  0x2d   : > { %p2665_p3 = por %p106_p2, %p34_p11  ;;  %p2110_p0 = scmp.lt.s32.totalorder %s2548_s15, 3 }
  0x2e   : > { %s2671_s11 = scalar_select %p25_p12, %s2544_s14, %s27_s8  }
  0x2f   : > { %s3389_s10 = scalar_select %p2665_p3, 1, 0 }
  0x30   : > { %p36_p5 = por %p35_p13, %p34_p11  ;;  %s158_s17 = sand.u32 1, %s2544_s14  }
  0x31   : > { %s1832_s21 = sshll.u32 %s158_s17, 6  ;;  %s1887_s22 = sshll.u32 %s2548_s15, 10 }
  0x32   : > { %s2678_s25 = scalar_lea.hbm %s3377_s0, %s1887_s22  ;;  %s162_s26 = scalar_lea.vmem [#allocation2], %s1832_s21 }
  0x33   : > { %s169_s29 = sshll.u32 %s162_s26, 4  ;;  %p2682_p2 = pnand %p2110_p0, %p36_p5  ;;  %s2680_s29 = int_to_ptr.vmem [resolvable:$true] %s169_s29 }
  0x34   : > { %s2686_s4 = scalar_lea.sflag [#allocation3], %s158_s17  ;;  %s2452_s5 = scalar_lea.hbm %s2678_s25, 1024 }
  0x35   : > { %p2453_p10 = scmp.ne.s32.totalorder %s2678_s25, %s2452_s5  ;;  %p2454_p7 = pneg %p2682_p2 }
  0x36   : > { %s2457_s9 = scalar_lea.hbm %s3377_s0, 3072  ;;  %p2458_p12 = scmp.lt.s32.totalorder %s2678_s25, %s3377_s0 }
  0x37   : > { %p2455_p9 = pnand %p2454_p7, %p2453_p10  ;;  %p2459_p13 = scmp.lt.s32.totalorder %s2457_s9, %s2452_s5 }
  0x39   : > { %p2456_p11 = pneg %p2455_p9  ;;  %p2460_p0 = por %p2459_p13, %p2458_p12 }
  0x3b   : > { %p2461_p5 = pnand %p2460_p0, %p2456_p11 }
  0x3d   : > { %2464 = shalt.err (!%p2461_p5)
}
  0x3e   : > { %s2465_s17 = scalar_lea.vmem %s2680_s29, 1024  ;;  %s2554_s23 = smov [#allocation2]  }
  0x3f   : > { %p2466_p1 = scmp.ne.s32.totalorder %s2680_s29, %s2465_s17  ;;  %s2470_s24 = sshll.u32 %s2554_s23, 4  ;;  %s2471_s24 = int_to_ptr.vmem [resolvable:$false] %s2470_s24 }
  0x40   : > { %s2472_s26 = scalar_lea.vmem %s2471_s24, 2048  ;;  %p2473_p9 = scmp.lt.s32.totalorder %s2680_s29, %s2471_s24 }
  0x41   : > { %p2468_p6 = pnand %p2466_p1, %p2454_p7  ;;  %p2474_p3 = scmp.lt.s32.totalorder %s2472_s26, %s2465_s17 }
  0x43   : > { %p2469_p10 = pneg %p2468_p6  ;;  %p2475_p4 = por %p2474_p3, %p2473_p9 }
  0x45   : > { %p2476_p8 = pnand %p2475_p4, %p2469_p10 }
  0x47   : > { %2479 = shalt.err (!%p2476_p8)
}
  0x48   : > { %2103 = dma.hbm_to_vmem [thread:$0]  (!%p2682_p2), %s2678_s25, 1024, %s2680_s29, %s2686_s4, %s2552_s27, %s2552_s27, %s2553_s28  }
  0x49   : > { %p3391_p1 = scmp.ne.s32.totalorder %s3387_s20, 0 }
  0x4a   : > { %s2713_s5 = sand.u32 (!%p3391_p1), 1, %s2540_s13   ;;  %p3392_p4 = scmp.ne.s32.totalorder (!%p3391_p1), %s3385_s18, 0 }
  0x4b   : > { %181 = sbr.rel (%p3391_p1) target bundleno = 1825 (0x721), region = 32  ;;  %s1836_s6 = sshll.u32 (!%p3391_p1), %s2713_s5, 6 }
  0x4c   : > { %s184_s8 = scalar_lea.sflag (!%p3391_p1), [#allocation3], %s2713_s5  ;;  %s187_s9 = scalar_lea.vmem (!%p3391_p1), [#allocation2], %s1836_s6 }
  0x50   : > { %2523 = dma.done.wait (%p3392_p4), %s184_s8, 1024  }
  0x51   : > { %2525 = vsyncadd (%p3392_p4), %s184_s8, 4294966272  ;;  %p3393_p6 = scmp.eq.s32.totalorder %s2599_s16, 0 }
  0x53   : > { %2527 = dma.done.wait (%p3393_p6), [#allocation6], 3072   ;;  %p3394_p8 = pmov %p3393_p6 }
  0x54   : > { %s1839_s20 = sshll.u32 %s2713_s5, 7  ;;  %v2726_v0 = vld [vmem:[%s187_s9] sm:$0xf]  ;;  %v2728_v1 = vld [vmem:[%s187_s9 + $0x4] sm:$0xf]  ;;  %p1840_p3 = scmp.ge.s32.totalorder %s2599_s16, 2 }
  0x55   : > { %2529 = vsyncadd (%p3394_p8), [#allocation6], 4294964224  ;;  %v2730_v2 = vld [vmem:[%s187_s9 + $0x8] sm:$0xf]  ;;  %v2732_v3 = vld [vmem:[%s187_s9 + $0xc] sm:$0xf] }
  0x56   : > { %v2734_v4 = vld [vmem:[%s187_s9 + $0x10] sm:$0xf]  ;;  %v2736_v5 = vld [vmem:[%s187_s9 + $0x14] sm:$0xf]  ;;  %v2738_v6 = vld [vmem:[%s187_s9 + $0x18] sm:$0xf] }
  0x57   : > { %v2740_v7 = vld [vmem:[%s187_s9 + $0x1c] sm:$0xf]  ;;  %v2742_v8 = vld [vmem:[%s187_s9 + $0x20] sm:$0xf]  ;;  %v2744_v9 = vld [vmem:[%s187_s9 + $0x24] sm:$0xf] }
  0x58   : > { %v2746_v10 = vld [vmem:[%s187_s9 + $0x28] sm:$0xf]  ;;  %v2748_v11 = vld [vmem:[%s187_s9 + $0x2c] sm:$0xf]  ;;  %v2750_v12 = vld [vmem:[%s187_s9 + $0x30] sm:$0xf] }
  0x59   : > { %v2752_v13 = vld [vmem:[%s187_s9 + $0x34] sm:$0xf]  ;;  %v2754_v14 = vld [vmem:[%s187_s9 + $0x38] sm:$0xf]  ;;  %v2756_v15 = vld [vmem:[%s187_s9 + $0x3c] sm:$0xf] }
  0x5a   : > { %s2758_s18 = scalar_lea.vmem [#allocation8], %s1839_s20  ;;  %240 = sbr.rel (%p1840_p3) target bundleno = 926 (0x39e), region = 48 }
  0x5f   : > { %v2152_v16 = vld [vmem:[#allocation5 + $0x38] sm:$0xff]   ;;  %v1841_v17 = vcombine.low %v2726_v0, %v2728_v1  ;;  %v2153_v18 = vld [vmem:[#allocation5 + $0x30] sm:$0xff]   ;;  %v2154_v19 = vld [vmem:[#allocation5 + $0x28] sm:$0xff]   ;;  %v1842_v25 = vcombine.low %v2730_v2, %v2732_v3  ;;  %v1843_v26 = vcombine.low %v2734_v4, %v2736_v5  ;;  %v1844_v27 = vcombine.low %v2738_v6, %v2740_v7 }
  0x60   : > { %2017 = vmatprep.subr.bf16.mxu0 %v2152_v16  ;;  %2049 = vmatprep.subr.bf16.mxu1 %v2152_v16  ;;  %v2155_v20 = vld [vmem:[#allocation5 + $0x20] sm:$0xff]   ;;  %v2156_v21 = vld [vmem:[#allocation5 + $0x18] sm:$0xff]   ;;  %v2157_v22 = vld [vmem:[#allocation5 + $0x10] sm:$0xff]   ;;  %v1845_v28 = vcombine.low %v2742_v8, %v2744_v9  ;;  %v1846_v29 = vcombine.low %v2746_v10, %v2748_v11  ;;  %v1847_v30 = vcombine.low %v2750_v12, %v2752_v13 }
  0x61   : > { %2033 = vmatprep.mubr.bf16.mxu0 %v1841_v17  ;;  %2018 = vmatpush3.bf16.xpose.msra.mxu0 %v2152_v16  ;;  %v2158_v23 = vld [vmem:[#allocation5 + $0x8] sm:$0xff]   ;;  %v2159_v24 = vld [vmem:[#allocation5] sm:$0xff]   ;;  %v1848_v31 = vcombine.low %v2754_v14, %v2756_v15 }
  0x62   : > { %2019 = vmatprep.subr.bf16.mxu0 %v2153_v18  ;;  %2050 = vmatpush3.bf16.msra.mxu1 %v2152_v16 }
  0x63   : > { %2051 = vmatprep.subr.bf16.mxu1 %v2153_v18 }
  0x66   : > { %2052 = vmatpush3.bf16.msra.mxu1 %v2153_v18 }
  0x67   : > { %2053 = vmatprep.subr.bf16.mxu1 %v2154_v19 }
  0x69   : > { %2020 = vmatpush3.bf16.xpose.msra.mxu0 %v2153_v18 }
  0x6a   : > { %2021 = vmatprep.subr.bf16.mxu0 %v2154_v19  ;;  %2054 = vmatpush3.bf16.msra.mxu1 %v2154_v19 }
  0x6b   : > { %2055 = vmatprep.subr.bf16.mxu1 %v2155_v20 }
  0x6e   : > { %2056 = vmatpush3.bf16.msra.mxu1 %v2155_v20 }
  0x6f   : > { %2057 = vmatprep.subr.bf16.mxu1 %v2156_v21 }
  0x71   : > { %2022 = vmatpush3.bf16.xpose.msra.mxu0 %v2154_v19 }
  0x72   : > { %2023 = vmatprep.subr.bf16.mxu0 %v2155_v20  ;;  %2058 = vmatpush3.bf16.msra.mxu1 %v2156_v21 }
  0x73   : > { %2059 = vmatprep.subr.bf16.mxu1 %v2157_v22 }
  0x76   : > { %2060 = vmatpush3.bf16.msra.mxu1 %v2157_v22 }
  0x77   : > { %2061 = vmatprep.subr.bf16.mxu1 %v2158_v23 }
  0x79   : > { %2024 = vmatpush3.bf16.xpose.msra.mxu0 %v2155_v20 }
  0x7a   : > { %2025 = vmatprep.subr.bf16.mxu0 %v2156_v21  ;;  %2062 = vmatpush3.bf16.msra.mxu1 %v2158_v23 }
  0x7b   : > { %2063 = vmatprep.subr.bf16.mxu1 %v2159_v24 }
  0x7e   : > { %2064 = vmatpush3.bf16.msra.mxu1 %v2159_v24 }
  0x81   : > { %2026 = vmatpush3.bf16.xpose.msra.mxu0 %v2156_v21 }
  0x82   : > { %2027 = vmatprep.subr.bf16.mxu0 %v2157_v22 }
  0x89   : > { %2028 = vmatpush3.bf16.xpose.msra.mxu0 %v2157_v22 }
  0x8a   : > { %2029 = vmatprep.subr.bf16.mxu0 %v2158_v23 }
  0x91   : > { %2030 = vmatpush3.bf16.xpose.msra.mxu0 %v2158_v23 }
  0x92   : > { %2031 = vmatprep.subr.bf16.mxu0 %v2159_v24 }
  0x99   : > { %2032 = vmatpush3.bf16.xpose.msra.mxu0 %v2159_v24 }
  0xa0   : > { %2034 = vmatmul.mubr.bf16.vlgmr.msra.gmra.mxu0 %v1842_v25 }
  0xa1   : > { %2037 = vmatprep.mubr.bf16.mxu0 %v1843_v26 }
  0xa8   : > { %2038 = vmatmul.mubr.bf16.gmra.mxu0 %v1844_v27 }
  0xa9   : > { %2041 = vmatprep.mubr.bf16.mxu0 %v1845_v28 }
  0xb0   : > { %2042 = vmatmul.mubr.bf16.gmra.mxu0 %v1846_v29 }
  0xb1   : > { %2045 = vmatprep.mubr.bf16.mxu0 %v1847_v30 }
  0xb8   : > { %2046 = vmatmul.mubr.bf16.gmra.mxu0 %v1848_v31 }
 0x160   : > { %v2035_v32 = vpop.f32.mrf.mxu0 }
 0x161   : > { %v468_v33 = vmul.f32 0.1, %v2035_v32  ;;  %vm452_vm0 = vcmp.ge.f32.partialorder %v2035_v32, 0.0 }
 0x162   : > { %v387_v34 = vpop.f32.mrf.mxu0 }
 0x163   : > { %v466_v35 = vmul.f32 0.1, %v387_v34  ;;  %v2777_v36 = vsel %vm452_vm0, %v2035_v32, %v468_v33  ;;  %vm450_vm1 = vcmp.ge.f32.partialorder %v387_v34, 0.0 }
 0x164   : > { %v2036_v37 = vpop.f32.mrf.mxu0  ;;  %v500_v38 = vmul.f32 %v2777_v36, %v2777_v36 }
 0x165   : > { %vm453_vm2 = vcmp.ge.f32.partialorder %v2036_v37, 0.0  ;;  %v469_v39 = vmul.f32 0.1, %v2036_v37  ;;  %v2781_v40 = vsel %vm450_vm1, %v387_v34, %v466_v35 }
 0x166   : > { %518 = vadd.xlane.f32.xlu1 %v500_v38  ;;  %v390_v41 = vpop.f32.mrf.mxu0  ;;  %v498_v42 = vmul.f32 %v2781_v40, %v2781_v40 }
 0x167   : > { %vm451_vm3 = vcmp.ge.f32.partialorder %v390_v41, 0.0  ;;  %v467_v43 = vmul.f32 0.1, %v390_v41  ;;  %v2785_v44 = vsel %vm453_vm2, %v2036_v37, %v469_v39 }
 0x168   : > { %514 = vadd.xlane.f32.xlu0 %v498_v42  ;;  %v2039_v45 = vpop.f32.mrf.mxu0  ;;  %v501_v46 = vmul.f32 %v2785_v44, %v2785_v44 }
 0x169   : > { %v2789_v47 = vsel %vm451_vm3, %v390_v41, %v467_v43  ;;  %v472_v50 = vmul.f32 0.1, %v2039_v45  ;;  %vm456_vm5 = vcmp.ge.f32.partialorder %v2039_v45, 0.0 }
 0x16a   : > { %520 = vadd.xlane.f32.xlu1 %v501_v46  ;;  %v403_v48 = vpop.f32.mrf.mxu0  ;;  %v499_v49 = vmul.f32 %v2789_v47, %v2789_v47 }
 0x16b   : > { %vm454_vm4 = vcmp.ge.f32.partialorder %v403_v48, 0.0  ;;  %v470_v51 = vmul.f32 0.1, %v403_v48  ;;  %v2797_v58 = vsel %vm456_vm5, %v2039_v45, %v472_v50 }
 0x16c   : > { %516 = vadd.xlane.f32.xlu0 %v499_v49  ;;  %v2040_v52 = vpop.f32.mrf.mxu0  ;;  %v504_v62 = vmul.f32 %v2797_v58, %v2797_v58 }
 0x16d   : > { %v2793_v53 = vsel %vm454_vm4, %v403_v48, %v470_v51  ;;  %v473_v56 = vmul.f32 0.1, %v2040_v52  ;;  %vm457_vm7 = vcmp.ge.f32.partialorder %v2040_v52, 0.0 }
 0x16e   : > { %v406_v54 = vpop.f32.mrf.mxu0  ;;  %v502_v55 = vmul.f32 %v2793_v53, %v2793_v53 }
 0x16f   : > { %vm455_vm6 = vcmp.ge.f32.partialorder %v406_v54, 0.0  ;;  %v471_v57 = vmul.f32 0.1, %v406_v54  ;;  %v2805_v18 = vsel %vm457_vm7, %v2040_v52, %v473_v56 }
 0x170   : > { %522 = vadd.xlane.f32.xlu0 %v502_v55  ;;  %v2043_v59 = vpop.f32.mrf.mxu0  ;;  %v505_v22 = vmul.f32 %v2805_v18, %v2805_v18 }
 0x171   : > { %v2799_v60 = vsel %vm455_vm6, %v406_v54, %v471_v57  ;;  %v476_v16 = vmul.f32 0.1, %v2043_v59  ;;  %vm460_vm9 = vcmp.ge.f32.partialorder %v2043_v59, 0.0 }
 0x172   : > { %v419_v61 = vpop.f32.mrf.mxu0  ;;  %v503_v63 = vmul.f32 %v2799_v60, %v2799_v60 }
 0x173   : > { %vm458_vm8 = vcmp.ge.f32.partialorder %v419_v61, 0.0  ;;  %v474_v17 = vmul.f32 0.1, %v419_v61  ;;  %v2813_v26 = vsel %vm460_vm9, %v2043_v59, %v476_v16 }
 0x174   : > { %526 = vadd.xlane.f32.xlu0 %v504_v62  ;;  %524 = vadd.xlane.f32.xlu1 %v503_v63  ;;  %v2044_v19 = vpop.f32.mrf.mxu0  ;;  %v508_v30 = vmul.f32 %v2813_v26, %v2813_v26 }
 0x175   : > { %v2807_v20 = vsel %vm458_vm8, %v419_v61, %v474_v17  ;;  %v477_v24 = vmul.f32 0.1, %v2044_v19  ;;  %vm461_vm11 = vcmp.ge.f32.partialorder %v2044_v19, 0.0 }
 0x176   : > { %v422_v21 = vpop.f32.mrf.mxu0  ;;  %v506_v23 = vmul.f32 %v2807_v20, %v2807_v20 }
 0x177   : > { %vm459_vm10 = vcmp.ge.f32.partialorder %v422_v21, 0.0  ;;  %v475_v25 = vmul.f32 0.1, %v422_v21  ;;  %v2821_v34 = vsel %vm461_vm11, %v2044_v19, %v477_v24 }
 0x178   : > { %528 = vadd.xlane.f32.xlu1 %v505_v22  ;;  %530 = vadd.xlane.f32.xlu0 %v506_v23  ;;  %v2047_v27 = vpop.f32.mrf.mxu0  ;;  %v509_v39 = vmul.f32 %v2821_v34, %v2821_v34 }
 0x179   : > { %v2815_v28 = vsel %vm459_vm10, %v422_v21, %v475_v25  ;;  %v480_v32 = vmul.f32 0.1, %v2047_v27  ;;  %vm464_vm13 = vcmp.ge.f32.partialorder %v2047_v27, 0.0 }
 0x17a   : > { %v435_v29 = vpop.f32.mrf.mxu0  ;;  %v507_v31 = vmul.f32 %v2815_v28, %v2815_v28 }
 0x17b   : > { %vm462_vm12 = vcmp.ge.f32.partialorder %v435_v29, 0.0  ;;  %v478_v33 = vmul.f32 0.1, %v435_v29  ;;  %v2829_v45 = vsel %vm464_vm13, %v2047_v27, %v480_v32 }
 0x17c   : > { %534 = vadd.xlane.f32.xlu0 %v508_v30  ;;  %532 = vadd.xlane.f32.xlu1 %v507_v31  ;;  %v2048_v35 = vpop.f32.mrf.mxu0  ;;  %v512_v48 = vmul.f32 %v2829_v45, %v2829_v45 }
 0x17d   : > { %v2823_v37 = vsel %vm462_vm12, %v435_v29, %v478_v33  ;;  %v481_v42 = vmul.f32 0.1, %v2048_v35  ;;  %vm465_vm15 = vcmp.ge.f32.partialorder %v2048_v35, 0.0 }
 0x17e   : > { %v438_v38 = vpop.f32.mrf.mxu0  ;;  %v510_v41 = vmul.f32 %v2823_v37, %v2823_v37 }
 0x17f   : > { %vm463_vm14 = vcmp.ge.f32.partialorder %v438_v38, 0.0  ;;  %v479_v43 = vmul.f32 0.1, %v438_v38  ;;  %v2837_v50 = vsel %vm465_vm15, %v2048_v35, %v481_v42 }
 0x180   : > { %536 = vadd.xlane.f32.xlu1 %v509_v39  ;;  %538 = vadd.xlane.f32.xlu0 %v510_v41  ;;  %v513_v51 = vmul.f32 %v2837_v50, %v2837_v50 }
 0x181   : > { %v2831_v46 = vsel %vm463_vm14, %v438_v38, %v479_v43 }
 0x182   : > { %v511_v49 = vmul.f32 %v2831_v46, %v2831_v46 }
 0x184   : > { %542 = vadd.xlane.f32.xlu0 %v512_v48  ;;  %540 = vadd.xlane.f32.xlu1 %v511_v49 }
 0x188   : > { %544 = vadd.xlane.f32.xlu1 %v513_v51 }
 0x1ef   : > { %v519_v52 = vpop.xlane.xlu1 %518 }
 0x1f0   : > { %v548_v54 = vadd.f32 1e-08, %v519_v52 }
 0x1f1   : > { %v515_v55 = vpop.xlane.xlu0 %514 }
 0x1f2   : > { %2160 = vrsqrt.f32 %v548_v54  ;;  %v546_v56 = vadd.f32 1e-08, %v515_v55 }
 0x1f3   : > { %v521_v57 = vpop.xlane.xlu1 %520 }
 0x1f4   : > { %2162 = vrsqrt.f32 %v546_v56  ;;  %v549_v59 = vadd.f32 1e-08, %v521_v57 }
 0x1f5   : > { %v517_v61 = vpop.xlane.xlu0 %516 }
 0x1f6   : > { %2164 = vrsqrt.f32 %v549_v59  ;;  %v547_v62 = vadd.f32 1e-08, %v517_v61 }
 0x1f8   : > { %2166 = vrsqrt.f32 %v547_v62 }
 0x1f9   : > { %v523_v63 = vpop.xlane.xlu0 %522 }
 0x1fa   : > { %v550_v16 = vadd.f32 1e-08, %v523_v63 }
 0x1fc   : > { %2168 = vrsqrt.f32 %v550_v16 }
 0x1fd   : > { %v527_v17 = vpop.xlane.xlu0 %526  ;;  %v525_v19 = vpop.xlane.xlu1 %524 }
 0x1fe   : > { %v552_v21 = vadd.f32 1e-08, %v527_v17  ;;  %v551_v22 = vadd.f32 1e-08, %v525_v19 }
 0x1ff   : > { %v2161_v23 = vpop.eup %2160 }
 0x200   : > { %v580_v24 = vmul.f32 6.0, %v2161_v23  ;;  %2170 = vrsqrt.f32 %v552_v21 }
 0x201   : > { %v2163_v25 = vpop.eup %2162  ;;  %2172 = vrsqrt.f32 %v551_v22  ;;  %v529_v27 = vpop.xlane.xlu1 %528  ;;  %v642_v22 = vlaneseq }
 0x202   : > { %v531_v29 = vpop.xlane.xlu0 %530  ;;  %v596_v30 = vmul.f32 %v580_v24, %v2777_v36  ;;  %v578_v31 = vmul.f32 6.0, %v2163_v25  ;;  %v553_v32 = vadd.f32 1e-08, %v529_v27 }
 0x203   : > { %v554_v33 = vadd.f32 1e-08, %v531_v29  ;;  %v2165_v35 = vpop.eup %2164 }
 0x204   : > { %v614_v38 = vmul.f32 1.442695, %v596_v30  ;;  %v594_v39 = vmul.f32 %v578_v31, %v2781_v40  ;;  %v581_v41 = vmul.f32 6.0, %v2165_v35  ;;  %2174 = vrsqrt.f32 %v553_v32 }
 0x205   : > { %v2167_v42 = vpop.eup %2166  ;;  %2176 = vrsqrt.f32 %v554_v33  ;;  %v533_v48 = vpop.xlane.xlu1 %532  ;;  %v2848_v33 = vand.u32 127, %v642_v22 }
 0x206   : > { %v535_v43 = vpop.xlane.xlu0 %534  ;;  %v610_v49 = vmul.f32 1.442695, %v594_v39  ;;  %v597_v51 = vmul.f32 %v581_v41, %v2785_v44  ;;  %v579_v52 = vmul.f32 6.0, %v2167_v42  ;;  %2178 = vpow2.f32 %v614_v38 }
 0x207   : > { %v556_v54 = vadd.f32 1e-08, %v535_v43  ;;  %v555_v36 = vadd.f32 1e-08, %v533_v48  ;;  %vm644_vm0 = vcmp.lt.s32.totalorder %v2848_v33, 120 }
 0x208   : > { %2180 = vpow2.f32 %v610_v49  ;;  %v616_v55 = vmul.f32 1.442695, %v597_v51  ;;  %v595_v56 = vmul.f32 %v579_v52, %v2789_v47 }
 0x209   : > { %v2169_v57 = vpop.eup %2168  ;;  %2182 = vrsqrt.f32 %v556_v54  ;;  %v537_v40 = vpop.xlane.xlu1 %536 }
 0x20a   : > { %v539_v59 = vpop.xlane.xlu0 %538  ;;  %2184 = vpow2.f32 %v616_v55  ;;  %v612_v61 = vmul.f32 1.442695, %v595_v56  ;;  %v582_v62 = vmul.f32 6.0, %v2169_v57  ;;  %v557_v63 = vadd.f32 1e-08, %v537_v40 }
 0x20b   : > { %2186 = vrsqrt.f32 %v555_v36  ;;  %v558_v16 = vadd.f32 1e-08, %v539_v59 }
 0x20c   : > { %2188 = vpow2.f32 %v612_v61  ;;  %v598_v44 = vmul.f32 %v582_v62, %v2793_v53 }
 0x20d   : > { %v2171_v17 = vpop.eup %2170  ;;  %2190 = vrsqrt.f32 %v557_v63  ;;  %v541_v21 = vpop.xlane.xlu1 %540 }
 0x20e   : > { %v543_v19 = vpop.xlane.xlu0 %542  ;;  %v2173_v23 = vpop.eup %2172  ;;  %v618_v47 = vmul.f32 1.442695, %v598_v44  ;;  %v584_v24 = vmul.f32 6.0, %v2171_v17  ;;  %2192 = vrsqrt.f32 %v558_v16  ;;  %v559_v29 = vadd.f32 1e-08, %v541_v21 }
 0x20f   : > { %v560_v25 = vadd.f32 1e-08, %v543_v19  ;;  %v583_v27 = vmul.f32 6.0, %v2173_v23 }
 0x210   : > { %2194 = vpow2.f32 %v618_v47  ;;  %v600_v30 = vmul.f32 %v584_v24, %v2797_v58 }
 0x211   : > { %v2175_v31 = vpop.eup %2174  ;;  %v599_v32 = vmul.f32 %v583_v27, %v2799_v60  ;;  %2196 = vrsqrt.f32 %v560_v25  ;;  %v545_v53 = vpop.xlane.xlu1 %544 }
 0x212   : > { %v2177_v35 = vpop.eup %2176  ;;  %v622_v38 = vmul.f32 1.442695, %v600_v30  ;;  %v585_v39 = vmul.f32 6.0, %v2175_v31  ;;  %2198 = vrsqrt.f32 %v559_v29  ;;  %v561_v41 = vadd.f32 1e-08, %v545_v53 }
 0x213   : > { %v620_v42 = vmul.f32 1.442695, %v599_v32  ;;  %v586_v43 = vmul.f32 6.0, %v2177_v35  ;;  %v2179_v48 = vpop.eup %2178 }
 0x214   : > { %2200 = vpow2.f32 %v622_v38  ;;  %v601_v49 = vmul.f32 %v585_v39, %v2805_v18  ;;  %v2861_v61 = vsel %vm644_vm0, %v2179_v48, 0.0 }
 0x215   : > { %v2181_v51 = vpop.eup %2180  ;;  %2202 = vpow2.f32 %v620_v42  ;;  %v602_v58 = vmul.f32 %v586_v43, %v2807_v20 }
 0x216   : > { %v2183_v60 = vpop.eup %2182  ;;  %v624_v52 = vmul.f32 1.442695, %v601_v49  ;;  %2204 = vrsqrt.f32 %v561_v41  ;;  %v2855_v54 = vsel %vm644_vm0, %v2181_v51, 0.0 }
 0x217   : > { %v2185_v36 = vpop.eup %2184  ;;  %v626_v55 = vmul.f32 1.442695, %v602_v58  ;;  %v588_v56 = vmul.f32 6.0, %v2183_v60  ;;  %661 = vadd.xlane.f32.xlu0 %v2855_v54 }
 0x218   : > { %v2187_v57 = vpop.eup %2186  ;;  %2206 = vpow2.f32 %v624_v52 }
 0x219   : > { %v2189_v18 = vpop.eup %2188  ;;  %2208 = vpow2.f32 %v626_v55  ;;  %v604_v20 = vmul.f32 %v588_v56, %v2813_v26  ;;  %v587_v40 = vmul.f32 6.0, %v2187_v57 }
 0x21a   : > { %v2191_v59 = vpop.eup %2190  ;;  %v2865_v62 = vsel %vm644_vm0, %v2189_v18, 0.0 }
 0x21b   : > { %v2193_v63 = vpop.eup %2192  ;;  %v630_v16 = vmul.f32 1.442695, %v604_v20  ;;  %v603_v44 = vmul.f32 %v587_v40, %v2815_v28  ;;  %v589_v17 = vmul.f32 6.0, %v2191_v59  ;;  %665 = vadd.xlane.f32.xlu0 %v2861_v61  ;;  %663 = vadd.xlane.f32.xlu1 %v2865_v62  ;;  %v2878_v28 = vsel %vm644_vm0, %v2185_v36, 0.0 }
 0x21c   : > { %v590_v26 = vmul.f32 6.0, %v2193_v63 }
 0x21d   : > { %v2195_v19 = vpop.eup %2194  ;;  %2210 = vpow2.f32 %v630_v16  ;;  %v628_v21 = vmul.f32 1.442695, %v603_v44  ;;  %v605_v22 = vmul.f32 %v589_v17, %v2821_v34 }
 0x21e   : > { %v2197_v23 = vpop.eup %2196  ;;  %v606_v47 = vmul.f32 %v590_v26, %v2823_v37  ;;  %v2874_v24 = vsel %vm644_vm0, %v2195_v19, 0.0 }
 0x21f   : > { %v2199_v25 = vpop.eup %2198  ;;  %2212 = vpow2.f32 %v628_v21  ;;  %v632_v27 = vmul.f32 1.442695, %v605_v22  ;;  %v592_v29 = vmul.f32 6.0, %v2197_v23  ;;  %669 = vadd.xlane.f32.xlu0 %v2874_v24  ;;  %667 = vadd.xlane.f32.xlu1 %v2878_v28 }
 0x220   : > { %v634_v34 = vmul.f32 1.442695, %v606_v47  ;;  %v591_v30 = vmul.f32 6.0, %v2199_v25 }
 0x221   : > { %v2201_v31 = vpop.eup %2200  ;;  %2214 = vpow2.f32 %v632_v27  ;;  %v608_v37 = vmul.f32 %v592_v29, %v2829_v45 }
 0x222   : > { %v2203_v32 = vpop.eup %2202  ;;  %2216 = vpow2.f32 %v634_v34  ;;  %v607_v53 = vmul.f32 %v591_v30, %v2831_v46  ;;  %v2886_v35 = vsel %vm644_vm0, %v2201_v31, 0.0 }
 0x223   : > { %v2205_v38 = vpop.eup %2204  ;;  %v638_v39 = vmul.f32 1.442695, %v608_v37  ;;  %673 = vadd.xlane.f32.xlu0 %v2886_v35  ;;  %v2891_v41 = vsel %vm644_vm0, %v2203_v32, 0.0 }
 0x224   : > { %v636_v42 = vmul.f32 1.442695, %v607_v53  ;;  %v593_v43 = vmul.f32 6.0, %v2205_v38  ;;  %671 = vadd.xlane.f32.xlu1 %v2891_v41 }
 0x225   : > { %v2207_v45 = vpop.eup %2206  ;;  %2218 = vpow2.f32 %v638_v39 }
 0x226   : > { %v2209_v48 = vpop.eup %2208  ;;  %2220 = vpow2.f32 %v636_v42  ;;  %v609_v46 = vmul.f32 %v593_v43, %v2837_v50  ;;  %v2897_v49 = vsel %vm644_vm0, %v2207_v45, 0.0 }
 0x227   : > { %v2901_v51 = vsel %vm644_vm0, %v2209_v48, 0.0 }
 0x228   : > { %v640_v58 = vmul.f32 1.442695, %v609_v46  ;;  %677 = vadd.xlane.f32.xlu0 %v2901_v51  ;;  %675 = vadd.xlane.f32.xlu1 %v2897_v49 }
 0x22a   : > { %v2211_v60 = vpop.eup %2210  ;;  %2222 = vpow2.f32 %v640_v58 }
 0x22b   : > { %v2907_v52 = vsel %vm644_vm0, %v2211_v60, 0.0 }
 0x22c   : > { %v2213_v50 = vpop.eup %2212  ;;  %681 = vadd.xlane.f32.xlu0 %v2907_v52 }
 0x22d   : > { %v2912_v36 = vsel %vm644_vm0, %v2213_v50, 0.0 }
 0x22e   : > { %v2215_v55 = vpop.eup %2214  ;;  %679 = vadd.xlane.f32.xlu1 %v2912_v36 }
 0x22f   : > { %v2217_v56 = vpop.eup %2216  ;;  %v2917_v57 = vsel %vm644_vm0, %v2215_v55, 0.0 }
 0x230   : > { %v2921_v18 = vsel %vm644_vm0, %v2217_v56, 0.0 }
 0x231   : > { %685 = vadd.xlane.f32.xlu0 %v2921_v18 }
 0x232   : > { %v2219_v20 = vpop.eup %2218  ;;  %683 = vadd.xlane.f32.xlu1 %v2917_v57 }
 0x233   : > { %v2221_v40 = vpop.eup %2220  ;;  %v2927_v59 = vsel %vm644_vm0, %v2219_v20, 0.0 }
 0x234   : > { %v2931_v63 = vsel %vm644_vm0, %v2221_v40, 0.0 }
 0x235   : > { %689 = vadd.xlane.f32.xlu0 %v2927_v59 }
 0x236   : > { %687 = vadd.xlane.f32.xlu1 %v2931_v63 }
 0x237   : > { %v2223_v16 = vpop.eup %2222 }
 0x238   : > { %v2937_v44 = vsel %vm644_vm0, %v2223_v16, 0.0 }
 0x23a   : > { %691 = vadd.xlane.f32.xlu1 %v2937_v44 }
 0x2a0   : > { %v662_v17 = vpop.xlane.xlu0 %661 }
 0x2a1   : > { %2224 = vrcp.f32 %v662_v17 }
 0x2a4   : > { %v666_v26 = vpop.xlane.xlu0 %665  ;;  %v664_v19 = vpop.xlane.xlu1 %663 }
 0x2a5   : > { %2226 = vrcp.f32 %v664_v19 }
 0x2a6   : > { %2228 = vrcp.f32 %v666_v26 }
 0x2a8   : > { %v670_v21 = vpop.xlane.xlu0 %669  ;;  %v668_v22 = vpop.xlane.xlu1 %667 }
 0x2a9   : > { %2230 = vrcp.f32 %v668_v22 }
 0x2aa   : > { %2232 = vrcp.f32 %v670_v21 }
 0x2ac   : > { %v674_v23 = vpop.xlane.xlu0 %673 }
 0x2ad   : > { %v672_v47 = vpop.xlane.xlu1 %671 }
 0x2ae   : > { %2234 = vrcp.f32 %v672_v47  ;;  %v2225_v25 = vpop.eup %2224 }
 0x2af   : > { %2236 = vrcp.f32 %v674_v23  ;;  %v709_v34 = vmul.f32 %v2225_v25, %v2855_v54 }
 0x2b1   : > { %v678_v33 = vpop.xlane.xlu0 %677  ;;  %v676_v27 = vpop.xlane.xlu1 %675 }
 0x2b2   : > { %v2227_v29 = vpop.eup %2226  ;;  %2238 = vrcp.f32 %v676_v27 }
 0x2b3   : > { %v710_v30 = vmul.f32 %v2227_v29, %v2865_v62  ;;  %v2229_v31 = vpop.eup %2228  ;;  %2240 = vrcp.f32 %v678_v33 }
 0x2b4   : > { %v711_v39 = vmul.f32 %v2229_v31, %v2861_v61 }
 0x2b5   : > { %v682_v37 = vpop.xlane.xlu0 %681  ;;  %v725_v32 = vpack.c.bf16 %v710_v30, %v709_v34 }
 0x2b6   : > { %v2231_v53 = vpop.eup %2230 }
 0x2b7   : > { %v680_v38 = vpop.xlane.xlu1 %679  ;;  %2065 = vmatprep.mubr.bf16.mxu1 %v725_v32  ;;  %v712_v42 = vmul.f32 %v2231_v53, %v2878_v28  ;;  %v2233_v43 = vpop.eup %2232 }
 0x2b8   : > { %2242 = vrcp.f32 %v680_v38  ;;  %v713_v62 = vmul.f32 %v2233_v43, %v2874_v24 }
 0x2b9   : > { %2244 = vrcp.f32 %v682_v37  ;;  %v726_v48 = vpack.c.bf16 %v712_v42, %v711_v39 }
 0x2ba   : > { %v686_v45 = vpop.xlane.xlu0 %685 }
 0x2bb   : > { %v2235_v46 = vpop.eup %2234  ;;  %v684_v54 = vpop.xlane.xlu1 %683  ;;  %2066 = vmatmul.mubr.bf16.vlgmr.msra.gmra.mxu1 %v726_v48 }
 0x2bc   : > { %2246 = vrcp.f32 %v684_v54  ;;  %v714_v58 = vmul.f32 %v2235_v46, %v2891_v41  ;;  %v2237_v60 = vpop.eup %2236 }
 0x2bd   : > { %2248 = vrcp.f32 %v686_v45  ;;  %v715_v28 = vmul.f32 %v2237_v60, %v2886_v35 }
 0x2be   : > { %v727_v50 = vpack.c.bf16 %v714_v58, %v713_v62  ;;  %v690_v55 = vpop.xlane.xlu0 %689 }
 0x2bf   : > { %v688_v56 = vpop.xlane.xlu1 %687  ;;  %v2239_v61 = vpop.eup %2238 }
 0x2c0   : > { %2250 = vrcp.f32 %v688_v56  ;;  %2069 = vmatprep.mubr.bf16.mxu1 %v727_v50  ;;  %v716_v20 = vmul.f32 %v2239_v61, %v2897_v49  ;;  %v2241_v40 = vpop.eup %2240 }
 0x2c1   : > { %2252 = vrcp.f32 %v690_v55  ;;  %v717_v41 = vmul.f32 %v2241_v40, %v2901_v51 }
 0x2c2   : > { %v728_v17 = vpack.c.bf16 %v716_v20, %v715_v28 }
 0x2c3   : > { %v692_v16 = vpop.xlane.xlu1 %691 }
 0x2c4   : > { %2254 = vrcp.f32 %v692_v16  ;;  %2070 = vmatmul.mubr.bf16.gmra.mxu1 %v728_v17 }
 0x2c5   : > { %v2243_v24 = vpop.eup %2242 }
 0x2c6   : > { %v718_v26 = vmul.f32 %v2243_v24, %v2912_v36  ;;  %v2245_v19 = vpop.eup %2244 }
 0x2c7   : > { %v719_v23 = vmul.f32 %v2245_v19, %v2907_v52 }
 0x2c8   : > { %v729_v21 = vpack.c.bf16 %v718_v26, %v717_v41 }
 0x2c9   : > { %v2247_v22 = vpop.eup %2246 }
 0x2ca   : > { %2073 = vmatprep.mubr.bf16.mxu1 %v729_v21  ;;  %v720_v35 = vmul.f32 %v2247_v22, %v2917_v57  ;;  %v2249_v49 = vpop.eup %2248 }
 0x2cb   : > { %v721_v33 = vmul.f32 %v2249_v49, %v2921_v18 }
 0x2cc   : > { %v730_v47 = vpack.c.bf16 %v720_v35, %v719_v23 }
 0x2cd   : > { %v2251_v25 = vpop.eup %2250 }
 0x2ce   : > { %2074 = vmatmul.mubr.bf16.gmra.mxu1 %v730_v47  ;;  %v722_v51 = vmul.f32 %v2251_v25, %v2931_v63  ;;  %v2253_v36 = vpop.eup %2252 }
 0x2cf   : > { %v723_v52 = vmul.f32 %v2253_v36, %v2927_v59 }
 0x2d0   : > { %v731_v27 = vpack.c.bf16 %v722_v51, %v721_v33 }
 0x2d1   : > { %v2255_v29 = vpop.eup %2254 }
 0x2d2   : > { %2077 = vmatprep.mubr.bf16.mxu1 %v731_v27  ;;  %v724_v57 = vmul.f32 %v2255_v29, %v2937_v44 }
 0x2d4   : > { %v732_v34 = vpack.c.bf16 %v724_v57, %v723_v52 }
 0x2d6   : > { %2078 = vmatmul.mubr.bf16.gmra.mxu1 %v732_v34 }
 0x37b   : > { %v2067_v30 = vpop.f32.mrf.mxu1 }
 0x37c   : > { %832 = vst [vmem:[%s2758_s18 + $0x10] sm:$0xff] %v2067_v30 }
 0x37d   : > { %v767_v18 = vpop.f32.mrf.mxu1 }
 0x37e   : > { %830 = vst [vmem:[%s2758_s18] sm:$0xff] %v767_v18 }
 0x37f   : > { %v2068_v63 = vpop.f32.mrf.mxu1 }
 0x380   : > { %833 = vst [vmem:[%s2758_s18 + $0x18] sm:$0xff] %v2068_v63 }
 0x381   : > { %v770_v31 = vpop.f32.mrf.mxu1 }
 0x382   : > { %831 = vst [vmem:[%s2758_s18 + $0x8] sm:$0xff] %v770_v31 }
 0x384   : > { %v2071_v37 = vpop.f32.mrf.mxu1 }
 0x385   : > { %836 = vst [vmem:[%s2758_s18 + $0x30] sm:$0xff] %v2071_v37 }
 0x386   : > { %v783_v59 = vpop.f32.mrf.mxu1 }
 0x387   : > { %834 = vst [vmem:[%s2758_s18 + $0x20] sm:$0xff] %v783_v59 }
 0x388   : > { %v2072_v44 = vpop.f32.mrf.mxu1 }
 0x389   : > { %837 = vst [vmem:[%s2758_s18 + $0x38] sm:$0xff] %v2072_v44 }
 0x38a   : > { %v786_v32 = vpop.f32.mrf.mxu1 }
 0x38b   : > { %835 = vst [vmem:[%s2758_s18 + $0x28] sm:$0xff] %v786_v32 }
 0x38e   : > { %v2075_v53 = vpop.f32.mrf.mxu1 }
 0x38f   : > { %840 = vst [vmem:[%s2758_s18 + $0x50] sm:$0xff] %v2075_v53 }
 0x390   : > { %v799_v38 = vpop.f32.mrf.mxu1 }
 0x391   : > { %838 = vst [vmem:[%s2758_s18 + $0x40] sm:$0xff] %v799_v38 }
 0x392   : > { %v2076_v39 = vpop.f32.mrf.mxu1 }
 0x393   : > { %841 = vst [vmem:[%s2758_s18 + $0x58] sm:$0xff] %v2076_v39 }
 0x394   : > { %v802_v42 = vpop.f32.mrf.mxu1 }
 0x395   : > { %839 = vst [vmem:[%s2758_s18 + $0x48] sm:$0xff] %v802_v42 }
 0x396   : > { %v2079_v43 = vpop.f32.mrf.mxu1 }
 0x397   : > { %844 = vst [vmem:[%s2758_s18 + $0x70] sm:$0xff] %v2079_v43 }
 0x398   : > { %v815_v45 = vpop.f32.mrf.mxu1 }
 0x399   : > { %842 = vst [vmem:[%s2758_s18 + $0x60] sm:$0xff] %v815_v45 }
 0x39a   : > { %v2080_v48 = vpop.f32.mrf.mxu1 }
 0x39b   : > { %845 = vst [vmem:[%s2758_s18 + $0x78] sm:$0xff] %v2080_v48 }
 0x39c   : > { %v818_v46 = vpop.f32.mrf.mxu1 }
 0x39d   : > { %843 = vst [vmem:[%s2758_s18 + $0x68] sm:$0xff] %v818_v46 }
 0x39e PF: > { %p1857_p2 = scmp.lt.s32.totalorder %s2599_s16, 2 }
 0x3a0   : > { %849 = sbr.rel (%p1857_p2) target bundleno = 1800 (0x708), region = 52 }
 0x3a5   : > { %v2256_v54 = vld [vmem:[#allocation7 + $0x78] sm:$0xff]   ;;  %v1858_v62 = vcombine.low %v2726_v0, %v2728_v1  ;;  %v2258_v60 = vld [vmem:[#allocation7 + $0x70] sm:$0xff]   ;;  %v2260_v55 = vld [vmem:[#allocation7 + $0x68] sm:$0xff]   ;;  %v1859_v26 = vcombine.low %v2730_v2, %v2732_v3  ;;  %v1860_v19 = vcombine.low %v2734_v4, %v2736_v5  ;;  %v1861_v21 = vcombine.low %v2738_v6, %v2740_v7 }
 0x3a6   : > { %v2257_v58 = vld [vmem:[#allocation7 + $0x38] sm:$0xff]   ;;  %1921 = vmatprep.subr.bf16.mxu0 %v2256_v54  ;;  %1953 = vmatprep.subr.bf16.mxu1 %v2256_v54  ;;  %v2259_v50 = vld [vmem:[#allocation7 + $0x30] sm:$0xff]   ;;  %v2261_v56 = vld [vmem:[#allocation7 + $0x28] sm:$0xff]   ;;  %v1862_v22 = vcombine.low %v2742_v8, %v2744_v9  ;;  %v1863_v2 = vcombine.low %v2746_v10, %v2748_v11  ;;  %v1864_v3 = vcombine.low %v2750_v12, %v2752_v13 }
 0x3a7   : > { %1937 = vmatprep.mubr.bf16.mxu0 %v1858_v62  ;;  %1922 = vmatpush3.bf16.xpose.msra.mxu0 %v2257_v58  ;;  %v2262_v61 = vld [vmem:[#allocation7 + $0x60] sm:$0xff]   ;;  %v2264_v1 = vld [vmem:[#allocation7 + $0x58] sm:$0xff]   ;;  %v2266_v20 = vld [vmem:[#allocation7 + $0x50] sm:$0xff]   ;;  %v1865_v4 = vcombine.low %v2754_v14, %v2756_v15 }
 0x3a8   : > { %1923 = vmatprep.subr.bf16.mxu0 %v2258_v60  ;;  %1954 = vmatpush3.bf16.msra.mxu1 %v2257_v58  ;;  %v2263_v0 = vld [vmem:[#allocation7 + $0x20] sm:$0xff]   ;;  %v2265_v28 = vld [vmem:[#allocation7 + $0x18] sm:$0xff]   ;;  %v2267_v40 = vld [vmem:[#allocation7 + $0x10] sm:$0xff]  }
 0x3a9   : > { %1955 = vmatprep.subr.bf16.mxu1 %v2258_v60  ;;  %v2268_v16 = vld [vmem:[#allocation7 + $0x48] sm:$0xff]   ;;  %v2270_v24 = vld [vmem:[#allocation7 + $0x40] sm:$0xff]  }
 0x3aa   : > { %v2269_v17 = vld [vmem:[#allocation7 + $0x8] sm:$0xff]   ;;  %v2271_v41 = vld [vmem:[#allocation7] sm:$0xff]  }
 0x3ac   : > { %1956 = vmatpush3.bf16.msra.mxu1 %v2259_v50 }
 0x3ad   : > { %1957 = vmatprep.subr.bf16.mxu1 %v2260_v55 }
 0x3af   : > { %1924 = vmatpush3.bf16.xpose.msra.mxu0 %v2259_v50 }
 0x3b0   : > { %1925 = vmatprep.subr.bf16.mxu0 %v2260_v55  ;;  %1958 = vmatpush3.bf16.msra.mxu1 %v2261_v56 }
 0x3b1   : > { %1959 = vmatprep.subr.bf16.mxu1 %v2262_v61 }
 0x3b4   : > { %1960 = vmatpush3.bf16.msra.mxu1 %v2263_v0 }
 0x3b5   : > { %1961 = vmatprep.subr.bf16.mxu1 %v2264_v1 }
 0x3b7   : > { %1926 = vmatpush3.bf16.xpose.msra.mxu0 %v2261_v56 }
 0x3b8   : > { %1927 = vmatprep.subr.bf16.mxu0 %v2262_v61  ;;  %1962 = vmatpush3.bf16.msra.mxu1 %v2265_v28 }
 0x3b9   : > { %1963 = vmatprep.subr.bf16.mxu1 %v2266_v20 }
 0x3bc   : > { %1964 = vmatpush3.bf16.msra.mxu1 %v2267_v40 }
 0x3bd   : > { %1965 = vmatprep.subr.bf16.mxu1 %v2268_v16 }
 0x3bf   : > { %1928 = vmatpush3.bf16.xpose.msra.mxu0 %v2263_v0 }
 0x3c0   : > { %1929 = vmatprep.subr.bf16.mxu0 %v2264_v1  ;;  %1966 = vmatpush3.bf16.msra.mxu1 %v2269_v17 }
 0x3c1   : > { %1967 = vmatprep.subr.bf16.mxu1 %v2270_v24 }
 0x3c4   : > { %1968 = vmatpush3.bf16.msra.mxu1 %v2271_v41 }
 0x3c7   : > { %1930 = vmatpush3.bf16.xpose.msra.mxu0 %v2265_v28 }
 0x3c8   : > { %1931 = vmatprep.subr.bf16.mxu0 %v2266_v20 }
 0x3cf   : > { %1932 = vmatpush3.bf16.xpose.msra.mxu0 %v2267_v40 }
 0x3d0   : > { %1933 = vmatprep.subr.bf16.mxu0 %v2268_v16 }
 0x3d7   : > { %1934 = vmatpush3.bf16.xpose.msra.mxu0 %v2269_v17 }
 0x3d8   : > { %1935 = vmatprep.subr.bf16.mxu0 %v2270_v24 }
 0x3df   : > { %1936 = vmatpush3.bf16.xpose.msra.mxu0 %v2271_v41 }
 0x3e6   : > { %1938 = vmatmul.mubr.bf16.vlgmr.msra.gmra.mxu0 %v1858_v62 }
 0x3e7   : > { %1939 = vmatprep.mubr.bf16.mxu0 %v1859_v26 }
 0x3ee   : > { %1940 = vmatmul.mubr.bf16.gmra.mxu0 %v1859_v26 }
 0x3ef   : > { %1941 = vmatprep.mubr.bf16.mxu0 %v1860_v19 }
 0x3f6   : > { %1942 = vmatmul.mubr.bf16.gmra.mxu0 %v1860_v19 }
 0x3f7   : > { %1943 = vmatprep.mubr.bf16.mxu0 %v1861_v21 }
 0x3fe   : > { %1944 = vmatmul.mubr.bf16.gmra.mxu0 %v1861_v21 }
 0x3ff   : > { %1945 = vmatprep.mubr.bf16.mxu0 %v1862_v22 }
 0x406   : > { %1946 = vmatmul.mubr.bf16.gmra.mxu0 %v1862_v22 }
 0x407   : > { %1947 = vmatprep.mubr.bf16.mxu0 %v1863_v2 }
 0x40e   : > { %1948 = vmatmul.mubr.bf16.gmra.mxu0 %v1863_v2 }
 0x40f   : > { %1949 = vmatprep.mubr.bf16.mxu0 %v1864_v3 }
 0x416   : > { %1950 = vmatmul.mubr.bf16.gmra.mxu0 %v1864_v3 }
 0x417   : > { %1951 = vmatprep.mubr.bf16.mxu0 %v1865_v4 }
 0x41e   : > { %1952 = vmatmul.mubr.bf16.gmra.mxu0 %v1865_v4 }
 0x4a6   : > { %v1060_v5 = vpop.f32.mrf.mxu0 }
 0x4a7   : > { %vm1139_vm1 = vcmp.ge.f32.partialorder %v1060_v5, 0.0  ;;  %v1171_v6 = vmul.f32 0.1, %v1060_v5 }
 0x4a8   : > { %v1062_v7 = vpop.f32.mrf.mxu0 }
 0x4a9   : > { %vm1140_vm2 = vcmp.ge.f32.partialorder %v1062_v7, 0.0  ;;  %v1172_v8 = vmul.f32 0.1, %v1062_v7  ;;  %v2989_v9 = vsel %vm1139_vm1, %v1060_v5, %v1171_v6 }
 0x4aa   : > { %v1064_v10 = vpop.f32.mrf.mxu0  ;;  %v1235_v14 = vmul.f32 %v2989_v9, %v2989_v9 }
 0x4ab   : > { %vm1141_vm3 = vcmp.ge.f32.partialorder %v1064_v10, 0.0  ;;  %v1173_v11 = vmul.f32 0.1, %v1064_v10  ;;  %v2991_v12 = vsel %vm1140_vm2, %v1062_v7, %v1172_v8 }
 0x4ac   : > { %v1066_v13 = vpop.f32.mrf.mxu0  ;;  %v1236_v15 = vmul.f32 %v2991_v12, %v2991_v12 }
 0x4ad   : > { %v2997_v23 = vsel %vm1141_vm3, %v1064_v10, %v1173_v11  ;;  %vm1142_vm4 = vcmp.ge.f32.partialorder %v1066_v13, 0.0  ;;  %v1174_v35 = vmul.f32 0.1, %v1066_v13 }
 0x4ae   : > { %v1070_v49 = vpop.f32.mrf.mxu0  ;;  %v1267_v47 = vadd.f32 %v1236_v15, %v1235_v14  ;;  %v1237_v36 = vmul.f32 %v2997_v23, %v2997_v23 }
 0x4af   : > { %v2999_v25 = vsel %vm1142_vm4, %v1066_v13, %v1174_v35  ;;  %vm1143_vm5 = vcmp.ge.f32.partialorder %v1070_v49, 0.0  ;;  %v1175_v33 = vmul.f32 0.1, %v1070_v49 }
 0x4b0   : > { %1268 = vadd.xlane.f32.xlu0 %v1267_v47  ;;  %v1072_v51 = vpop.f32.mrf.mxu0  ;;  %v1238_v27 = vmul.f32 %v2999_v25, %v2999_v25 }
 0x4b1   : > { %vm1144_vm6 = vcmp.ge.f32.partialorder %v1072_v51, 0.0  ;;  %v1176_v29 = vmul.f32 0.1, %v1072_v51  ;;  %v3005_v52 = vsel %vm1143_vm5, %v1070_v49, %v1175_v33 }
 0x4b2   : > { %v1074_v57 = vpop.f32.mrf.mxu0  ;;  %v1270_v34 = vadd.f32 %v1238_v27, %v1237_v36  ;;  %v1239_v31 = vmul.f32 %v3005_v52, %v3005_v52 }
 0x4b3   : > { %vm1145_vm7 = vcmp.ge.f32.partialorder %v1074_v57, 0.0  ;;  %v1177_v30 = vmul.f32 0.1, %v1074_v57  ;;  %v3007_v18 = vsel %vm1144_vm6, %v1072_v51, %v1176_v29 }
 0x4b4   : > { %1271 = vadd.xlane.f32.xlu0 %v1270_v34  ;;  %v1076_v63 = vpop.f32.mrf.mxu0  ;;  %v1240_v37 = vmul.f32 %v3007_v18, %v3007_v18 }
 0x4b5   : > { %v3013_v59 = vsel %vm1145_vm7, %v1074_v57, %v1177_v30  ;;  %vm1146_vm8 = vcmp.ge.f32.partialorder %v1076_v63, 0.0  ;;  %v1178_v44 = vmul.f32 0.1, %v1076_v63 }
 0x4b6   : > { %v1080_v32 = vpop.f32.mrf.mxu0  ;;  %v1273_v53 = vadd.f32 %v1240_v37, %v1239_v31  ;;  %v1241_v43 = vmul.f32 %v3013_v59, %v3013_v59 }
 0x4b7   : > { %v3015_v38 = vsel %vm1146_vm8, %v1076_v63, %v1178_v44  ;;  %vm1147_vm9 = vcmp.ge.f32.partialorder %v1080_v32, 0.0  ;;  %v1179_v39 = vmul.f32 0.1, %v1080_v32 }
 0x4b8   : > { %1274 = vadd.xlane.f32.xlu1 %v1273_v53  ;;  %v1082_v42 = vpop.f32.mrf.mxu0  ;;  %v1242_v45 = vmul.f32 %v3015_v38, %v3015_v38 }
 0x4b9   : > { %v3021_v48 = vsel %vm1147_vm9, %v1080_v32, %v1179_v39  ;;  %vm1148_vm10 = vcmp.ge.f32.partialorder %v1082_v42, 0.0  ;;  %v1180_v46 = vmul.f32 0.1, %v1082_v42 }
 0x4ba   : > { %v1084_v54 = vpop.f32.mrf.mxu0  ;;  %v1276_v62 = vadd.f32 %v1242_v45, %v1241_v43  ;;  %v1243_v55 = vmul.f32 %v3021_v48, %v3021_v48 }
 0x4bb   : > { %v3023_v58 = vsel %vm1148_vm10, %v1082_v42, %v1180_v46  ;;  %vm1149_vm11 = vcmp.ge.f32.partialorder %v1084_v54, 0.0  ;;  %v1181_v60 = vmul.f32 0.1, %v1084_v54 }
 0x4bc   : > { %1277 = vadd.xlane.f32.xlu1 %v1276_v62  ;;  %v1086_v50 = vpop.f32.mrf.mxu0  ;;  %v1244_v56 = vmul.f32 %v3023_v58, %v3023_v58 }
 0x4bd   : > { %v3029_v61 = vsel %vm1149_vm11, %v1084_v54, %v1181_v60  ;;  %vm1150_vm12 = vcmp.ge.f32.partialorder %v1086_v50, 0.0  ;;  %v1182_v0 = vmul.f32 0.1, %v1086_v50 }
 0x4be   : > { %v1090_v1 = vpop.f32.mrf.mxu0  ;;  %v1279_v28 = vadd.f32 %v1244_v56, %v1243_v55  ;;  %v1245_v17 = vmul.f32 %v3029_v61, %v3029_v61 }
 0x4bf   : > { %v3031_v20 = vsel %vm1150_vm12, %v1086_v50, %v1182_v0  ;;  %vm1151_vm13 = vcmp.ge.f32.partialorder %v1090_v1, 0.0  ;;  %v1183_v40 = vmul.f32 0.1, %v1090_v1 }
 0x4c0   : > { %1280 = vadd.xlane.f32.xlu0 %v1279_v28  ;;  %v1092_v16 = vpop.f32.mrf.mxu0  ;;  %v1246_v24 = vmul.f32 %v3031_v20, %v3031_v20 }
 0x4c1   : > { %v3037_v41 = vsel %vm1151_vm13, %v1090_v1, %v1183_v40  ;;  %vm1152_vm14 = vcmp.ge.f32.partialorder %v1092_v16, 0.0  ;;  %v1184_v26 = vmul.f32 0.1, %v1092_v16 }
 0x4c2   : > { %v1094_v19 = vpop.f32.mrf.mxu0  ;;  %v1282_v21 = vadd.f32 %v1246_v24, %v1245_v17  ;;  %v1247_v4 = vmul.f32 %v3037_v41, %v3037_v41 }
 0x4c3   : > { %v3039_v22 = vsel %vm1152_vm14, %v1092_v16, %v1184_v26  ;;  %vm1153_vm15 = vcmp.ge.f32.partialorder %v1094_v19, 0.0  ;;  %v1185_v2 = vmul.f32 0.1, %v1094_v19 }
 0x4c4   : > { %1283 = vadd.xlane.f32.xlu1 %v1282_v21  ;;  %v1096_v3 = vpop.f32.mrf.mxu0  ;;  %v1248_v5 = vmul.f32 %v3039_v22, %v3039_v22 }
 0x4c5   : > { %v3045_v6 = vsel %vm1153_vm15, %v1094_v19, %v1185_v2  ;;  %vm1154_vm0 = vcmp.ge.f32.partialorder %v1096_v3, 0.0  ;;  %v1186_v7 = vmul.f32 0.1, %v1096_v3 }
 0x4c6   : > { %v1100_v8 = vpop.f32.mrf.mxu0  ;;  %v1285_v10 = vadd.f32 %v1248_v5, %v1247_v4  ;;  %v1249_v15 = vmul.f32 %v3045_v6, %v3045_v6 }
 0x4c7   : > { %v3047_v11 = vsel %vm1154_vm0, %v1096_v3, %v1186_v7  ;;  %vm1155_vm1 = vcmp.ge.f32.partialorder %v1100_v8, 0.0  ;;  %v1187_v13 = vmul.f32 0.1, %v1100_v8 }
 0x4c8   : > { %1286 = vadd.xlane.f32.xlu0 %v1285_v10  ;;  %v1102_v14 = vpop.f32.mrf.mxu0  ;;  %v1250_v35 = vmul.f32 %v3047_v11, %v3047_v11 }
 0x4c9   : > { %v3053_v49 = vsel %vm1155_vm1, %v1100_v8, %v1187_v13  ;;  %vm1156_vm2 = vcmp.ge.f32.partialorder %v1102_v14, 0.0  ;;  %v1188_v47 = vmul.f32 0.1, %v1102_v14 }
 0x4ca   : > { %v1104_v33 = vpop.f32.mrf.mxu0  ;;  %v1288_v51 = vadd.f32 %v1250_v35, %v1249_v15  ;;  %v1251_v57 = vmul.f32 %v3053_v49, %v3053_v49 }
 0x4cb   : > { %v3055_v36 = vsel %vm1156_vm2, %v1102_v14, %v1188_v47  ;;  %vm1157_vm3 = vcmp.ge.f32.partialorder %v1104_v33, 0.0  ;;  %v1189_v27 = vmul.f32 0.1, %v1104_v33 }
 0x4cc   : > { %1289 = vadd.xlane.f32.xlu1 %v1288_v51  ;;  %v1106_v29 = vpop.f32.mrf.mxu0  ;;  %v1252_v34 = vmul.f32 %v3055_v36, %v3055_v36 }
 0x4cd   : > { %v3061_v30 = vsel %vm1157_vm3, %v1104_v33, %v1189_v27  ;;  %vm1158_vm4 = vcmp.ge.f32.partialorder %v1106_v29, 0.0  ;;  %v1190_v63 = vmul.f32 0.1, %v1106_v29 }
 0x4ce   : > { %v1110_v31 = vpop.f32.mrf.mxu0  ;;  %v1291_v37 = vadd.f32 %v1252_v34, %v1251_v57  ;;  %v1253_v39 = vmul.f32 %v3061_v30, %v3061_v30 }
 0x4cf   : > { %v3063_v44 = vsel %vm1158_vm4, %v1106_v29, %v1190_v63  ;;  %vm1159_vm5 = vcmp.ge.f32.partialorder %v1110_v31, 0.0  ;;  %v1191_v32 = vmul.f32 0.1, %v1110_v31 }
 0x4d0   : > { %1292 = vadd.xlane.f32.xlu0 %v1291_v37  ;;  %v1112_v53 = vpop.f32.mrf.mxu0  ;;  %v1254_v42 = vmul.f32 %v3063_v44, %v3063_v44 }
 0x4d1   : > { %v3069_v43 = vsel %vm1159_vm5, %v1110_v31, %v1191_v32  ;;  %vm1160_vm6 = vcmp.ge.f32.partialorder %v1112_v53, 0.0  ;;  %v1192_v45 = vmul.f32 0.1, %v1112_v53 }
 0x4d2   : > { %v1114_v46 = vpop.f32.mrf.mxu0  ;;  %v1294_v54 = vadd.f32 %v1254_v42, %v1253_v39  ;;  %v1255_v55 = vmul.f32 %v3069_v43, %v3069_v43 }
 0x4d3   : > { %v3071_v62 = vsel %vm1160_vm6, %v1112_v53, %v1192_v45  ;;  %vm1161_vm7 = vcmp.ge.f32.partialorder %v1114_v46, 0.0  ;;  %v1193_v60 = vmul.f32 0.1, %v1114_v46 }
 0x4d4   : > { %1295 = vadd.xlane.f32.xlu1 %v1294_v54  ;;  %v1116_v50 = vpop.f32.mrf.mxu0  ;;  %v1256_v56 = vmul.f32 %v3071_v62, %v3071_v62 }
 0x4d5   : > { %v3077_v0 = vsel %vm1161_vm7, %v1114_v46, %v1193_v60  ;;  %vm1162_vm8 = vcmp.ge.f32.partialorder %v1116_v50, 0.0  ;;  %v1194_v1 = vmul.f32 0.1, %v1116_v50 }
 0x4d6   : > { %v1120_v28 = vpop.f32.mrf.mxu0  ;;  %v1297_v40 = vadd.f32 %v1256_v56, %v1255_v55  ;;  %v1257_v26 = vmul.f32 %v3077_v0, %v3077_v0 }
 0x4d7   : > { %v3079_v16 = vsel %vm1162_vm8, %v1116_v50, %v1194_v1  ;;  %vm1163_vm9 = vcmp.ge.f32.partialorder %v1120_v28, 0.0  ;;  %v1195_v17 = vmul.f32 0.1, %v1120_v28 }
 0x4d8   : > { %1298 = vadd.xlane.f32.xlu0 %v1297_v40  ;;  %v1122_v24 = vpop.f32.mrf.mxu0  ;;  %v1258_v19 = vmul.f32 %v3079_v16, %v3079_v16 }
 0x4d9   : > { %v3085_v21 = vsel %vm1163_vm9, %v1120_v28, %v1195_v17  ;;  %vm1164_vm10 = vcmp.ge.f32.partialorder %v1122_v24, 0.0  ;;  %v1196_v2 = vmul.f32 0.1, %v1122_v24 }
 0x4da   : > { %v1124_v3 = vpop.f32.mrf.mxu0  ;;  %v1300_v4 = vadd.f32 %v1258_v19, %v1257_v26  ;;  %v1259_v10 = vmul.f32 %v3085_v21, %v3085_v21 }
 0x4db   : > { %v3087_v5 = vsel %vm1164_vm10, %v1122_v24, %v1196_v2  ;;  %vm1165_vm11 = vcmp.ge.f32.partialorder %v1124_v3, 0.0  ;;  %v1197_v7 = vmul.f32 0.1, %v1124_v3 }
 0x4dc   : > { %1301 = vadd.xlane.f32.xlu1 %v1300_v4  ;;  %v1126_v8 = vpop.f32.mrf.mxu0  ;;  %v1260_v13 = vmul.f32 %v3087_v5, %v3087_v5 }
 0x4dd   : > { %v3093_v14 = vsel %vm1165_vm11, %v1124_v3, %v1197_v7  ;;  %vm1166_vm12 = vcmp.ge.f32.partialorder %v1126_v8, 0.0  ;;  %v1198_v15 = vmul.f32 0.1, %v1126_v8 }
 0x4de   : > { %v1130_v35 = vpop.f32.mrf.mxu0  ;;  %v1303_v47 = vadd.f32 %v1260_v13, %v1259_v10  ;;  %v1261_v29 = vmul.f32 %v3093_v14, %v3093_v14 }
 0x4df   : > { %v3095_v33 = vsel %vm1166_vm12, %v1126_v8, %v1198_v15  ;;  %vm1167_vm13 = vcmp.ge.f32.partialorder %v1130_v35, 0.0  ;;  %v1199_v51 = vmul.f32 0.1, %v1130_v35 }
 0x4e0   : > { %1304 = vadd.xlane.f32.xlu0 %v1303_v47  ;;  %v1132_v27 = vpop.f32.mrf.mxu0  ;;  %v1262_v57 = vmul.f32 %v3095_v33, %v3095_v33 }
 0x4e1   : > { %v3101_v34 = vsel %vm1167_vm13, %v1130_v35, %v1199_v51  ;;  %vm1168_vm14 = vcmp.ge.f32.partialorder %v1132_v27, 0.0  ;;  %v1200_v63 = vmul.f32 0.1, %v1132_v27 }
 0x4e2   : > { %v1134_v31 = vpop.f32.mrf.mxu0  ;;  %v1306_v37 = vadd.f32 %v1262_v57, %v1261_v29  ;;  %v1263_v42 = vmul.f32 %v3101_v34, %v3101_v34 }
 0x4e3   : > { %v3103_v32 = vsel %vm1168_vm14, %v1132_v27, %v1200_v63  ;;  %vm1169_vm15 = vcmp.ge.f32.partialorder %v1134_v31, 0.0  ;;  %v1201_v53 = vmul.f32 0.1, %v1134_v31 }
 0x4e4   : > { %1307 = vadd.xlane.f32.xlu1 %v1306_v37  ;;  %v1136_v39 = vpop.f32.mrf.mxu0  ;;  %v1264_v45 = vmul.f32 %v3103_v32, %v3103_v32  ;;  %v1459_v37 = vlaneseq }
 0x4e5   : > { %v3109_v46 = vsel %vm1169_vm15, %v1134_v31, %v1201_v53  ;;  %vm1170_vm0 = vcmp.ge.f32.partialorder %v1136_v39, 0.0  ;;  %v1202_v54 = vmul.f32 0.1, %v1136_v39 }
 0x4e6   : > { %v1309_v60 = vadd.f32 %v1264_v45, %v1263_v42  ;;  %v1265_v56 = vmul.f32 %v3109_v46, %v3109_v46 }
 0x4e7   : > { %v3111_v50 = vsel %vm1170_vm0, %v1136_v39, %v1202_v54 }
 0x4e8   : > { %v1266_v55 = vmul.f32 %v3111_v50, %v3111_v50  ;;  %1310 = vadd.xlane.f32.xlu0 %v1309_v60 }
 0x4ea   : > { %v1312_v1 = vadd.f32 %v1266_v55, %v1265_v56  ;;  %v1460_v55 = vand.u32 127, %v1459_v37 }
 0x4ec   : > { %1313 = vadd.xlane.f32.xlu1 %v1312_v1 }
 0x539   : > { %v1269_v28 = vpop.xlane.xlu0 %1268 }
 0x53a   : > { %v1315_v40 = vadd.f32 1e-08, %v1269_v28 }
 0x53c   : > { %2272 = vrsqrt.f32 %v1315_v40 }
 0x53d   : > { %v1272_v17 = vpop.xlane.xlu0 %1271 }
 0x53e   : > { %v1316_v24 = vadd.f32 1e-08, %v1272_v17 }
 0x540   : > { %2274 = vrsqrt.f32 %v1316_v24 }
 0x541   : > { %v1275_v26 = vpop.xlane.xlu1 %1274 }
 0x542   : > { %v1317_v19 = vadd.f32 1e-08, %v1275_v26  ;;  %v3125_v26 = vadd.s32 128, %v1460_v55 }
 0x544   : > { %2276 = vrsqrt.f32 %v1317_v19  ;;  %vm1463_vm1 = vcmp.lt.s32.totalorder %v3125_v26, 200 }
 0x545   : > { %v1278_v2 = vpop.xlane.xlu1 %1277 }
 0x546   : > { %v1318_v3 = vadd.f32 1e-08, %v1278_v2 }
 0x548   : > { %2278 = vrsqrt.f32 %v1318_v3 }
 0x549   : > { %v2273_v4 = vpop.eup %2272  ;;  %v1281_v7 = vpop.xlane.xlu0 %1280 }
 0x54a   : > { %v1347_v8 = vmul.f32 6.0, %v2273_v4  ;;  %v1319_v10 = vadd.f32 1e-08, %v1281_v7 }
 0x54c   : > { %v1363_v13 = vmul.f32 %v1347_v8, %v2989_v9  ;;  %v1364_v15 = vmul.f32 %v1347_v8, %v2991_v12  ;;  %2280 = vrsqrt.f32 %v1319_v10 }
 0x54d   : > { %v2275_v35 = vpop.eup %2274  ;;  %v1284_v47 = vpop.xlane.xlu1 %1283 }
 0x54e   : > { %v1395_v51 = vmul.f32 1.442695, %v1363_v13  ;;  %v1397_v27 = vmul.f32 1.442695, %v1364_v15  ;;  %v1348_v29 = vmul.f32 6.0, %v2275_v35 }
 0x54f   : > { %v1320_v57 = vadd.f32 1e-08, %v1284_v47 }
 0x550   : > { %2282 = vpow2.f32 %v1395_v51  ;;  %v1365_v63 = vmul.f32 %v1348_v29, %v2997_v23  ;;  %v1366_v31 = vmul.f32 %v1348_v29, %v2999_v25 }
 0x551   : > { %v2277_v53 = vpop.eup %2276  ;;  %2284 = vpow2.f32 %v1397_v27  ;;  %v1287_v39 = vpop.xlane.xlu0 %1286 }
 0x552   : > { %v1399_v42 = vmul.f32 1.442695, %v1365_v63  ;;  %v1401_v9 = vmul.f32 1.442695, %v1366_v31  ;;  %v1349_v45 = vmul.f32 6.0, %v2277_v53  ;;  %2286 = vrsqrt.f32 %v1320_v57 }
 0x553   : > { %v1321_v12 = vadd.f32 1e-08, %v1287_v39 }
 0x554   : > { %2288 = vpow2.f32 %v1399_v42  ;;  %v1367_v54 = vmul.f32 %v1349_v45, %v3005_v52  ;;  %v1368_v60 = vmul.f32 %v1349_v45, %v3007_v18 }
 0x555   : > { %v2279_v56 = vpop.eup %2278  ;;  %2290 = vpow2.f32 %v1401_v9  ;;  %v1290_v23 = vpop.xlane.xlu1 %1289 }
 0x556   : > { %v1403_v1 = vmul.f32 1.442695, %v1367_v54  ;;  %v1405_v25 = vmul.f32 1.442695, %v1368_v60  ;;  %v1350_v28 = vmul.f32 6.0, %v2279_v56  ;;  %2292 = vrsqrt.f32 %v1321_v12 }
 0x557   : > { %v1322_v40 = vadd.f32 1e-08, %v1290_v23 }
 0x558   : > { %2294 = vpow2.f32 %v1403_v1  ;;  %v1369_v17 = vmul.f32 %v1350_v28, %v3013_v59  ;;  %v1370_v24 = vmul.f32 %v1350_v28, %v3015_v38 }
 0x559   : > { %v2281_v19 = vpop.eup %2280  ;;  %2296 = vpow2.f32 %v1405_v25  ;;  %v1293_v52 = vpop.xlane.xlu0 %1292 }
 0x55a   : > { %v1407_v18 = vmul.f32 1.442695, %v1369_v17  ;;  %v1409_v2 = vmul.f32 1.442695, %v1370_v24  ;;  %v1351_v3 = vmul.f32 6.0, %v2281_v19  ;;  %2298 = vrsqrt.f32 %v1322_v40 }
 0x55b   : > { %v1323_v4 = vadd.f32 1e-08, %v1293_v52 }
 0x55c   : > { %2300 = vpow2.f32 %v1407_v18  ;;  %v1371_v7 = vmul.f32 %v1351_v3, %v3021_v48  ;;  %v1372_v8 = vmul.f32 %v1351_v3, %v3023_v58 }
 0x55d   : > { %v3130_v59 = vpop.eup %2282  ;;  %2302 = vpow2.f32 %v1409_v2  ;;  %v1296_v38 = vpop.xlane.xlu1 %1295 }
 0x55e   : > { %v2285_v10 = vpop.eup %2284  ;;  %v1411_v13 = vmul.f32 1.442695, %v1371_v7  ;;  %v1413_v15 = vmul.f32 1.442695, %v1372_v8  ;;  %2304 = vrsqrt.f32 %v1323_v4  ;;  %v1324_v35 = vadd.f32 1e-08, %v1296_v38 }
 0x55f   : > { %v2287_v47 = vpop.eup %2286  ;;  %v3134_v51 = vsel %vm1463_vm1, %v2285_v10, 0.0 }
 0x560   : > { %2306 = vpow2.f32 %v1411_v13  ;;  %v1352_v48 = vmul.f32 6.0, %v2287_v47  ;;  %v1496_v58 = vadd.f32 %v3130_v59, %v3134_v51 }
 0x561   : > { %v3138_v27 = vpop.eup %2288  ;;  %2308 = vpow2.f32 %v1413_v15  ;;  %v1299_v29 = vpop.xlane.xlu0 %1298 }
 0x562   : > { %v2291_v57 = vpop.eup %2290  ;;  %v1373_v63 = vmul.f32 %v1352_v48, %v3029_v61  ;;  %v1374_v31 = vmul.f32 %v1352_v48, %v3031_v20  ;;  %2310 = vrsqrt.f32 %v1324_v35  ;;  %v1325_v37 = vadd.f32 1e-08, %v1299_v29  ;;  %1497 = vadd.xlane.f32.xlu0 %v1496_v58 }
 0x563   : > { %v2293_v53 = vpop.eup %2292  ;;  %v3144_v39 = vsel %vm1463_vm1, %v2291_v57, 0.0 }
 0x564   : > { %v1415_v42 = vmul.f32 1.442695, %v1373_v63  ;;  %v1417_v9 = vmul.f32 1.442695, %v1374_v31  ;;  %v1353_v45 = vmul.f32 6.0, %v2293_v53  ;;  %2312 = vrsqrt.f32 %v1325_v37 }
 0x565   : > { %v3146_v12 = vpop.eup %2294  ;;  %v1302_v54 = vpop.xlane.xlu1 %1301  ;;  %v1499_v61 = vadd.f32 %v3138_v27, %v3144_v39 }
 0x566   : > { %v2297_v60 = vpop.eup %2296  ;;  %2314 = vpow2.f32 %v1415_v42  ;;  %v1375_v20 = vmul.f32 %v1353_v45, %v3037_v41  ;;  %v1376_v55 = vmul.f32 %v1353_v45, %v3039_v22  ;;  %v1326_v56 = vadd.f32 1e-08, %v1302_v54 }
 0x567   : > { %v2299_v23 = vpop.eup %2298  ;;  %2316 = vpow2.f32 %v1417_v9  ;;  %1500 = vadd.xlane.f32.xlu1 %v1499_v61  ;;  %v3154_v1 = vsel %vm1463_vm1, %v2297_v60, 0.0 }
 0x568   : > { %v1419_v25 = vmul.f32 1.442695, %v1375_v20  ;;  %v1421_v28 = vmul.f32 1.442695, %v1376_v55  ;;  %v1354_v40 = vmul.f32 6.0, %v2299_v23  ;;  %2318 = vrsqrt.f32 %v1326_v56 }
 0x569   : > { %v3156_v17 = vpop.eup %2300  ;;  %v1305_v24 = vpop.xlane.xlu0 %1304  ;;  %v1502_v41 = vadd.f32 %v3146_v12, %v3154_v1 }
 0x56a   : > { %v2303_v19 = vpop.eup %2302  ;;  %2320 = vpow2.f32 %v1419_v25  ;;  %v1377_v22 = vmul.f32 %v1354_v40, %v3045_v6  ;;  %v1378_v52 = vmul.f32 %v1354_v40, %v3047_v11  ;;  %v1327_v18 = vadd.f32 1e-08, %v1305_v24 }
 0x56b   : > { %v2305_v2 = vpop.eup %2304  ;;  %2322 = vpow2.f32 %v1421_v28  ;;  %1503 = vadd.xlane.f32.xlu0 %v1502_v41  ;;  %v3164_v3 = vsel %vm1463_vm1, %v2303_v19, 0.0 }
 0x56c   : > { %v1423_v4 = vmul.f32 1.442695, %v1377_v22  ;;  %v1425_v7 = vmul.f32 1.442695, %v1378_v52  ;;  %v1355_v8 = vmul.f32 6.0, %v2305_v2  ;;  %2324 = vrsqrt.f32 %v1327_v18 }
 0x56d   : > { %v3166_v38 = vpop.eup %2306  ;;  %v1308_v10 = vpop.xlane.xlu1 %1307  ;;  %v1505_v6 = vadd.f32 %v3156_v17, %v3164_v3 }
 0x56e   : > { %v2309_v13 = vpop.eup %2308  ;;  %2326 = vpow2.f32 %v1423_v4  ;;  %v1379_v11 = vmul.f32 %v1355_v8, %v3053_v49  ;;  %v1380_v15 = vmul.f32 %v1355_v8, %v3055_v36  ;;  %v1328_v35 = vadd.f32 1e-08, %v1308_v10 }
 0x56f   : > { %v2311_v47 = vpop.eup %2310  ;;  %2328 = vpow2.f32 %v1425_v7  ;;  %1506 = vadd.xlane.f32.xlu1 %v1505_v6  ;;  %v3174_v48 = vsel %vm1463_vm1, %v2309_v13, 0.0 }
 0x570   : > { %v1427_v58 = vmul.f32 1.442695, %v1379_v11  ;;  %v1429_v29 = vmul.f32 1.442695, %v1380_v15  ;;  %v1356_v57 = vmul.f32 6.0, %v2311_v47  ;;  %2330 = vrsqrt.f32 %v1328_v35 }
 0x571   : > { %v2313_v63 = vpop.eup %2312  ;;  %v1508_v31 = vadd.f32 %v3166_v38, %v3174_v48  ;;  %v1311_v37 = vpop.xlane.xlu0 %1310 }
 0x572   : > { %2332 = vpow2.f32 %v1427_v58  ;;  %v1381_v49 = vmul.f32 %v1356_v57, %v3061_v30  ;;  %v1382_v36 = vmul.f32 %v1356_v57, %v3063_v44  ;;  %v1357_v53 = vmul.f32 6.0, %v2313_v63 }
 0x573   : > { %v3180_v42 = vpop.eup %2314  ;;  %2334 = vpow2.f32 %v1429_v29  ;;  %1509 = vadd.xlane.f32.xlu0 %v1508_v31  ;;  %v1329_v9 = vadd.f32 1e-08, %v1311_v37 }
 0x574   : > { %v2317_v45 = vpop.eup %2316  ;;  %v1431_v54 = vmul.f32 1.442695, %v1381_v49  ;;  %v1433_v61 = vmul.f32 1.442695, %v1382_v36  ;;  %v1383_v60 = vmul.f32 %v1357_v53, %v3069_v43  ;;  %v1384_v20 = vmul.f32 %v1357_v53, %v3071_v62 }
 0x575   : > { %v2319_v55 = vpop.eup %2318  ;;  %2336 = vrsqrt.f32 %v1329_v9  ;;  %v3186_v30 = vsel %vm1463_vm1, %v2317_v45, 0.0  ;;  %v1314_v44 = vpop.xlane.xlu1 %1313 }
 0x576   : > { %2338 = vpow2.f32 %v1431_v54  ;;  %v1435_v56 = vmul.f32 1.442695, %v1383_v60  ;;  %v1437_v23 = vmul.f32 1.442695, %v1384_v20  ;;  %v1358_v25 = vmul.f32 6.0, %v2319_v55 }
 0x577   : > { %v3188_v28 = vpop.eup %2320  ;;  %2340 = vpow2.f32 %v1433_v61  ;;  %v1511_v40 = vadd.f32 %v3180_v42, %v3186_v30  ;;  %v1330_v43 = vadd.f32 1e-08, %v1314_v44 }
 0x578   : > { %v2323_v24 = vpop.eup %2322  ;;  %2342 = vpow2.f32 %v1435_v56  ;;  %v1385_v62 = vmul.f32 %v1358_v25, %v3077_v0  ;;  %v1386_v41 = vmul.f32 %v1358_v25, %v3079_v16 }
 0x579   : > { %v2325_v19 = vpop.eup %2324  ;;  %2344 = vpow2.f32 %v1437_v23  ;;  %1512 = vadd.xlane.f32.xlu1 %v1511_v40  ;;  %v3196_v22 = vsel %vm1463_vm1, %v2323_v24, 0.0 }
 0x57a   : > { %v1439_v52 = vmul.f32 1.442695, %v1385_v62  ;;  %v1441_v18 = vmul.f32 1.442695, %v1386_v41  ;;  %v1359_v2 = vmul.f32 6.0, %v2325_v19  ;;  %2346 = vrsqrt.f32 %v1330_v43 }
 0x57b   : > { %v3198_v4 = vpop.eup %2326  ;;  %v1514_v7 = vadd.f32 %v3188_v28, %v3196_v22 }
 0x57c   : > { %v2329_v8 = vpop.eup %2328  ;;  %2348 = vpow2.f32 %v1439_v52  ;;  %v1387_v0 = vmul.f32 %v1359_v2, %v3085_v21  ;;  %v1388_v16 = vmul.f32 %v1359_v2, %v3087_v5 }
 0x57d   : > { %v2331_v10 = vpop.eup %2330  ;;  %2350 = vpow2.f32 %v1441_v18  ;;  %1515 = vadd.xlane.f32.xlu0 %v1514_v7  ;;  %v3206_v6 = vsel %vm1463_vm1, %v2329_v8, 0.0 }
 0x57e   : > { %v1443_v13 = vmul.f32 1.442695, %v1387_v0  ;;  %v1445_v11 = vmul.f32 1.442695, %v1388_v16  ;;  %v1360_v15 = vmul.f32 6.0, %v2331_v10  ;;  %v1517_v35 = vadd.f32 %v3198_v4, %v3206_v6 }
 0x57f   : > { %v3210_v47 = vpop.eup %2332 }
 0x580   : > { %v2335_v58 = vpop.eup %2334  ;;  %2352 = vpow2.f32 %v1443_v13  ;;  %v1389_v21 = vmul.f32 %v1360_v15, %v3093_v14  ;;  %v1390_v5 = vmul.f32 %v1360_v15, %v3095_v33  ;;  %1518 = vadd.xlane.f32.xlu1 %v1517_v35 }
 0x581   : > { %2354 = vpow2.f32 %v1445_v11  ;;  %v3216_v29 = vsel %vm1463_vm1, %v2335_v58, 0.0 }
 0x582   : > { %v2337_v57 = vpop.eup %2336  ;;  %v1447_v63 = vmul.f32 1.442695, %v1389_v21  ;;  %v1449_v31 = vmul.f32 1.442695, %v1390_v5  ;;  %v1520_v37 = vadd.f32 %v3210_v47, %v3216_v29 }
 0x583   : > { %v3220_v49 = vpop.eup %2338  ;;  %v1361_v36 = vmul.f32 6.0, %v2337_v57 }
 0x584   : > { %v2341_v53 = vpop.eup %2340  ;;  %2356 = vpow2.f32 %v1447_v63  ;;  %1521 = vadd.xlane.f32.xlu0 %v1520_v37 }
 0x585   : > { %v3222_v14 = vpop.eup %2342  ;;  %2358 = vpow2.f32 %v1449_v31  ;;  %v1391_v33 = vmul.f32 %v1361_v36, %v3101_v34  ;;  %v1392_v9 = vmul.f32 %v1361_v36, %v3103_v32  ;;  %v3228_v45 = vsel %vm1463_vm1, %v2341_v53, 0.0 }
 0x586   : > { %v2345_v54 = vpop.eup %2344  ;;  %v1523_v61 = vadd.f32 %v3220_v49, %v3228_v45 }
 0x587   : > { %v2347_v60 = vpop.eup %2346  ;;  %v1451_v20 = vmul.f32 1.442695, %v1391_v33  ;;  %v1453_v55 = vmul.f32 1.442695, %v1392_v9  ;;  %v3234_v44 = vsel %vm1463_vm1, %v2345_v54, 0.0 }
 0x588   : > { %v1362_v56 = vmul.f32 6.0, %v2347_v60  ;;  %1524 = vadd.xlane.f32.xlu1 %v1523_v61  ;;  %v1526_v34 = vadd.f32 %v3222_v14, %v3234_v44 }
 0x589   : > { %v3238_v32 = vpop.eup %2348  ;;  %2360 = vpow2.f32 %v1451_v20 }
 0x58a   : > { %v2351_v23 = vpop.eup %2350  ;;  %2362 = vpow2.f32 %v1453_v55  ;;  %v1393_v25 = vmul.f32 %v1362_v56, %v3109_v46  ;;  %v1394_v40 = vmul.f32 %v1362_v56, %v3111_v50  ;;  %1527 = vadd.xlane.f32.xlu0 %v1526_v34 }
 0x58b   : > { %v3244_v43 = vsel %vm1463_vm1, %v2351_v23, 0.0 }
 0x58c   : > { %v1455_v24 = vmul.f32 1.442695, %v1393_v25  ;;  %v1457_v62 = vmul.f32 1.442695, %v1394_v40  ;;  %v1529_v41 = vadd.f32 %v3238_v32, %v3244_v43 }
 0x58d   : > { %v3248_v19 = vpop.eup %2352 }
 0x58e   : > { %v2355_v52 = vpop.eup %2354  ;;  %2364 = vpow2.f32 %v1455_v24  ;;  %1530 = vadd.xlane.f32.xlu1 %v1529_v41 }
 0x58f   : > { %2366 = vpow2.f32 %v1457_v62  ;;  %v3252_v46 = vsel %vm1463_vm1, %v2355_v52, 0.0 }
 0x590   : > { %v1532_v50 = vadd.f32 %v3248_v19, %v3252_v46 }
 0x591   : > { %v3256_v18 = vpop.eup %2356 }
 0x592   : > { %v2359_v2 = vpop.eup %2358  ;;  %1533 = vadd.xlane.f32.xlu0 %v1532_v50 }
 0x593   : > { %v3260_v7 = vsel %vm1463_vm1, %v2359_v2, 0.0 }
 0x594   : > { %v1535_v8 = vadd.f32 %v3256_v18, %v3260_v7 }
 0x596   : > { %v3264_v0 = vpop.eup %2360  ;;  %1536 = vadd.xlane.f32.xlu1 %v1535_v8 }
 0x597   : > { %v2363_v16 = vpop.eup %2362 }
 0x598   : > { %v3268_v10 = vsel %vm1463_vm1, %v2363_v16, 0.0 }
 0x599   : > { %v1538_v13 = vadd.f32 %v3264_v0, %v3268_v10 }
 0x59b   : > { %v3272_v11 = vpop.eup %2364  ;;  %1539 = vadd.xlane.f32.xlu0 %v1538_v13 }
 0x59c   : > { %v2367_v15 = vpop.eup %2366 }
 0x59d   : > { %v3276_v35 = vsel %vm1463_vm1, %v2367_v15, 0.0 }
 0x59e   : > { %v1541_v58 = vadd.f32 %v3272_v11, %v3276_v35 }
 0x5a0   : > { %1542 = vadd.xlane.f32.xlu1 %v1541_v58 }
 0x5eb   : > { %v1498_v21 = vpop.xlane.xlu0 %1497 }
 0x5ec   : > { %2368 = vrcp.f32 %v1498_v21 }
 0x5f0   : > { %v1501_v5 = vpop.xlane.xlu1 %1500 }
 0x5f1   : > { %2370 = vrcp.f32 %v1501_v5 }
 0x5f4   : > { %v1504_v57 = vpop.xlane.xlu0 %1503 }
 0x5f5   : > { %2372 = vrcp.f32 %v1504_v57 }
 0x5f8   : > { %v1507_v63 = vpop.xlane.xlu1 %1506 }
 0x5f9   : > { %2374 = vrcp.f32 %v1507_v63  ;;  %v2369_v31 = vpop.eup %2368 }
 0x5fa   : > { %v1561_v53 = vmul.f32 %v2369_v31, %v3134_v51  ;;  %v1560_v33 = vmul.f32 %v2369_v31, %v3130_v59 }
 0x5fc   : > { %v1510_v36 = vpop.xlane.xlu0 %1509 }
 0x5fd   : > { %2376 = vrcp.f32 %v1510_v36 }
 0x5fe   : > { %v2371_v37 = vpop.eup %2370 }
 0x5ff   : > { %v1563_v26 = vmul.f32 %v2371_v37, %v3144_v39  ;;  %v1562_v9 = vmul.f32 %v2371_v37, %v3138_v27 }
 0x601   : > { %v1593_v54 = vpack.c.bf16 %v1563_v26, %v1561_v53  ;;  %v1592_v61 = vpack.c.bf16 %v1562_v9, %v1560_v33 }
 0x602   : > { %v1513_v60 = vpop.xlane.xlu1 %1512  ;;  %v2373_v20 = vpop.eup %2372 }
 0x603   : > { %2378 = vrcp.f32 %v1513_v60  ;;  %1640 = vmatprep.mubr.bf16.mxu1 %v1593_v54  ;;  %v1565_v34 = vmul.f32 %v2373_v20, %v3154_v1  ;;  %v1564_v39 = vmul.f32 %v2373_v20, %v3146_v12 }
 0x604   : > { %1641 = vmatmul.mubr.bf16.vlgmr.msra.gmra.mxu1 %v1592_v61 }
 0x606   : > { %v2375_v55 = vpop.eup %2374  ;;  %v1516_v56 = vpop.xlane.xlu0 %1515 }
 0x607   : > { %2380 = vrcp.f32 %v1516_v56  ;;  %v1567_v51 = vmul.f32 %v2375_v55, %v3164_v3  ;;  %v1566_v59 = vmul.f32 %v2375_v55, %v3156_v17 }
 0x609   : > { %v1519_v27 = vpop.xlane.xlu1 %1518  ;;  %v1595_v23 = vpack.c.bf16 %v1567_v51, %v1565_v34  ;;  %v1594_v25 = vpack.c.bf16 %v1566_v59, %v1564_v39 }
 0x60a   : > { %2382 = vrcp.f32 %v1519_v27  ;;  %v2377_v24 = vpop.eup %2376 }
 0x60b   : > { %1648 = vmatprep.mubr.bf16.mxu1 %v1595_v23  ;;  %v1569_v1 = vmul.f32 %v2377_v24, %v3174_v48  ;;  %v1568_v3 = vmul.f32 %v2377_v24, %v3166_v38 }
 0x60c   : > { %1649 = vmatmul.mubr.bf16.gmra.mxu1 %v1594_v25 }
 0x60d   : > { %v1522_v40 = vpop.xlane.xlu0 %1521 }
 0x60e   : > { %2384 = vrcp.f32 %v1522_v40 }
 0x610   : > { %v2379_v62 = vpop.eup %2378 }
 0x611   : > { %v1525_v41 = vpop.xlane.xlu1 %1524  ;;  %v1571_v52 = vmul.f32 %v2379_v62, %v3186_v30  ;;  %v1570_v12 = vmul.f32 %v2379_v62, %v3180_v42 }
 0x612   : > { %2386 = vrcp.f32 %v1525_v41 }
 0x613   : > { %v1597_v17 = vpack.c.bf16 %v1571_v52, %v1569_v1  ;;  %v1528_v50 = vpop.xlane.xlu0 %1527  ;;  %v1596_v2 = vpack.c.bf16 %v1570_v12, %v1568_v3 }
 0x614   : > { %v2381_v8 = vpop.eup %2380  ;;  %2388 = vrcp.f32 %v1528_v50 }
 0x615   : > { %1656 = vmatprep.mubr.bf16.mxu1 %v1597_v17  ;;  %v1573_v15 = vmul.f32 %v2381_v8, %v3196_v22  ;;  %v1572_v30 = vmul.f32 %v2381_v8, %v3188_v28 }
 0x616   : > { %1657 = vmatmul.mubr.bf16.gmra.mxu1 %v1596_v2 }
 0x617   : > { %v2383_v16 = vpop.eup %2382  ;;  %v1531_v13 = vpop.xlane.xlu1 %1530 }
 0x618   : > { %2390 = vrcp.f32 %v1531_v13  ;;  %v1575_v48 = vmul.f32 %v2383_v16, %v3206_v6  ;;  %v1574_v38 = vmul.f32 %v2383_v16, %v3198_v4 }
 0x61a   : > { %v1599_v42 = vpack.c.bf16 %v1575_v48, %v1573_v15  ;;  %v1598_v58 = vpack.c.bf16 %v1574_v38, %v1572_v30 }
 0x61b   : > { %v1534_v21 = vpop.xlane.xlu0 %1533  ;;  %v2385_v5 = vpop.eup %2384 }
 0x61c   : > { %1664 = vmatprep.mubr.bf16.mxu1 %v1599_v42  ;;  %2392 = vrcp.f32 %v1534_v21  ;;  %v1577_v31 = vmul.f32 %v2385_v5, %v3216_v29  ;;  %v1576_v6 = vmul.f32 %v2385_v5, %v3210_v47 }
 0x61e   : > { %1665 = vmatmul.mubr.bf16.gmra.mxu1 %v1598_v58 }
 0x61f   : > { %v2387_v57 = vpop.eup %2386  ;;  %v1537_v63 = vpop.xlane.xlu1 %1536 }
 0x620   : > { %2394 = vrcp.f32 %v1537_v63  ;;  %v1579_v22 = vmul.f32 %v2387_v57, %v3228_v45  ;;  %v1578_v28 = vmul.f32 %v2387_v57, %v3220_v49 }
 0x621   : > { %v2389_v36 = vpop.eup %2388 }
 0x622   : > { %v1601_v37 = vpack.c.bf16 %v1579_v22, %v1577_v31  ;;  %v1600_v4 = vpack.c.bf16 %v1578_v28, %v1576_v6  ;;  %v1581_v33 = vmul.f32 %v2389_v36, %v3234_v44  ;;  %v1580_v45 = vmul.f32 %v2389_v36, %v3222_v14 }
 0x624   : > { %1672 = vmatprep.mubr.bf16.mxu1 %v1601_v37  ;;  %v1540_v26 = vpop.xlane.xlu0 %1539 }
 0x625   : > { %v2391_v53 = vpop.eup %2390  ;;  %2396 = vrcp.f32 %v1540_v26 }
 0x626   : > { %1673 = vmatmul.mubr.bf16.gmra.mxu1 %v1600_v4  ;;  %v1583_v9 = vmul.f32 %v2391_v53, %v3244_v43  ;;  %v1582_v29 = vmul.f32 %v2391_v53, %v3238_v32 }
 0x628   : > { %v1603_v54 = vpack.c.bf16 %v1583_v9, %v1581_v33  ;;  %v1602_v49 = vpack.c.bf16 %v1582_v29, %v1580_v45 }
 0x629   : > { %v1543_v47 = vpop.xlane.xlu1 %1542  ;;  %v2393_v61 = vpop.eup %2392 }
 0x62a   : > { %2398 = vrcp.f32 %v1543_v47  ;;  %1680 = vmatprep.mubr.bf16.mxu1 %v1603_v54  ;;  %v1585_v20 = vmul.f32 %v2393_v61, %v3252_v46  ;;  %v1584_v32 = vmul.f32 %v2393_v61, %v3248_v19 }
 0x62d   : > { %v2395_v60 = vpop.eup %2394 }
 0x62e   : > { %1681 = vmatmul.mubr.bf16.gmra.mxu1 %v1602_v49  ;;  %v1587_v55 = vmul.f32 %v2395_v60, %v3260_v7  ;;  %v1586_v44 = vmul.f32 %v2395_v60, %v3256_v18 }
 0x630   : > { %v1605_v43 = vpack.c.bf16 %v1587_v55, %v1585_v20  ;;  %v1604_v56 = vpack.c.bf16 %v1586_v44, %v1584_v32 }
 0x632   : > { %1688 = vmatprep.mubr.bf16.mxu1 %v1605_v43  ;;  %v2397_v14 = vpop.eup %2396 }
 0x633   : > { %v1589_v51 = vmul.f32 %v2397_v14, %v3268_v10  ;;  %v1588_v46 = vmul.f32 %v2397_v14, %v3264_v0 }
 0x636   : > { %1689 = vmatmul.mubr.bf16.gmra.mxu1 %v1604_v56 }
 0x637   : > { %v2399_v34 = vpop.eup %2398 }
 0x638   : > { %v1591_v39 = vmul.f32 %v2399_v34, %v3276_v35  ;;  %v1590_v7 = vmul.f32 %v2399_v34, %v3272_v11 }
 0x63a   : > { %v1607_v59 = vpack.c.bf16 %v1591_v39, %v1589_v51  ;;  %v1606_v18 = vpack.c.bf16 %v1590_v7, %v1588_v46 }
 0x63c   : > { %1696 = vmatprep.mubr.bf16.mxu1 %v1607_v59 }
 0x63e   : > { %1697 = vmatmul.mubr.bf16.gmra.mxu1 %v1606_v18 }
 0x6c4   : > { %v1969_v19 = vpop.f32.mrf.mxu1 }
 0x6c6   : > { %v1970_v27 = vpop.f32.mrf.mxu1 }
 0x6c7   : > { %v1971_v23 = vadd.f32 %v1970_v27, %v1969_v19 }
 0x6c8   : > { %v1972_v25 = vpop.f32.mrf.mxu1 }
 0x6c9   : > { %1705 = vst [vmem:[%s2758_s18] sm:$0xff] %v1971_v23 }
 0x6ca   : > { %v1973_v10 = vpop.f32.mrf.mxu1 }
 0x6cb   : > { %v1974_v40 = vadd.f32 %v1973_v10, %v1972_v25 }
 0x6cc   : > { %v1975_v24 = vpop.f32.mrf.mxu1 }
 0x6cd   : > { %1706 = vst [vmem:[%s2758_s18 + $0x8] sm:$0xff] %v1974_v40 }
 0x6ce   : > { %v1976_v0 = vpop.f32.mrf.mxu1 }
 0x6cf   : > { %v1977_v35 = vadd.f32 %v1976_v0, %v1975_v24 }
 0x6d0   : > { %v1978_v11 = vpop.f32.mrf.mxu1 }
 0x6d1   : > { %1707 = vst [vmem:[%s2758_s18 + $0x10] sm:$0xff] %v1977_v35 }
 0x6d2   : > { %v1979_v62 = vpop.f32.mrf.mxu1 }
 0x6d3   : > { %v1980_v41 = vadd.f32 %v1979_v62, %v1978_v11 }
 0x6d5   : > { %1708 = vst [vmem:[%s2758_s18 + $0x18] sm:$0xff] %v1980_v41 }
 0x6d6   : > { %v1981_v1 = vpop.f32.mrf.mxu1 }
 0x6d8   : > { %v1982_v52 = vpop.f32.mrf.mxu1 }
 0x6d9   : > { %v1983_v3 = vadd.f32 %v1982_v52, %v1981_v1 }
 0x6da   : > { %v1984_v12 = vpop.f32.mrf.mxu1 }
 0x6db   : > { %1709 = vst [vmem:[%s2758_s18 + $0x20] sm:$0xff] %v1983_v3 }
 0x6dc   : > { %v1985_v17 = vpop.f32.mrf.mxu1 }
 0x6dd   : > { %v1986_v50 = vadd.f32 %v1985_v17, %v1984_v12 }
 0x6de   : > { %v1987_v2 = vpop.f32.mrf.mxu1 }
 0x6df   : > { %1710 = vst [vmem:[%s2758_s18 + $0x28] sm:$0xff] %v1986_v50 }
 0x6e0   : > { %v1988_v8 = vpop.f32.mrf.mxu1 }
 0x6e1   : > { %v1989_v16 = vadd.f32 %v1988_v8, %v1987_v2 }
 0x6e2   : > { %v1990_v13 = vpop.f32.mrf.mxu1 }
 0x6e3   : > { %1711 = vst [vmem:[%s2758_s18 + $0x30] sm:$0xff] %v1989_v16 }
 0x6e4   : > { %v1991_v15 = vpop.f32.mrf.mxu1 }
 0x6e5   : > { %v1992_v48 = vadd.f32 %v1991_v15, %v1990_v13 }
 0x6e6   : > { %v1993_v30 = vpop.f32.mrf.mxu1 }
 0x6e7   : > { %1712 = vst [vmem:[%s2758_s18 + $0x38] sm:$0xff] %v1992_v48 }
 0x6e8   : > { %v1994_v38 = vpop.f32.mrf.mxu1 }
 0x6e9   : > { %v1995_v42 = vadd.f32 %v1994_v38, %v1993_v30 }
 0x6ea   : > { %v1996_v58 = vpop.f32.mrf.mxu1 }
 0x6eb   : > { %1713 = vst [vmem:[%s2758_s18 + $0x40] sm:$0xff] %v1995_v42 }
 0x6ec   : > { %v1997_v21 = vpop.f32.mrf.mxu1 }
 0x6ed   : > { %v1998_v5 = vadd.f32 %v1997_v21, %v1996_v58 }
 0x6ee   : > { %v1999_v57 = vpop.f32.mrf.mxu1 }
 0x6ef   : > { %1714 = vst [vmem:[%s2758_s18 + $0x48] sm:$0xff] %v1998_v5 }
 0x6f0   : > { %v2000_v63 = vpop.f32.mrf.mxu1 }
 0x6f1   : > { %v2001_v31 = vadd.f32 %v2000_v63, %v1999_v57 }
 0x6f2   : > { %v2002_v22 = vpop.f32.mrf.mxu1 }
 0x6f3   : > { %1715 = vst [vmem:[%s2758_s18 + $0x50] sm:$0xff] %v2001_v31 }
 0x6f4   : > { %v2003_v6 = vpop.f32.mrf.mxu1 }
 0x6f5   : > { %v2004_v28 = vadd.f32 %v2003_v6, %v2002_v22 }
 0x6f6   : > { %v2005_v37 = vpop.f32.mrf.mxu1 }
 0x6f7   : > { %1716 = vst [vmem:[%s2758_s18 + $0x58] sm:$0xff] %v2004_v28 }
 0x6f8   : > { %v2006_v4 = vpop.f32.mrf.mxu1 }
 0x6f9   : > { %v2007_v36 = vadd.f32 %v2006_v4, %v2005_v37 }
 0x6fa   : > { %v2008_v53 = vpop.f32.mrf.mxu1 }
 0x6fb   : > { %1717 = vst [vmem:[%s2758_s18 + $0x60] sm:$0xff] %v2007_v36 }
 0x6fc   : > { %v2009_v26 = vpop.f32.mrf.mxu1 }
 0x6fd   : > { %v2010_v33 = vadd.f32 %v2009_v26, %v2008_v53 }
 0x6fe   : > { %v2011_v9 = vpop.f32.mrf.mxu1 }
 0x6ff   : > { %1718 = vst [vmem:[%s2758_s18 + $0x68] sm:$0xff] %v2010_v33 }
 0x700   : > { %v2012_v29 = vpop.f32.mrf.mxu1 }
 0x701   : > { %v2013_v54 = vadd.f32 %v2012_v29, %v2011_v9 }
 0x702   : > { %v2014_v45 = vpop.f32.mrf.mxu1 }
 0x703   : > { %1719 = vst [vmem:[%s2758_s18 + $0x70] sm:$0xff] %v2013_v54 }
 0x704   : > { %v2015_v47 = vpop.f32.mrf.mxu1 }
 0x705   : > { %v2016_v49 = vadd.f32 %v2015_v47, %v2014_v45 }
 0x707   : > { %1720 = vst [vmem:[%s2758_s18 + $0x78] sm:$0xff] %v2016_v49 }
 0x708 PF: > { %s1888_s27 = sshll.u32 %s2599_s16, 11  ;;  %s1735_s30 = sshll.u32 %s2758_s18, 4  ;;  %s3335_s30 = int_to_ptr.vmem [resolvable:$true] %s1735_s30 }
 0x709   : > { %s3332_s29 = scalar_lea.hbm %s3380_s3, %s1888_s27  ;;  %s1722_s4 = scalar_lea.sflag [#allocation4], %s2713_s5 }
 0x70a   : > { %s2480_s21 = scalar_lea.vmem %s3335_s30, 2048  ;;  %p3395_p11 = scmp.ne.s32.totalorder %s3389_s10, 0 }
 0x70b   : > { %p2481_p7 = scmp.ne.s32.totalorder %s3335_s30, %s2480_s21  ;;  %s2555_s22 = smov [#allocation8]  }
 0x70c   : > { %s2484_s17 = sshll.u32 %s2555_s22, 4  ;;  %s2485_s17 = int_to_ptr.vmem [resolvable:$false] %s2484_s17 }
 0x70d   : > { %p2482_p12 = pnand %p2481_p7, %p3395_p11  ;;  %s2486_s16 = scalar_lea.vmem %s2485_s17, 4096 }
 0x70e   : > { %p2487_p0 = scmp.lt.s32.totalorder %s3335_s30, %s2485_s17  ;;  %p2488_p5 = scmp.lt.s32.totalorder %s2486_s16, %s2480_s21 }
 0x70f   : > { %p2483_p13 = pneg %p2482_p12 }
 0x710   : > { %p2489_p10 = por %p2488_p5, %p2487_p0 }
 0x712   : > { %p2490_p9 = pnand %p2489_p10, %p2483_p13 }
 0x714   : > { %2493 = shalt.err (!%p2490_p9)
}
 0x715   : > { %s2494_s23 = scalar_lea.hbm %s3332_s29, 2048  ;;  %s2498_s6 = scalar_lea.hbm %s3380_s3, 6144 }
 0x716   : > { %p2495_p1 = scmp.ne.s32.totalorder %s3332_s29, %s2494_s23  ;;  %p2499_p8 = scmp.lt.s32.totalorder %s3332_s29, %s3380_s3 }
 0x717   : > { %p2500_p3 = scmp.lt.s32.totalorder %s2498_s6, %s2494_s23 }
 0x718   : > { %p2496_p4 = pnand %p2495_p1, %p3395_p11 }
 0x719   : > { %p2501_p2 = por %p2500_p3, %p2499_p8 }
 0x71a   : > { %p2497_p6 = pneg %p2496_p4 }
 0x71c   : > { %p2502_p7 = pnand %p2501_p2, %p2497_p6 }
 0x71e   : > { %2505 = shalt.err (!%p2502_p7)
}
 0x71f   : > { %s2556_s20 = smov 128   ;;  %s2557_s18 = smov 8  }
 0x720   : > { %2091 = dma.vmem_to_hbm [thread:$0]  (%p3395_p11), %s3335_s30, 2048, %s3332_s29, %s1722_s4, %s2556_s20, %s2556_s20, %s2557_s18  }
 0x721 PF: > { %p2113_p12 = scmp.ge.s32.totalorder %s2548_s15, 2  ;;  %s1750_s27 = sand.u32 1, %s2536_s12  }
 0x722   : > { %p3396_p13 = scmp.ne.s32.totalorder %s3386_s19, 0  ;;  %s1751_s28 = scalar_lea.sflag [#allocation4], %s1750_s27 }
 0x724   : > { %p2105_p0 = pnand %p2113_p12, %p3396_p13 }
 0x726   : > { %p2106_p5 = pneg %p2105_p0 }
 0x728   : > { %2531 = dma.done.wait (%p2106_p5), %s1751_s28, 2048  }
 0x729   : > { %2533 = vsyncadd (%p2106_p5), %s1751_s28, 4294965248  ;;  %p17_p10 = scmp.ge.s32.totalorder %s2655_s7, 5   ;;  %s3397_s12 = smov %s2540_s13 }
 0x72a   : > { %s3398_s13 = smov %s2544_s14  ;;  %s3399_s14 = smov %s2671_s11 }
 0x72b   : > { %s3400_s15 = smov %s2655_s7  ;;  %19 = sbr.rel (!%p17_p10) target bundleno = 6 (0x6), region = 93 }
 0x730   :  { %1756 = vsyncpa [#allocation3], 1 }
 0x731   :  { %1758 = vsyncpa [#allocation3 + $0x1], 1 }
 0x732   :  { %1759 = vsyncpa [#allocation6], 1 }
 0x733   :  { %1760 = vsyncpa [#allocation4], 1 }
 0x734   :  { %1762 = vsyncpa [#allocation4 + $0x1], 1 }

// kernel: tpu_custom_call.1
= control target key start
LH: loop header
LB: loop body
LE: loop exit
PB: predicated region body
PF: predicated region fallthrough
CT: control target
= control target key end

     0   :  { %8 = vsyncpa [#allocation3], 0  ;;  %s3377_s0 = inlined_call_operand.hbm [shape: bf16[384,128], index: 0, kind: input, shape index: {}]   ;;  %s3378_s1 = inlined_call_operand.hbm [shape: bf16[128,128], index: 1, kind: input, shape index: {}]   ;;  %s3379_s2 = inlined_call_operand.hbm [shape: bf16[256,128], index: 2, kind: input, shape index: {}]   ;;  %s3380_s3 = inlined_call_operand.hbm [shape: f32[384,128], index: 3, kind: output, shape index: {}]  }
   0x1   :  { %10 = vsyncpa [#allocation3 + $0x1], 0 }
   0x2   :  { %11 = vsyncpa [#allocation6], 0 }
   0x3   :  { %12 = vsyncpa [#allocation4], 0 }
   0x4   :  { %14 = vsyncpa [#allocation4 + $0x1], 0  ;;  %s2578_s12 = smov 0   ;;  %s2580_s13 = smov 0  }
   0x5   :  { %s2582_s14 = smov 0   ;;  %s2584_s15 = smov 0  }
   0x6 LB: > { %s2599_s16 = sadd.s32 4294967295, %s2548_s15   ;;  %s1827_s17 = sadd.s32 4294967294, %s2548_s15   ;;  %s2548_s15 = sphi %s2584_s15, %s3400_s15   ;;  %s2544_s14 = sphi %s2582_s14, %s3399_s14   ;;  %s2540_s13 = sphi %s2580_s13, %s3398_s13   ;;  %s2536_s12 = sphi %s2578_s12, %s3397_s12  }
   0x7   : > { %p40_p0 = scmp.ne.s32.totalorder %s2540_s13, %s2536_s12  ;;  %p3381_p1 = scmp.eq.s32.totalorder %s2599_s16, 0 }
   0x8   : > { %p106_p2 = scmp.eq.s32.totalorder %s2599_s16, 2  ;;  %p112_p3 = scmp.eq.s32.totalorder %s1827_s17, 2 }
   0x9   : > { %p2608_p4 = por %p3381_p1, %p40_p0  ;;  %p1828_p5 = scmp.ge.s32.totalorder %s2548_s15, 1 }
   0xa   : > { %p2613_p6 = por %p112_p3, %p40_p0  ;;  %p119_p7 = scmp.lt.s32.totalorder %s2548_s15, 4 }
   0xb   : > { %s3385_s18 = scalar_select %p2608_p4, 1, 0 }
   0xc   : > { %s3386_s19 = scalar_select %p2613_p6, 1, 0 }
   0xd   : > { %p2618_p8 = pnand %p1828_p5, %p119_p7  ;;  %s2550_s21 = smov [#allocation5]  }
   0xe   : > { %s131_s22 = sshll.u32 %s2550_s21, 4  ;;  %s2551_s24 = smov [#allocation7]   ;;  %s132_s22 = int_to_ptr.vmem [resolvable:$true] %s131_s22 }
   0xf   : > { %s3387_s20 = scalar_select %p2618_p8, 1, 0 }
  0x10   : > { %p2093_p9 = pneg %p2618_p8  ;;  %s144_s25 = sshll.u32 %s2551_s24, 4  ;;  %s145_s25 = int_to_ptr.vmem [resolvable:$true] %s144_s25 }
  0x11   : > { %s2411_s26 = scalar_lea.vmem %s132_s22, 1024  ;;  %p2419_p3 = scmp.lt.s32.totalorder %s132_s22, %s132_s22 }
  0x12   : > { %p2626_p10 = pnand %p2093_p9, %p3381_p1  ;;  %p2412_p12 = scmp.ne.s32.totalorder %s132_s22, %s2411_s26 }
  0x13   : > { %p2420_p5 = scmp.lt.s32.totalorder %s2411_s26, %s2411_s26 }
  0x14   : > { %p2402_p11 = pneg %p2626_p10 }
  0x15   : > { %p2421_p7 = por %p2420_p5, %p2419_p3 }
  0x16   : > { %p2414_p13 = pnand %p2412_p12, %p2402_p11 }
  0x18   : > { %p2415_p0 = pneg %p2414_p13 }
  0x1a   : > { %p2422_p9 = pnand %p2421_p7, %p2415_p0 }
  0x1c   : > { %2425 = shalt.err (!%p2422_p9)
}
  0x1d   : > { %s2552_s27 = smov 64   ;;  %s2553_s28 = smov 4  }
  0x1e   : > { %2096 = dma.hbm_to_vmem [thread:$0]  (!%p2626_p10), %s3378_s1, 1024, %s132_s22, [#allocation6], %s2552_s27, %s2552_s27, %s2553_s28  }
  0x1f   : > { %s2437_s4 = scalar_lea.vmem %s145_s25, 2048  ;;  %p2445_p0 = scmp.lt.s32.totalorder %s145_s25, %s145_s25 }
  0x20   : > { %p2438_p12 = scmp.ne.s32.totalorder %s145_s25, %s2437_s4  ;;  %p2446_p5 = scmp.lt.s32.totalorder %s2437_s4, %s2437_s4 }
  0x22   : > { %p2440_p13 = pnand %p2438_p12, %p2402_p11  ;;  %p2447_p7 = por %p2446_p5, %p2445_p0 }
  0x24   : > { %p2441_p3 = pneg %p2440_p13 }
  0x26   : > { %p2448_p9 = pnand %p2447_p7, %p2441_p3 }
  0x28   : > { %2451 = shalt.err (!%p2448_p9)
}
  0x29   : > { %2099 = dma.hbm_to_vmem [thread:$0]  (!%p2626_p10), %s3379_s2, 2048, %s145_s25, [#allocation6], %s2552_s27, %s2552_s27, %s2553_s28  }
  0x2a   : > { %s2655_s7 = sadd.s32 1, %s2548_s15   ;;  %s27_s8 = sadd.s32 1, %s2544_s14 }
  0x2b   : > { %s24_s9 = ssub.s32 %s2548_s15, %s2655_s7  ;;  %p34_p11 = scmp.ne.s32.totalorder %s2544_s14, %s2540_s13 }
  0x2c   : > { %p25_p12 = scmp.eq.s32.totalorder %s24_s9, 0  ;;  %p35_p13 = scmp.eq.s32.totalorder %s2548_s15, 0 }
  0x2d   : > { %p2665_p3 = por %p106_p2, %p34_p11  ;;  %p2110_p0 = scmp.lt.s32.totalorder %s2548_s15, 3 }
  0x2e   : > { %s2671_s11 = scalar_select %p25_p12, %s2544_s14, %s27_s8  }
  0x2f   : > { %s3389_s10 = scalar_select %p2665_p3, 1, 0 }
  0x30   : > { %p36_p5 = por %p35_p13, %p34_p11  ;;  %s158_s17 = sand.u32 1, %s2544_s14  }
  0x31   : > { %s1832_s21 = sshll.u32 %s158_s17, 6  ;;  %s1887_s22 = sshll.u32 %s2548_s15, 10 }
  0x32   : > { %s2678_s25 = scalar_lea.hbm %s3377_s0, %s1887_s22  ;;  %s162_s26 = scalar_lea.vmem [#allocation2], %s1832_s21 }
  0x33   : > { %s169_s29 = sshll.u32 %s162_s26, 4  ;;  %p2682_p2 = pnand %p2110_p0, %p36_p5  ;;  %s2680_s29 = int_to_ptr.vmem [resolvable:$true] %s169_s29 }
  0x34   : > { %s2686_s4 = scalar_lea.sflag [#allocation3], %s158_s17  ;;  %s2452_s5 = scalar_lea.hbm %s2678_s25, 1024 }
  0x35   : > { %p2453_p10 = scmp.ne.s32.totalorder %s2678_s25, %s2452_s5  ;;  %p2454_p7 = pneg %p2682_p2 }
  0x36   : > { %s2457_s9 = scalar_lea.hbm %s3377_s0, 3072  ;;  %p2458_p12 = scmp.lt.s32.totalorder %s2678_s25, %s3377_s0 }
  0x37   : > { %p2455_p9 = pnand %p2454_p7, %p2453_p10  ;;  %p2459_p13 = scmp.lt.s32.totalorder %s2457_s9, %s2452_s5 }
  0x39   : > { %p2456_p11 = pneg %p2455_p9  ;;  %p2460_p0 = por %p2459_p13, %p2458_p12 }
  0x3b   : > { %p2461_p5 = pnand %p2460_p0, %p2456_p11 }
  0x3d   : > { %2464 = shalt.err (!%p2461_p5)
}
  0x3e   : > { %s2465_s17 = scalar_lea.vmem %s2680_s29, 1024  ;;  %s2554_s23 = smov [#allocation2]  }
  0x3f   : > { %p2466_p1 = scmp.ne.s32.totalorder %s2680_s29, %s2465_s17  ;;  %s2470_s24 = sshll.u32 %s2554_s23, 4  ;;  %s2471_s24 = int_to_ptr.vmem [resolvable:$false] %s2470_s24 }
  0x40   : > { %s2472_s26 = scalar_lea.vmem %s2471_s24, 2048  ;;  %p2473_p9 = scmp.lt.s32.totalorder %s2680_s29, %s2471_s24 }
  0x41   : > { %p2468_p6 = pnand %p2466_p1, %p2454_p7  ;;  %p2474_p3 = scmp.lt.s32.totalorder %s2472_s26, %s2465_s17 }
  0x43   : > { %p2469_p10 = pneg %p2468_p6  ;;  %p2475_p4 = por %p2474_p3, %p2473_p9 }
  0x45   : > { %p2476_p8 = pnand %p2475_p4, %p2469_p10 }
  0x47   : > { %2479 = shalt.err (!%p2476_p8)
}
  0x48   : > { %2103 = dma.hbm_to_vmem [thread:$0]  (!%p2682_p2), %s2678_s25, 1024, %s2680_s29, %s2686_s4, %s2552_s27, %s2552_s27, %s2553_s28  }
  0x49   : > { %p3391_p1 = scmp.ne.s32.totalorder %s3387_s20, 0 }
  0x4a   : > { %s2713_s5 = sand.u32 (!%p3391_p1), 1, %s2540_s13   ;;  %p3392_p4 = scmp.ne.s32.totalorder (!%p3391_p1), %s3385_s18, 0 }
  0x4b   : > { %181 = sbr.rel (%p3391_p1) target bundleno = 1825 (0x721), region = 32  ;;  %s1836_s6 = sshll.u32 (!%p3391_p1), %s2713_s5, 6 }
  0x4c   : > { %s184_s8 = scalar_lea.sflag (!%p3391_p1), [#allocation3], %s2713_s5  ;;  %s187_s9 = scalar_lea.vmem (!%p3391_p1), [#allocation2], %s1836_s6 }
  0x50   : > { %2523 = dma.done.wait (%p3392_p4), %s184_s8, 1024  }
  0x51   : > { %2525 = vsyncadd (%p3392_p4), %s184_s8, 4294966272  ;;  %p3393_p6 = scmp.eq.s32.totalorder %s2599_s16, 0 }
  0x53   : > { %2527 = dma.done.wait (%p3393_p6), [#allocation6], 3072   ;;  %p3394_p8 = pmov %p3393_p6 }
  0x54   : > { %s1839_s20 = sshll.u32 %s2713_s5, 7  ;;  %v2726_v0 = vld [vmem:[%s187_s9] sm:$0xf]  ;;  %v2728_v1 = vld [vmem:[%s187_s9 + $0x4] sm:$0xf]  ;;  %p1840_p3 = scmp.ge.s32.totalorder %s2599_s16, 2 }
  0x55   : > { %2529 = vsyncadd (%p3394_p8), [#allocation6], 4294964224  ;;  %v2730_v2 = vld [vmem:[%s187_s9 + $0x8] sm:$0xf]  ;;  %v2732_v3 = vld [vmem:[%s187_s9 + $0xc] sm:$0xf] }
  0x56   : > { %v2734_v4 = vld [vmem:[%s187_s9 + $0x10] sm:$0xf]  ;;  %v2736_v5 = vld [vmem:[%s187_s9 + $0x14] sm:$0xf]  ;;  %v2738_v6 = vld [vmem:[%s187_s9 + $0x18] sm:$0xf] }
  0x57   : > { %v2740_v7 = vld [vmem:[%s187_s9 + $0x1c] sm:$0xf]  ;;  %v2742_v8 = vld [vmem:[%s187_s9 + $0x20] sm:$0xf]  ;;  %v2744_v9 = vld [vmem:[%s187_s9 + $0x24] sm:$0xf] }
  0x58   : > { %v2746_v10 = vld [vmem:[%s187_s9 + $0x28] sm:$0xf]  ;;  %v2748_v11 = vld [vmem:[%s187_s9 + $0x2c] sm:$0xf]  ;;  %v2750_v12 = vld [vmem:[%s187_s9 + $0x30] sm:$0xf] }
  0x59   : > { %v2752_v13 = vld [vmem:[%s187_s9 + $0x34] sm:$0xf]  ;;  %v2754_v14 = vld [vmem:[%s187_s9 + $0x38] sm:$0xf]  ;;  %v2756_v15 = vld [vmem:[%s187_s9 + $0x3c] sm:$0xf] }
  0x5a   : > { %s2758_s18 = scalar_lea.vmem [#allocation8], %s1839_s20  ;;  %240 = sbr.rel (%p1840_p3) target bundleno = 926 (0x39e), region = 48 }
  0x5f   : > { %v2152_v16 = vld [vmem:[#allocation5 + $0x38] sm:$0xff]   ;;  %v1841_v17 = vcombine.low %v2726_v0, %v2728_v1  ;;  %v2153_v18 = vld [vmem:[#allocation5 + $0x30] sm:$0xff]   ;;  %v2154_v19 = vld [vmem:[#allocation5 + $0x28] sm:$0xff]   ;;  %v1842_v25 = vcombine.low %v2730_v2, %v2732_v3  ;;  %v1843_v26 = vcombine.low %v2734_v4, %v2736_v5  ;;  %v1844_v27 = vcombine.low %v2738_v6, %v2740_v7 }
  0x60   : > { %2017 = vmatprep.subr.bf16.mxu0 %v2152_v16  ;;  %2049 = vmatprep.subr.bf16.mxu1 %v2152_v16  ;;  %v2155_v20 = vld [vmem:[#allocation5 + $0x20] sm:$0xff]   ;;  %v2156_v21 = vld [vmem:[#allocation5 + $0x18] sm:$0xff]   ;;  %v2157_v22 = vld [vmem:[#allocation5 + $0x10] sm:$0xff]   ;;  %v1845_v28 = vcombine.low %v2742_v8, %v2744_v9  ;;  %v1846_v29 = vcombine.low %v2746_v10, %v2748_v11  ;;  %v1847_v30 = vcombine.low %v2750_v12, %v2752_v13 }
  0x61   : > { %2033 = vmatprep.mubr.bf16.mxu0 %v1841_v17  ;;  %2018 = vmatpush3.bf16.xpose.msra.mxu0 %v2152_v16  ;;  %v2158_v23 = vld [vmem:[#allocation5 + $0x8] sm:$0xff]   ;;  %v2159_v24 = vld [vmem:[#allocation5] sm:$0xff]   ;;  %v1848_v31 = vcombine.low %v2754_v14, %v2756_v15 }
  0x62   : > { %2019 = vmatprep.subr.bf16.mxu0 %v2153_v18  ;;  %2050 = vmatpush3.bf16.msra.mxu1 %v2152_v16 }
  0x63   : > { %2051 = vmatprep.subr.bf16.mxu1 %v2153_v18 }
  0x66   : > { %2052 = vmatpush3.bf16.msra.mxu1 %v2153_v18 }
  0x67   : > { %2053 = vmatprep.subr.bf16.mxu1 %v2154_v19 }
  0x69   : > { %2020 = vmatpush3.bf16.xpose.msra.mxu0 %v2153_v18 }
  0x6a   : > { %2021 = vmatprep.subr.bf16.mxu0 %v2154_v19  ;;  %2054 = vmatpush3.bf16.msra.mxu1 %v2154_v19 }
  0x6b   : > { %2055 = vmatprep.subr.bf16.mxu1 %v2155_v20 }
  0x6e   : > { %2056 = vmatpush3.bf16.msra.mxu1 %v2155_v20 }
  0x6f   : > { %2057 = vmatprep.subr.bf16.mxu1 %v2156_v21 }
  0x71   : > { %2022 = vmatpush3.bf16.xpose.msra.mxu0 %v2154_v19 }
  0x72   : > { %2023 = vmatprep.subr.bf16.mxu0 %v2155_v20  ;;  %2058 = vmatpush3.bf16.msra.mxu1 %v2156_v21 }
  0x73   : > { %2059 = vmatprep.subr.bf16.mxu1 %v2157_v22 }
  0x76   : > { %2060 = vmatpush3.bf16.msra.mxu1 %v2157_v22 }
  0x77   : > { %2061 = vmatprep.subr.bf16.mxu1 %v2158_v23 }
  0x79   : > { %2024 = vmatpush3.bf16.xpose.msra.mxu0 %v2155_v20 }
  0x7a   : > { %2025 = vmatprep.subr.bf16.mxu0 %v2156_v21  ;;  %2062 = vmatpush3.bf16.msra.mxu1 %v2158_v23 }
  0x7b   : > { %2063 = vmatprep.subr.bf16.mxu1 %v2159_v24 }
  0x7e   : > { %2064 = vmatpush3.bf16.msra.mxu1 %v2159_v24 }
  0x81   : > { %2026 = vmatpush3.bf16.xpose.msra.mxu0 %v2156_v21 }
  0x82   : > { %2027 = vmatprep.subr.bf16.mxu0 %v2157_v22 }
  0x89   : > { %2028 = vmatpush3.bf16.xpose.msra.mxu0 %v2157_v22 }
  0x8a   : > { %2029 = vmatprep.subr.bf16.mxu0 %v2158_v23 }
  0x91   : > { %2030 = vmatpush3.bf16.xpose.msra.mxu0 %v2158_v23 }
  0x92   : > { %2031 = vmatprep.subr.bf16.mxu0 %v2159_v24 }
  0x99   : > { %2032 = vmatpush3.bf16.xpose.msra.mxu0 %v2159_v24 }
  0xa0   : > { %2034 = vmatmul.mubr.bf16.vlgmr.msra.gmra.mxu0 %v1842_v25 }
  0xa1   : > { %2037 = vmatprep.mubr.bf16.mxu0 %v1843_v26 }
  0xa8   : > { %2038 = vmatmul.mubr.bf16.gmra.mxu0 %v1844_v27 }
  0xa9   : > { %2041 = vmatprep.mubr.bf16.mxu0 %v1845_v28 }
  0xb0   : > { %2042 = vmatmul.mubr.bf16.gmra.mxu0 %v1846_v29 }
  0xb1   : > { %2045 = vmatprep.mubr.bf16.mxu0 %v1847_v30 }
  0xb8   : > { %2046 = vmatmul.mubr.bf16.gmra.mxu0 %v1848_v31 }
 0x160   : > { %v2035_v32 = vpop.f32.mrf.mxu0 }
 0x161   : > { %v468_v33 = vmul.f32 0.1, %v2035_v32  ;;  %vm452_vm0 = vcmp.ge.f32.partialorder %v2035_v32, 0.0 }
 0x162   : > { %v387_v34 = vpop.f32.mrf.mxu0 }
 0x163   : > { %v466_v35 = vmul.f32 0.1, %v387_v34  ;;  %v2777_v36 = vsel %vm452_vm0, %v2035_v32, %v468_v33  ;;  %vm450_vm1 = vcmp.ge.f32.partialorder %v387_v34, 0.0 }
 0x164   : > { %v2036_v37 = vpop.f32.mrf.mxu0  ;;  %v500_v38 = vmul.f32 %v2777_v36, %v2777_v36 }
 0x165   : > { %vm453_vm2 = vcmp.ge.f32.partialorder %v2036_v37, 0.0  ;;  %v469_v39 = vmul.f32 0.1, %v2036_v37  ;;  %v2781_v40 = vsel %vm450_vm1, %v387_v34, %v466_v35 }
 0x166   : > { %518 = vadd.xlane.f32.xlu1 %v500_v38  ;;  %v390_v41 = vpop.f32.mrf.mxu0  ;;  %v498_v42 = vmul.f32 %v2781_v40, %v2781_v40 }
 0x167   : > { %vm451_vm3 = vcmp.ge.f32.partialorder %v390_v41, 0.0  ;;  %v467_v43 = vmul.f32 0.1, %v390_v41  ;;  %v2785_v44 = vsel %vm453_vm2, %v2036_v37, %v469_v39 }
 0x168   : > { %514 = vadd.xlane.f32.xlu0 %v498_v42  ;;  %v2039_v45 = vpop.f32.mrf.mxu0  ;;  %v501_v46 = vmul.f32 %v2785_v44, %v2785_v44 }
 0x169   : > { %v2789_v47 = vsel %vm451_vm3, %v390_v41, %v467_v43  ;;  %v472_v50 = vmul.f32 0.1, %v2039_v45  ;;  %vm456_vm5 = vcmp.ge.f32.partialorder %v2039_v45, 0.0 }
 0x16a   : > { %520 = vadd.xlane.f32.xlu1 %v501_v46  ;;  %v403_v48 = vpop.f32.mrf.mxu0  ;;  %v499_v49 = vmul.f32 %v2789_v47, %v2789_v47 }
 0x16b   : > { %vm454_vm4 = vcmp.ge.f32.partialorder %v403_v48, 0.0  ;;  %v470_v51 = vmul.f32 0.1, %v403_v48  ;;  %v2797_v58 = vsel %vm456_vm5, %v2039_v45, %v472_v50 }
 0x16c   : > { %516 = vadd.xlane.f32.xlu0 %v499_v49  ;;  %v2040_v52 = vpop.f32.mrf.mxu0  ;;  %v504_v62 = vmul.f32 %v2797_v58, %v2797_v58 }
 0x16d   : > { %v2793_v53 = vsel %vm454_vm4, %v403_v48, %v470_v51  ;;  %v473_v56 = vmul.f32 0.1, %v2040_v52  ;;  %vm457_vm7 = vcmp.ge.f32.partialorder %v2040_v52, 0.0 }
 0x16e   : > { %v406_v54 = vpop.f32.mrf.mxu0  ;;  %v502_v55 = vmul.f32 %v2793_v53, %v2793_v53 }
 0x16f   : > { %vm455_vm6 = vcmp.ge.f32.partialorder %v406_v54, 0.0  ;;  %v471_v57 = vmul.f32 0.1, %v406_v54  ;;  %v2805_v18 = vsel %vm457_vm7, %v2040_v52, %v473_v56 }
 0x170   : > { %522 = vadd.xlane.f32.xlu0 %v502_v55  ;;  %v2043_v59 = vpop.f32.mrf.mxu0  ;;  %v505_v22 = vmul.f32 %v2805_v18, %v2805_v18 }
 0x171   : > { %v2799_v60 = vsel %vm455_vm6, %v406_v54, %v471_v57  ;;  %v476_v16 = vmul.f32 0.1, %v2043_v59  ;;  %vm460_vm9 = vcmp.ge.f32.partialorder %v2043_v59, 0.0 }
 0x172   : > { %v419_v61 = vpop.f32.mrf.mxu0  ;;  %v503_v63 = vmul.f32 %v2799_v60, %v2799_v60 }
 0x173   : > { %vm458_vm8 = vcmp.ge.f32.partialorder %v419_v61, 0.0  ;;  %v474_v17 = vmul.f32 0.1, %v419_v61  ;;  %v2813_v26 = vsel %vm460_vm9, %v2043_v59, %v476_v16 }
 0x174   : > { %526 = vadd.xlane.f32.xlu0 %v504_v62  ;;  %524 = vadd.xlane.f32.xlu1 %v503_v63  ;;  %v2044_v19 = vpop.f32.mrf.mxu0  ;;  %v508_v30 = vmul.f32 %v2813_v26, %v2813_v26 }
 0x175   : > { %v2807_v20 = vsel %vm458_vm8, %v419_v61, %v474_v17  ;;  %v477_v24 = vmul.f32 0.1, %v2044_v19  ;;  %vm461_vm11 = vcmp.ge.f32.partialorder %v2044_v19, 0.0 }
 0x176   : > { %v422_v21 = vpop.f32.mrf.mxu0  ;;  %v506_v23 = vmul.f32 %v2807_v20, %v2807_v20 }
 0x177   : > { %vm459_vm10 = vcmp.ge.f32.partialorder %v422_v21, 0.0  ;;  %v475_v25 = vmul.f32 0.1, %v422_v21  ;;  %v2821_v34 = vsel %vm461_vm11, %v2044_v19, %v477_v24 }
 0x178   : > { %528 = vadd.xlane.f32.xlu1 %v505_v22  ;;  %530 = vadd.xlane.f32.xlu0 %v506_v23  ;;  %v2047_v27 = vpop.f32.mrf.mxu0  ;;  %v509_v39 = vmul.f32 %v2821_v34, %v2821_v34 }
 0x179   : > { %v2815_v28 = vsel %vm459_vm10, %v422_v21, %v475_v25  ;;  %v480_v32 = vmul.f32 0.1, %v2047_v27  ;;  %vm464_vm13 = vcmp.ge.f32.partialorder %v2047_v27, 0.0 }
 0x17a   : > { %v435_v29 = vpop.f32.mrf.mxu0  ;;  %v507_v31 = vmul.f32 %v2815_v28, %v2815_v28 }
 0x17b   : > { %vm462_vm12 = vcmp.ge.f32.partialorder %v435_v29, 0.0  ;;  %v478_v33 = vmul.f32 0.1, %v435_v29  ;;  %v2829_v45 = vsel %vm464_vm13, %v2047_v27, %v480_v32 }
 0x17c   : > { %534 = vadd.xlane.f32.xlu0 %v508_v30  ;;  %532 = vadd.xlane.f32.xlu1 %v507_v31  ;;  %v2048_v35 = vpop.f32.mrf.mxu0  ;;  %v512_v48 = vmul.f32 %v2829_v45, %v2829_v45 }
 0x17d   : > { %v2823_v37 = vsel %vm462_vm12, %v435_v29, %v478_v33  ;;  %v481_v42 = vmul.f32 0.1, %v2048_v35  ;;  %vm465_vm15 = vcmp.ge.f32.partialorder %v2048_v35, 0.0 }
 0x17e   : > { %v438_v38 = vpop.f32.mrf.mxu0  ;;  %v510_v41 = vmul.f32 %v2823_v37, %v2823_v37 }
 0x17f   : > { %vm463_vm14 = vcmp.ge.f32.partialorder %v438_v38, 0.0  ;;  %v479_v43 = vmul.f32 0.1, %v438_v38  ;;  %v2837_v50 = vsel %vm465_vm15, %v2048_v35, %v481_v42 }
 0x180   : > { %536 = vadd.xlane.f32.xlu1 %v509_v39  ;;  %538 = vadd.xlane.f32.xlu0 %v510_v41  ;;  %v513_v51 = vmul.f32 %v2837_v50, %v2837_v50 }
 0x181   : > { %v2831_v46 = vsel %vm463_vm14, %v438_v38, %v479_v43 }
 0x182   : > { %v511_v49 = vmul.f32 %v2831_v46, %v2831_v46 }
 0x184   : > { %542 = vadd.xlane.f32.xlu0 %v512_v48  ;;  %540 = vadd.xlane.f32.xlu1 %v511_v49 }
 0x188   : > { %544 = vadd.xlane.f32.xlu1 %v513_v51 }
 0x1ef   : > { %v519_v52 = vpop.xlane.xlu1 %518 }
 0x1f0   : > { %v548_v54 = vadd.f32 1e-08, %v519_v52 }
 0x1f1   : > { %v515_v55 = vpop.xlane.xlu0 %514 }
 0x1f2   : > { %2160 = vrsqrt.f32 %v548_v54  ;;  %v546_v56 = vadd.f32 1e-08, %v515_v55 }
 0x1f3   : > { %v521_v57 = vpop.xlane.xlu1 %520 }
 0x1f4   : > { %2162 = vrsqrt.f32 %v546_v56  ;;  %v549_v59 = vadd.f32 1e-08, %v521_v57 }
 0x1f5   : > { %v517_v61 = vpop.xlane.xlu0 %516 }
 0x1f6   : > { %2164 = vrsqrt.f32 %v549_v59  ;;  %v547_v62 = vadd.f32 1e-08, %v517_v61 }
 0x1f8   : > { %2166 = vrsqrt.f32 %v547_v62 }
 0x1f9   : > { %v523_v63 = vpop.xlane.xlu0 %522 }
 0x1fa   : > { %v550_v16 = vadd.f32 1e-08, %v523_v63 }
 0x1fc   : > { %2168 = vrsqrt.f32 %v550_v16 }
 0x1fd   : > { %v527_v17 = vpop.xlane.xlu0 %526  ;;  %v525_v19 = vpop.xlane.xlu1 %524 }
 0x1fe   : > { %v552_v21 = vadd.f32 1e-08, %v527_v17  ;;  %v551_v22 = vadd.f32 1e-08, %v525_v19 }
 0x1ff   : > { %v2161_v23 = vpop.eup %2160 }
 0x200   : > { %v580_v24 = vmul.f32 6.0, %v2161_v23  ;;  %2170 = vrsqrt.f32 %v552_v21 }
 0x201   : > { %v2163_v25 = vpop.eup %2162  ;;  %2172 = vrsqrt.f32 %v551_v22  ;;  %v529_v27 = vpop.xlane.xlu1 %528  ;;  %v642_v22 = vlaneseq }
 0x202   : > { %v531_v29 = vpop.xlane.xlu0 %530  ;;  %v596_v30 = vmul.f32 %v580_v24, %v2777_v36  ;;  %v578_v31 = vmul.f32 6.0, %v2163_v25  ;;  %v553_v32 = vadd.f32 1e-08, %v529_v27 }
 0x203   : > { %v554_v33 = vadd.f32 1e-08, %v531_v29  ;;  %v2165_v35 = vpop.eup %2164 }
 0x204   : > { %v614_v38 = vmul.f32 1.442695, %v596_v30  ;;  %v594_v39 = vmul.f32 %v578_v31, %v2781_v40  ;;  %v581_v41 = vmul.f32 6.0, %v2165_v35  ;;  %2174 = vrsqrt.f32 %v553_v32 }
 0x205   : > { %v2167_v42 = vpop.eup %2166  ;;  %2176 = vrsqrt.f32 %v554_v33  ;;  %v533_v48 = vpop.xlane.xlu1 %532  ;;  %v2848_v33 = vand.u32 127, %v642_v22 }
 0x206   : > { %v535_v43 = vpop.xlane.xlu0 %534  ;;  %v610_v49 = vmul.f32 1.442695, %v594_v39  ;;  %v597_v51 = vmul.f32 %v581_v41, %v2785_v44  ;;  %v579_v52 = vmul.f32 6.0, %v2167_v42  ;;  %2178 = vpow2.f32 %v614_v38 }
 0x207   : > { %v556_v54 = vadd.f32 1e-08, %v535_v43  ;;  %v555_v36 = vadd.f32 1e-08, %v533_v48  ;;  %vm644_vm0 = vcmp.lt.s32.totalorder %v2848_v33, 120 }
 0x208   : > { %2180 = vpow2.f32 %v610_v49  ;;  %v616_v55 = vmul.f32 1.442695, %v597_v51  ;;  %v595_v56 = vmul.f32 %v579_v52, %v2789_v47 }
 0x209   : > { %v2169_v57 = vpop.eup %2168  ;;  %2182 = vrsqrt.f32 %v556_v54  ;;  %v537_v40 = vpop.xlane.xlu1 %536 }
 0x20a   : > { %v539_v59 = vpop.xlane.xlu0 %538  ;;  %2184 = vpow2.f32 %v616_v55  ;;  %v612_v61 = vmul.f32 1.442695, %v595_v56  ;;  %v582_v62 = vmul.f32 6.0, %v2169_v57  ;;  %v557_v63 = vadd.f32 1e-08, %v537_v40 }
 0x20b   : > { %2186 = vrsqrt.f32 %v555_v36  ;;  %v558_v16 = vadd.f32 1e-08, %v539_v59 }
 0x20c   : > { %2188 = vpow2.f32 %v612_v61  ;;  %v598_v44 = vmul.f32 %v582_v62, %v2793_v53 }
 0x20d   : > { %v2171_v17 = vpop.eup %2170  ;;  %2190 = vrsqrt.f32 %v557_v63  ;;  %v541_v21 = vpop.xlane.xlu1 %540 }
 0x20e   : > { %v543_v19 = vpop.xlane.xlu0 %542  ;;  %v2173_v23 = vpop.eup %2172  ;;  %v618_v47 = vmul.f32 1.442695, %v598_v44  ;;  %v584_v24 = vmul.f32 6.0, %v2171_v17  ;;  %2192 = vrsqrt.f32 %v558_v16  ;;  %v559_v29 = vadd.f32 1e-08, %v541_v21 }
 0x20f   : > { %v560_v25 = vadd.f32 1e-08, %v543_v19  ;;  %v583_v27 = vmul.f32 6.0, %v2173_v23 }
 0x210   : > { %2194 = vpow2.f32 %v618_v47  ;;  %v600_v30 = vmul.f32 %v584_v24, %v2797_v58 }
 0x211   : > { %v2175_v31 = vpop.eup %2174  ;;  %v599_v32 = vmul.f32 %v583_v27, %v2799_v60  ;;  %2196 = vrsqrt.f32 %v560_v25  ;;  %v545_v53 = vpop.xlane.xlu1 %544 }
 0x212   : > { %v2177_v35 = vpop.eup %2176  ;;  %v622_v38 = vmul.f32 1.442695, %v600_v30  ;;  %v585_v39 = vmul.f32 6.0, %v2175_v31  ;;  %2198 = vrsqrt.f32 %v559_v29  ;;  %v561_v41 = vadd.f32 1e-08, %v545_v53 }
 0x213   : > { %v620_v42 = vmul.f32 1.442695, %v599_v32  ;;  %v586_v43 = vmul.f32 6.0, %v2177_v35  ;;  %v2179_v48 = vpop.eup %2178 }
 0x214   : > { %2200 = vpow2.f32 %v622_v38  ;;  %v601_v49 = vmul.f32 %v585_v39, %v2805_v18  ;;  %v2861_v61 = vsel %vm644_vm0, %v2179_v48, 0.0 }
 0x215   : > { %v2181_v51 = vpop.eup %2180  ;;  %2202 = vpow2.f32 %v620_v42  ;;  %v602_v58 = vmul.f32 %v586_v43, %v2807_v20 }
 0x216   : > { %v2183_v60 = vpop.eup %2182  ;;  %v624_v52 = vmul.f32 1.442695, %v601_v49  ;;  %2204 = vrsqrt.f32 %v561_v41  ;;  %v2855_v54 = vsel %vm644_vm0, %v2181_v51, 0.0 }
 0x217   : > { %v2185_v36 = vpop.eup %2184  ;;  %v626_v55 = vmul.f32 1.442695, %v602_v58  ;;  %v588_v56 = vmul.f32 6.0, %v2183_v60  ;;  %661 = vadd.xlane.f32.xlu0 %v2855_v54 }
 0x218   : > { %v2187_v57 = vpop.eup %2186  ;;  %2206 = vpow2.f32 %v624_v52 }
 0x219   : > { %v2189_v18 = vpop.eup %2188  ;;  %2208 = vpow2.f32 %v626_v55  ;;  %v604_v20 = vmul.f32 %v588_v56, %v2813_v26  ;;  %v587_v40 = vmul.f32 6.0, %v2187_v57 }
 0x21a   : > { %v2191_v59 = vpop.eup %2190  ;;  %v2865_v62 = vsel %vm644_vm0, %v2189_v18, 0.0 }
 0x21b   : > { %v2193_v63 = vpop.eup %2192  ;;  %v630_v16 = vmul.f32 1.442695, %v604_v20  ;;  %v603_v44 = vmul.f32 %v587_v40, %v2815_v28  ;;  %v589_v17 = vmul.f32 6.0, %v2191_v59  ;;  %665 = vadd.xlane.f32.xlu0 %v2861_v61  ;;  %663 = vadd.xlane.f32.xlu1 %v2865_v62  ;;  %v2878_v28 = vsel %vm644_vm0, %v2185_v36, 0.0 }
 0x21c   : > { %v590_v26 = vmul.f32 6.0, %v2193_v63 }
 0x21d   : > { %v2195_v19 = vpop.eup %2194  ;;  %2210 = vpow2.f32 %v630_v16  ;;  %v628_v21 = vmul.f32 1.442695, %v603_v44  ;;  %v605_v22 = vmul.f32 %v589_v17, %v2821_v34 }
 0x21e   : > { %v2197_v23 = vpop.eup %2196  ;;  %v606_v47 = vmul.f32 %v590_v26, %v2823_v37  ;;  %v2874_v24 = vsel %vm644_vm0, %v2195_v19, 0.0 }
 0x21f   : > { %v2199_v25 = vpop.eup %2198  ;;  %2212 = vpow2.f32 %v628_v21  ;;  %v632_v27 = vmul.f32 1.442695, %v605_v22  ;;  %v592_v29 = vmul.f32 6.0, %v2197_v23  ;;  %669 = vadd.xlane.f32.xlu0 %v2874_v24  ;;  %667 = vadd.xlane.f32.xlu1 %v2878_v28 }
 0x220   : > { %v634_v34 = vmul.f32 1.442695, %v606_v47  ;;  %v591_v30 = vmul.f32 6.0, %v2199_v25 }
 0x221   : > { %v2201_v31 = vpop.eup %2200  ;;  %2214 = vpow2.f32 %v632_v27  ;;  %v608_v37 = vmul.f32 %v592_v29, %v2829_v45 }
 0x222   : > { %v2203_v32 = vpop.eup %2202  ;;  %2216 = vpow2.f32 %v634_v34  ;;  %v607_v53 = vmul.f32 %v591_v30, %v2831_v46  ;;  %v2886_v35 = vsel %vm644_vm0, %v2201_v31, 0.0 }
 0x223   : > { %v2205_v38 = vpop.eup %2204  ;;  %v638_v39 = vmul.f32 1.442695, %v608_v37  ;;  %673 = vadd.xlane.f32.xlu0 %v2886_v35  ;;  %v2891_v41 = vsel %vm644_vm0, %v2203_v32, 0.0 }
 0x224   : > { %v636_v42 = vmul.f32 1.442695, %v607_v53  ;;  %v593_v43 = vmul.f32 6.0, %v2205_v38  ;;  %671 = vadd.xlane.f32.xlu1 %v2891_v41 }
 0x225   : > { %v2207_v45 = vpop.eup %2206  ;;  %2218 = vpow2.f32 %v638_v39 }
 0x226   : > { %v2209_v48 = vpop.eup %2208  ;;  %2220 = vpow2.f32 %v636_v42  ;;  %v609_v46 = vmul.f32 %v593_v43, %v2837_v50  ;;  %v2897_v49 = vsel %vm644_vm0, %v2207_v45, 0.0 }
 0x227   : > { %v2901_v51 = vsel %vm644_vm0, %v2209_v48, 0.0 }
 0x228   : > { %v640_v58 = vmul.f32 1.442695, %v609_v46  ;;  %677 = vadd.xlane.f32.xlu0 %v2901_v51  ;;  %675 = vadd.xlane.f32.xlu1 %v2897_v49 }
 0x22a   : > { %v2211_v60 = vpop.eup %2210  ;;  %2222 = vpow2.f32 %v640_v58 }
 0x22b   : > { %v2907_v52 = vsel %vm644_vm0, %v2211_v60, 0.0 }
 0x22c   : > { %v2213_v50 = vpop.eup %2212  ;;  %681 = vadd.xlane.f32.xlu0 %v2907_v52 }
 0x22d   : > { %v2912_v36 = vsel %vm644_vm0, %v2213_v50, 0.0 }
 0x22e   : > { %v2215_v55 = vpop.eup %2214  ;;  %679 = vadd.xlane.f32.xlu1 %v2912_v36 }
 0x22f   : > { %v2217_v56 = vpop.eup %2216  ;;  %v2917_v57 = vsel %vm644_vm0, %v2215_v55, 0.0 }
 0x230   : > { %v2921_v18 = vsel %vm644_vm0, %v2217_v56, 0.0 }
 0x231   : > { %685 = vadd.xlane.f32.xlu0 %v2921_v18 }
 0x232   : > { %v2219_v20 = vpop.eup %2218  ;;  %683 = vadd.xlane.f32.xlu1 %v2917_v57 }
 0x233   : > { %v2221_v40 = vpop.eup %2220  ;;  %v2927_v59 = vsel %vm644_vm0, %v2219_v20, 0.0 }
 0x234   : > { %v2931_v63 = vsel %vm644_vm0, %v2221_v40, 0.0 }
 0x235   : > { %689 = vadd.xlane.f32.xlu0 %v2927_v59 }
 0x236   : > { %687 = vadd.xlane.f32.xlu1 %v2931_v63 }
 0x237   : > { %v2223_v16 = vpop.eup %2222 }
 0x238   : > { %v2937_v44 = vsel %vm644_vm0, %v2223_v16, 0.0 }
 0x23a   : > { %691 = vadd.xlane.f32.xlu1 %v2937_v44 }
 0x2a0   : > { %v662_v17 = vpop.xlane.xlu0 %661 }
 0x2a1   : > { %2224 = vrcp.f32 %v662_v17 }
 0x2a4   : > { %v666_v26 = vpop.xlane.xlu0 %665  ;;  %v664_v19 = vpop.xlane.xlu1 %663 }
 0x2a5   : > { %2226 = vrcp.f32 %v664_v19 }
 0x2a6   : > { %2228 = vrcp.f32 %v666_v26 }
 0x2a8   : > { %v670_v21 = vpop.xlane.xlu0 %669  ;;  %v668_v22 = vpop.xlane.xlu1 %667 }
 0x2a9   : > { %2230 = vrcp.f32 %v668_v22 }
 0x2aa   : > { %2232 = vrcp.f32 %v670_v21 }
 0x2ac   : > { %v674_v23 = vpop.xlane.xlu0 %673 }
 0x2ad   : > { %v672_v47 = vpop.xlane.xlu1 %671 }
 0x2ae   : > { %2234 = vrcp.f32 %v672_v47  ;;  %v2225_v25 = vpop.eup %2224 }
 0x2af   : > { %2236 = vrcp.f32 %v674_v23  ;;  %v709_v34 = vmul.f32 %v2225_v25, %v2855_v54 }
 0x2b1   : > { %v678_v33 = vpop.xlane.xlu0 %677  ;;  %v676_v27 = vpop.xlane.xlu1 %675 }
 0x2b2   : > { %v2227_v29 = vpop.eup %2226  ;;  %2238 = vrcp.f32 %v676_v27 }
 0x2b3   : > { %v710_v30 = vmul.f32 %v2227_v29, %v2865_v62  ;;  %v2229_v31 = vpop.eup %2228  ;;  %2240 = vrcp.f32 %v678_v33 }
 0x2b4   : > { %v711_v39 = vmul.f32 %v2229_v31, %v2861_v61 }
 0x2b5   : > { %v682_v37 = vpop.xlane.xlu0 %681  ;;  %v725_v32 = vpack.c.bf16 %v710_v30, %v709_v34 }
 0x2b6   : > { %v2231_v53 = vpop.eup %2230 }
 0x2b7   : > { %v680_v38 = vpop.xlane.xlu1 %679  ;;  %2065 = vmatprep.mubr.bf16.mxu1 %v725_v32  ;;  %v712_v42 = vmul.f32 %v2231_v53, %v2878_v28  ;;  %v2233_v43 = vpop.eup %2232 }
 0x2b8   : > { %2242 = vrcp.f32 %v680_v38  ;;  %v713_v62 = vmul.f32 %v2233_v43, %v2874_v24 }
 0x2b9   : > { %2244 = vrcp.f32 %v682_v37  ;;  %v726_v48 = vpack.c.bf16 %v712_v42, %v711_v39 }
 0x2ba   : > { %v686_v45 = vpop.xlane.xlu0 %685 }
 0x2bb   : > { %v2235_v46 = vpop.eup %2234  ;;  %v684_v54 = vpop.xlane.xlu1 %683  ;;  %2066 = vmatmul.mubr.bf16.vlgmr.msra.gmra.mxu1 %v726_v48 }
 0x2bc   : > { %2246 = vrcp.f32 %v684_v54  ;;  %v714_v58 = vmul.f32 %v2235_v46, %v2891_v41  ;;  %v2237_v60 = vpop.eup %2236 }
 0x2bd   : > { %2248 = vrcp.f32 %v686_v45  ;;  %v715_v28 = vmul.f32 %v2237_v60, %v2886_v35 }
 0x2be   : > { %v727_v50 = vpack.c.bf16 %v714_v58, %v713_v62  ;;  %v690_v55 = vpop.xlane.xlu0 %689 }
 0x2bf   : > { %v688_v56 = vpop.xlane.xlu1 %687  ;;  %v2239_v61 = vpop.eup %2238 }
 0x2c0   : > { %2250 = vrcp.f32 %v688_v56  ;;  %2069 = vmatprep.mubr.bf16.mxu1 %v727_v50  ;;  %v716_v20 = vmul.f32 %v2239_v61, %v2897_v49  ;;  %v2241_v40 = vpop.eup %2240 }
 0x2c1   : > { %2252 = vrcp.f32 %v690_v55  ;;  %v717_v41 = vmul.f32 %v2241_v40, %v2901_v51 }
 0x2c2   : > { %v728_v17 = vpack.c.bf16 %v716_v20, %v715_v28 }
 0x2c3   : > { %v692_v16 = vpop.xlane.xlu1 %691 }
 0x2c4   : > { %2254 = vrcp.f32 %v692_v16  ;;  %2070 = vmatmul.mubr.bf16.gmra.mxu1 %v728_v17 }
 0x2c5   : > { %v2243_v24 = vpop.eup %2242 }
 0x2c6   : > { %v718_v26 = vmul.f32 %v2243_v24, %v2912_v36  ;;  %v2245_v19 = vpop.eup %2244 }
 0x2c7   : > { %v719_v23 = vmul.f32 %v2245_v19, %v2907_v52 }
 0x2c8   : > { %v729_v21 = vpack.c.bf16 %v718_v26, %v717_v41 }
 0x2c9   : > { %v2247_v22 = vpop.eup %2246 }
 0x2ca   : > { %2073 = vmatprep.mubr.bf16.mxu1 %v729_v21  ;;  %v720_v35 = vmul.f32 %v2247_v22, %v2917_v57  ;;  %v2249_v49 = vpop.eup %2248 }
 0x2cb   : > { %v721_v33 = vmul.f32 %v2249_v49, %v2921_v18 }
 0x2cc   : > { %v730_v47 = vpack.c.bf16 %v720_v35, %v719_v23 }
 0x2cd   : > { %v2251_v25 = vpop.eup %2250 }
 0x2ce   : > { %2074 = vmatmul.mubr.bf16.gmra.mxu1 %v730_v47  ;;  %v722_v51 = vmul.f32 %v2251_v25, %v2931_v63  ;;  %v2253_v36 = vpop.eup %2252 }
 0x2cf   : > { %v723_v52 = vmul.f32 %v2253_v36, %v2927_v59 }
 0x2d0   : > { %v731_v27 = vpack.c.bf16 %v722_v51, %v721_v33 }
 0x2d1   : > { %v2255_v29 = vpop.eup %2254 }
 0x2d2   : > { %2077 = vmatprep.mubr.bf16.mxu1 %v731_v27  ;;  %v724_v57 = vmul.f32 %v2255_v29, %v2937_v44 }
 0x2d4   : > { %v732_v34 = vpack.c.bf16 %v724_v57, %v723_v52 }
 0x2d6   : > { %2078 = vmatmul.mubr.bf16.gmra.mxu1 %v732_v34 }
 0x37b   : > { %v2067_v30 = vpop.f32.mrf.mxu1 }
 0x37c   : > { %832 = vst [vmem:[%s2758_s18 + $0x10] sm:$0xff] %v2067_v30 }
 0x37d   : > { %v767_v18 = vpop.f32.mrf.mxu1 }
 0x37e   : > { %830 = vst [vmem:[%s2758_s18] sm:$0xff] %v767_v18 }
 0x37f   : > { %v2068_v63 = vpop.f32.mrf.mxu1 }
 0x380   : > { %833 = vst [vmem:[%s2758_s18 + $0x18] sm:$0xff] %v2068_v63 }
 0x381   : > { %v770_v31 = vpop.f32.mrf.mxu1 }
 0x382   : > { %831 = vst [vmem:[%s2758_s18 + $0x8] sm:$0xff] %v770_v31 }
 0x384   : > { %v2071_v37 = vpop.f32.mrf.mxu1 }
 0x385   : > { %836 = vst [vmem:[%s2758_s18 + $0x30] sm:$0xff] %v2071_v37 }
 0x386   : > { %v783_v59 = vpop.f32.mrf.mxu1 }
 0x387   : > { %834 = vst [vmem:[%s2758_s18 + $0x20] sm:$0xff] %v783_v59 }
 0x388   : > { %v2072_v44 = vpop.f32.mrf.mxu1 }
 0x389   : > { %837 = vst [vmem:[%s2758_s18 + $0x38] sm:$0xff] %v2072_v44 }
 0x38a   : > { %v786_v32 = vpop.f32.mrf.mxu1 }
 0x38b   : > { %835 = vst [vmem:[%s2758_s18 + $0x28] sm:$0xff] %v786_v32 }
 0x38e   : > { %v2075_v53 = vpop.f32.mrf.mxu1 }
 0x38f   : > { %840 = vst [vmem:[%s2758_s18 + $0x50] sm:$0xff] %v2075_v53 }
 0x390   : > { %v799_v38 = vpop.f32.mrf.mxu1 }
 0x391   : > { %838 = vst [vmem:[%s2758_s18 + $0x40] sm:$0xff] %v799_v38 }
 0x392   : > { %v2076_v39 = vpop.f32.mrf.mxu1 }
 0x393   : > { %841 = vst [vmem:[%s2758_s18 + $0x58] sm:$0xff] %v2076_v39 }
 0x394   : > { %v802_v42 = vpop.f32.mrf.mxu1 }
 0x395   : > { %839 = vst [vmem:[%s2758_s18 + $0x48] sm:$0xff] %v802_v42 }
 0x396   : > { %v2079_v43 = vpop.f32.mrf.mxu1 }
 0x397   : > { %844 = vst [vmem:[%s2758_s18 + $0x70] sm:$0xff] %v2079_v43 }
 0x398   : > { %v815_v45 = vpop.f32.mrf.mxu1 }
 0x399   : > { %842 = vst [vmem:[%s2758_s18 + $0x60] sm:$0xff] %v815_v45 }
 0x39a   : > { %v2080_v48 = vpop.f32.mrf.mxu1 }
 0x39b   : > { %845 = vst [vmem:[%s2758_s18 + $0x78] sm:$0xff] %v2080_v48 }
 0x39c   : > { %v818_v46 = vpop.f32.mrf.mxu1 }
 0x39d   : > { %843 = vst [vmem:[%s2758_s18 + $0x68] sm:$0xff] %v818_v46 }
 0x39e PF: > { %p1857_p2 = scmp.lt.s32.totalorder %s2599_s16, 2 }
 0x3a0   : > { %849 = sbr.rel (%p1857_p2) target bundleno = 1800 (0x708), region = 52 }
 0x3a5   : > { %v2256_v54 = vld [vmem:[#allocation7 + $0x78] sm:$0xff]   ;;  %v1858_v62 = vcombine.low %v2726_v0, %v2728_v1  ;;  %v2258_v60 = vld [vmem:[#allocation7 + $0x70] sm:$0xff]   ;;  %v2260_v55 = vld [vmem:[#allocation7 + $0x68] sm:$0xff]   ;;  %v1859_v26 = vcombine.low %v2730_v2, %v2732_v3  ;;  %v1860_v19 = vcombine.low %v2734_v4, %v2736_v5  ;;  %v1861_v21 = vcombine.low %v2738_v6, %v2740_v7 }
 0x3a6   : > { %v2257_v58 = vld [vmem:[#allocation7 + $0x38] sm:$0xff]   ;;  %1921 = vmatprep.subr.bf16.mxu0 %v2256_v54  ;;  %1953 = vmatprep.subr.bf16.mxu1 %v2256_v54  ;;  %v2259_v50 = vld [vmem:[#allocation7 + $0x30] sm:$0xff]   ;;  %v2261_v56 = vld [vmem:[#allocation7 + $0x28] sm:$0xff]   ;;  %v1862_v22 = vcombine.low %v2742_v8, %v2744_v9  ;;  %v1863_v2 = vcombine.low %v2746_v10, %v2748_v11  ;;  %v1864_v3 = vcombine.low %v2750_v12, %v2752_v13 }
 0x3a7   : > { %1937 = vmatprep.mubr.bf16.mxu0 %v1858_v62  ;;  %1922 = vmatpush3.bf16.xpose.msra.mxu0 %v2257_v58  ;;  %v2262_v61 = vld [vmem:[#allocation7 + $0x60] sm:$0xff]   ;;  %v2264_v1 = vld [vmem:[#allocation7 + $0x58] sm:$0xff]   ;;  %v2266_v20 = vld [vmem:[#allocation7 + $0x50] sm:$0xff]   ;;  %v1865_v4 = vcombine.low %v2754_v14, %v2756_v15 }
 0x3a8   : > { %1923 = vmatprep.subr.bf16.mxu0 %v2258_v60  ;;  %1954 = vmatpush3.bf16.msra.mxu1 %v2257_v58  ;;  %v2263_v0 = vld [vmem:[#allocation7 + $0x20] sm:$0xff]   ;;  %v2265_v28 = vld [vmem:[#allocation7 + $0x18] sm:$0xff]   ;;  %v2267_v40 = vld [vmem:[#allocation7 + $0x10] sm:$0xff]  }
 0x3a9   : > { %1955 = vmatprep.subr.bf16.mxu1 %v2258_v60  ;;  %v2268_v16 = vld [vmem:[#allocation7 + $0x48] sm:$0xff]   ;;  %v2270_v24 = vld [vmem:[#allocation7 + $0x40] sm:$0xff]  }
 0x3aa   : > { %v2269_v17 = vld [vmem:[#allocation7 + $0x8] sm:$0xff]   ;;  %v2271_v41 = vld [vmem:[#allocation7] sm:$0xff]  }
 0x3ac   : > { %1956 = vmatpush3.bf16.msra.mxu1 %v2259_v50 }
 0x3ad   : > { %1957 = vmatprep.subr.bf16.mxu1 %v2260_v55 }
 0x3af   : > { %1924 = vmatpush3.bf16.xpose.msra.mxu0 %v2259_v50 }
 0x3b0   : > { %1925 = vmatprep.subr.bf16.mxu0 %v2260_v55  ;;  %1958 = vmatpush3.bf16.msra.mxu1 %v2261_v56 }
 0x3b1   : > { %1959 = vmatprep.subr.bf16.mxu1 %v2262_v61 }
 0x3b4   : > { %1960 = vmatpush3.bf16.msra.mxu1 %v2263_v0 }
 0x3b5   : > { %1961 = vmatprep.subr.bf16.mxu1 %v2264_v1 }
 0x3b7   : > { %1926 = vmatpush3.bf16.xpose.msra.mxu0 %v2261_v56 }
 0x3b8   : > { %1927 = vmatprep.subr.bf16.mxu0 %v2262_v61  ;;  %1962 = vmatpush3.bf16.msra.mxu1 %v2265_v28 }
 0x3b9   : > { %1963 = vmatprep.subr.bf16.mxu1 %v2266_v20 }
 0x3bc   : > { %1964 = vmatpush3.bf16.msra.mxu1 %v2267_v40 }
 0x3bd   : > { %1965 = vmatprep.subr.bf16.mxu1 %v2268_v16 }
 0x3bf   : > { %1928 = vmatpush3.bf16.xpose.msra.mxu0 %v2263_v0 }
 0x3c0   : > { %1929 = vmatprep.subr.bf16.mxu0 %v2264_v1  ;;  %1966 = vmatpush3.bf16.msra.mxu1 %v2269_v17 }
 0x3c1   : > { %1967 = vmatprep.subr.bf16.mxu1 %v2270_v24 }
 0x3c4   : > { %1968 = vmatpush3.bf16.msra.mxu1 %v2271_v41 }
 0x3c7   : > { %1930 = vmatpush3.bf16.xpose.msra.mxu0 %v2265_v28 }
 0x3c8   : > { %1931 = vmatprep.subr.bf16.mxu0 %v2266_v20 }
 0x3cf   : > { %1932 = vmatpush3.bf16.xpose.msra.mxu0 %v2267_v40 }
 0x3d0   : > { %1933 = vmatprep.subr.bf16.mxu0 %v2268_v16 }
 0x3d7   : > { %1934 = vmatpush3.bf16.xpose.msra.mxu0 %v2269_v17 }
 0x3d8   : > { %1935 = vmatprep.subr.bf16.mxu0 %v2270_v24 }
 0x3df   : > { %1936 = vmatpush3.bf16.xpose.msra.mxu0 %v2271_v41 }
 0x3e6   : > { %1938 = vmatmul.mubr.bf16.vlgmr.msra.gmra.mxu0 %v1858_v62 }
 0x3e7   : > { %1939 = vmatprep.mubr.bf16.mxu0 %v1859_v26 }
 0x3ee   : > { %1940 = vmatmul.mubr.bf16.gmra.mxu0 %v1859_v26 }
 0x3ef   : > { %1941 = vmatprep.mubr.bf16.mxu0 %v1860_v19 }
 0x3f6   : > { %1942 = vmatmul.mubr.bf16.gmra.mxu0 %v1860_v19 }
 0x3f7   : > { %1943 = vmatprep.mubr.bf16.mxu0 %v1861_v21 }
 0x3fe   : > { %1944 = vmatmul.mubr.bf16.gmra.mxu0 %v1861_v21 }
 0x3ff   : > { %1945 = vmatprep.mubr.bf16.mxu0 %v1862_v22 }
 0x406   : > { %1946 = vmatmul.mubr.bf16.gmra.mxu0 %v1862_v22 }
 0x407   : > { %1947 = vmatprep.mubr.bf16.mxu0 %v1863_v2 }
 0x40e   : > { %1948 = vmatmul.mubr.bf16.gmra.mxu0 %v1863_v2 }
 0x40f   : > { %1949 = vmatprep.mubr.bf16.mxu0 %v1864_v3 }
 0x416   : > { %1950 = vmatmul.mubr.bf16.gmra.mxu0 %v1864_v3 }
 0x417   : > { %1951 = vmatprep.mubr.bf16.mxu0 %v1865_v4 }
 0x41e   : > { %1952 = vmatmul.mubr.bf16.gmra.mxu0 %v1865_v4 }
 0x4a6   : > { %v1060_v5 = vpop.f32.mrf.mxu0 }
 0x4a7   : > { %vm1139_vm1 = vcmp.ge.f32.partialorder %v1060_v5, 0.0  ;;  %v1171_v6 = vmul.f32 0.1, %v1060_v5 }
 0x4a8   : > { %v1062_v7 = vpop.f32.mrf.mxu0 }
 0x4a9   : > { %vm1140_vm2 = vcmp.ge.f32.partialorder %v1062_v7, 0.0  ;;  %v1172_v8 = vmul.f32 0.1, %v1062_v7  ;;  %v2989_v9 = vsel %vm1139_vm1, %v1060_v5, %v1171_v6 }
 0x4aa   : > { %v1064_v10 = vpop.f32.mrf.mxu0  ;;  %v1235_v14 = vmul.f32 %v2989_v9, %v2989_v9 }
 0x4ab   : > { %vm1141_vm3 = vcmp.ge.f32.partialorder %v1064_v10, 0.0  ;;  %v1173_v11 = vmul.f32 0.1, %v1064_v10  ;;  %v2991_v12 = vsel %vm1140_vm2, %v1062_v7, %v1172_v8 }
 0x4ac   : > { %v1066_v13 = vpop.f32.mrf.mxu0  ;;  %v1236_v15 = vmul.f32 %v2991_v12, %v2991_v12 }
 0x4ad   : > { %v2997_v23 = vsel %vm1141_vm3, %v1064_v10, %v1173_v11  ;;  %vm1142_vm4 = vcmp.ge.f32.partialorder %v1066_v13, 0.0  ;;  %v1174_v35 = vmul.f32 0.1, %v1066_v13 }
 0x4ae   : > { %v1070_v49 = vpop.f32.mrf.mxu0  ;;  %v1267_v47 = vadd.f32 %v1236_v15, %v1235_v14  ;;  %v1237_v36 = vmul.f32 %v2997_v23, %v2997_v23 }
 0x4af   : > { %v2999_v25 = vsel %vm1142_vm4, %v1066_v13, %v1174_v35  ;;  %vm1143_vm5 = vcmp.ge.f32.partialorder %v1070_v49, 0.0  ;;  %v1175_v33 = vmul.f32 0.1, %v1070_v49 }
 0x4b0   : > { %1268 = vadd.xlane.f32.xlu0 %v1267_v47  ;;  %v1072_v51 = vpop.f32.mrf.mxu0  ;;  %v1238_v27 = vmul.f32 %v2999_v25, %v2999_v25 }
 0x4b1   : > { %vm1144_vm6 = vcmp.ge.f32.partialorder %v1072_v51, 0.0  ;;  %v1176_v29 = vmul.f32 0.1, %v1072_v51  ;;  %v3005_v52 = vsel %vm1143_vm5, %v1070_v49, %v1175_v33 }
 0x4b2   : > { %v1074_v57 = vpop.f32.mrf.mxu0  ;;  %v1270_v34 = vadd.f32 %v1238_v27, %v1237_v36  ;;  %v1239_v31 = vmul.f32 %v3005_v52, %v3005_v52 }
 0x4b3   : > { %vm1145_vm7 = vcmp.ge.f32.partialorder %v1074_v57, 0.0  ;;  %v1177_v30 = vmul.f32 0.1, %v1074_v57  ;;  %v3007_v18 = vsel %vm1144_vm6, %v1072_v51, %v1176_v29 }
 0x4b4   : > { %1271 = vadd.xlane.f32.xlu0 %v1270_v34  ;;  %v1076_v63 = vpop.f32.mrf.mxu0  ;;  %v1240_v37 = vmul.f32 %v3007_v18, %v3007_v18 }
 0x4b5   : > { %v3013_v59 = vsel %vm1145_vm7, %v1074_v57, %v1177_v30  ;;  %vm1146_vm8 = vcmp.ge.f32.partialorder %v1076_v63, 0.0  ;;  %v1178_v44 = vmul.f32 0.1, %v1076_v63 }
 0x4b6   : > { %v1080_v32 = vpop.f32.mrf.mxu0  ;;  %v1273_v53 = vadd.f32 %v1240_v37, %v1239_v31  ;;  %v1241_v43 = vmul.f32 %v3013_v59, %v3013_v59 }
 0x4b7   : > { %v3015_v38 = vsel %vm1146_vm8, %v1076_v63, %v1178_v44  ;;  %vm1147_vm9 = vcmp.ge.f32.partialorder %v1080_v32, 0.0  ;;  %v1179_v39 = vmul.f32 0.1, %v1080_v32 }
 0x4b8   : > { %1274 = vadd.xlane.f32.xlu1 %v1273_v53  ;;  %v1082_v42 = vpop.f32.mrf.mxu0  ;;  %v1242_v45 = vmul.f32 %v3015_v38, %v3015_v38 }
 0x4b9   : > { %v3021_v48 = vsel %vm1147_vm9, %v1080_v32, %v1179_v39  ;;  %vm1148_vm10 = vcmp.ge.f32.partialorder %v1082_v42, 0.0  ;;  %v1180_v46 = vmul.f32 0.1, %v1082_v42 }
 0x4ba   : > { %v1084_v54 = vpop.f32.mrf.mxu0  ;;  %v1276_v62 = vadd.f32 %v1242_v45, %v1241_v43  ;;  %v1243_v55 = vmul.f32 %v3021_v48, %v3021_v48 }
 0x4bb   : > { %v3023_v58 = vsel %vm1148_vm10, %v1082_v42, %v1180_v46  ;;  %vm1149_vm11 = vcmp.ge.f32.partialorder %v1084_v54, 0.0  ;;  %v1181_v60 = vmul.f32 0.1, %v1084_v54 }
 0x4bc   : > { %1277 = vadd.xlane.f32.xlu1 %v1276_v62  ;;  %v1086_v50 = vpop.f32.mrf.mxu0  ;;  %v1244_v56 = vmul.f32 %v3023_v58, %v3023_v58 }
 0x4bd   : > { %v3029_v61 = vsel %vm1149_vm11, %v1084_v54, %v1181_v60  ;;  %vm1150_vm12 = vcmp.ge.f32.partialorder %v1086_v50, 0.0  ;;  %v1182_v0 = vmul.f32 0.1, %v1086_v50 }
 0x4be   : > { %v1090_v1 = vpop.f32.mrf.mxu0  ;;  %v1279_v28 = vadd.f32 %v1244_v56, %v1243_v55  ;;  %v1245_v17 = vmul.f32 %v3029_v61, %v3029_v61 }
 0x4bf   : > { %v3031_v20 = vsel %vm1150_vm12, %v1086_v50, %v1182_v0  ;;  %vm1151_vm13 = vcmp.ge.f32.partialorder %v1090_v1, 0.0  ;;  %v1183_v40 = vmul.f32 0.1, %v1090_v1 }
 0x4c0   : > { %1280 = vadd.xlane.f32.xlu0 %v1279_v28  ;;  %v1092_v16 = vpop.f32.mrf.mxu0  ;;  %v1246_v24 = vmul.f32 %v3031_v20, %v3031_v20 }
 0x4c1   : > { %v3037_v41 = vsel %vm1151_vm13, %v1090_v1, %v1183_v40  ;;  %vm1152_vm14 = vcmp.ge.f32.partialorder %v1092_v16, 0.0  ;;  %v1184_v26 = vmul.f32 0.1, %v1092_v16 }
 0x4c2   : > { %v1094_v19 = vpop.f32.mrf.mxu0  ;;  %v1282_v21 = vadd.f32 %v1246_v24, %v1245_v17  ;;  %v1247_v4 = vmul.f32 %v3037_v41, %v3037_v41 }
 0x4c3   : > { %v3039_v22 = vsel %vm1152_vm14, %v1092_v16, %v1184_v26  ;;  %vm1153_vm15 = vcmp.ge.f32.partialorder %v1094_v19, 0.0  ;;  %v1185_v2 = vmul.f32 0.1, %v1094_v19 }
 0x4c4   : > { %1283 = vadd.xlane.f32.xlu1 %v1282_v21  ;;  %v1096_v3 = vpop.f32.mrf.mxu0  ;;  %v1248_v5 = vmul.f32 %v3039_v22, %v3039_v22 }
 0x4c5   : > { %v3045_v6 = vsel %vm1153_vm15, %v1094_v19, %v1185_v2  ;;  %vm1154_vm0 = vcmp.ge.f32.partialorder %v1096_v3, 0.0  ;;  %v1186_v7 = vmul.f32 0.1, %v1096_v3 }
 0x4c6   : > { %v1100_v8 = vpop.f32.mrf.mxu0  ;;  %v1285_v10 = vadd.f32 %v1248_v5, %v1247_v4  ;;  %v1249_v15 = vmul.f32 %v3045_v6, %v3045_v6 }
 0x4c7   : > { %v3047_v11 = vsel %vm1154_vm0, %v1096_v3, %v1186_v7  ;;  %vm1155_vm1 = vcmp.ge.f32.partialorder %v1100_v8, 0.0  ;;  %v1187_v13 = vmul.f32 0.1, %v1100_v8 }
 0x4c8   : > { %1286 = vadd.xlane.f32.xlu0 %v1285_v10  ;;  %v1102_v14 = vpop.f32.mrf.mxu0  ;;  %v1250_v35 = vmul.f32 %v3047_v11, %v3047_v11 }
 0x4c9   : > { %v3053_v49 = vsel %vm1155_vm1, %v1100_v8, %v1187_v13  ;;  %vm1156_vm2 = vcmp.ge.f32.partialorder %v1102_v14, 0.0  ;;  %v1188_v47 = vmul.f32 0.1, %v1102_v14 }
 0x4ca   : > { %v1104_v33 = vpop.f32.mrf.mxu0  ;;  %v1288_v51 = vadd.f32 %v1250_v35, %v1249_v15  ;;  %v1251_v57 = vmul.f32 %v3053_v49, %v3053_v49 }
 0x4cb   : > { %v3055_v36 = vsel %vm1156_vm2, %v1102_v14, %v1188_v47  ;;  %vm1157_vm3 = vcmp.ge.f32.partialorder %v1104_v33, 0.0  ;;  %v1189_v27 = vmul.f32 0.1, %v1104_v33 }
 0x4cc   : > { %1289 = vadd.xlane.f32.xlu1 %v1288_v51  ;;  %v1106_v29 = vpop.f32.mrf.mxu0  ;;  %v1252_v34 = vmul.f32 %v3055_v36, %v3055_v36 }
 0x4cd   : > { %v3061_v30 = vsel %vm1157_vm3, %v1104_v33, %v1189_v27  ;;  %vm1158_vm4 = vcmp.ge.f32.partialorder %v1106_v29, 0.0  ;;  %v1190_v63 = vmul.f32 0.1, %v1106_v29 }
 0x4ce   : > { %v1110_v31 = vpop.f32.mrf.mxu0  ;;  %v1291_v37 = vadd.f32 %v1252_v34, %v1251_v57  ;;  %v1253_v39 = vmul.f32 %v3061_v30, %v3061_v30 }
 0x4cf   : > { %v3063_v44 = vsel %vm1158_vm4, %v1106_v29, %v1190_v63  ;;  %vm1159_vm5 = vcmp.ge.f32.partialorder %v1110_v31, 0.0  ;;  %v1191_v32 = vmul.f32 0.1, %v1110_v31 }
 0x4d0   : > { %1292 = vadd.xlane.f32.xlu0 %v1291_v37  ;;  %v1112_v53 = vpop.f32.mrf.mxu0  ;;  %v1254_v42 = vmul.f32 %v3063_v44, %v3063_v44 }
 0x4d1   : > { %v3069_v43 = vsel %vm1159_vm5, %v1110_v31, %v1191_v32  ;;  %vm1160_vm6 = vcmp.ge.f32.partialorder %v1112_v53, 0.0  ;;  %v1192_v45 = vmul.f32 0.1, %v1112_v53 }
 0x4d2   : > { %v1114_v46 = vpop.f32.mrf.mxu0  ;;  %v1294_v54 = vadd.f32 %v1254_v42, %v1253_v39  ;;  %v1255_v55 = vmul.f32 %v3069_v43, %v3069_v43 }
 0x4d3   : > { %v3071_v62 = vsel %vm1160_vm6, %v1112_v53, %v1192_v45  ;;  %vm1161_vm7 = vcmp.ge.f32.partialorder %v1114_v46, 0.0  ;;  %v1193_v60 = vmul.f32 0.1, %v1114_v46 }
 0x4d4   : > { %1295 = vadd.xlane.f32.xlu1 %v1294_v54  ;;  %v1116_v50 = vpop.f32.mrf.mxu0  ;;  %v1256_v56 = vmul.f32 %v3071_v62, %v3071_v62 }
 0x4d5   : > { %v3077_v0 = vsel %vm1161_vm7, %v1114_v46, %v1193_v60  ;;  %vm1162_vm8 = vcmp.ge.f32.partialorder %v1116_v50, 0.0  ;;  %v1194_v1 = vmul.f32 0.1, %v1116_v50 }
 0x4d6   : > { %v1120_v28 = vpop.f32.mrf.mxu0  ;;  %v1297_v40 = vadd.f32 %v1256_v56, %v1255_v55  ;;  %v1257_v26 = vmul.f32 %v3077_v0, %v3077_v0 }
 0x4d7   : > { %v3079_v16 = vsel %vm1162_vm8, %v1116_v50, %v1194_v1  ;;  %vm1163_vm9 = vcmp.ge.f32.partialorder %v1120_v28, 0.0  ;;  %v1195_v17 = vmul.f32 0.1, %v1120_v28 }
 0x4d8   : > { %1298 = vadd.xlane.f32.xlu0 %v1297_v40  ;;  %v1122_v24 = vpop.f32.mrf.mxu0  ;;  %v1258_v19 = vmul.f32 %v3079_v16, %v3079_v16 }
 0x4d9   : > { %v3085_v21 = vsel %vm1163_vm9, %v1120_v28, %v1195_v17  ;;  %vm1164_vm10 = vcmp.ge.f32.partialorder %v1122_v24, 0.0  ;;  %v1196_v2 = vmul.f32 0.1, %v1122_v24 }
 0x4da   : > { %v1124_v3 = vpop.f32.mrf.mxu0  ;;  %v1300_v4 = vadd.f32 %v1258_v19, %v1257_v26  ;;  %v1259_v10 = vmul.f32 %v3085_v21, %v3085_v21 }
 0x4db   : > { %v3087_v5 = vsel %vm1164_vm10, %v1122_v24, %v1196_v2  ;;  %vm1165_vm11 = vcmp.ge.f32.partialorder %v1124_v3, 0.0  ;;  %v1197_v7 = vmul.f32 0.1, %v1124_v3 }
 0x4dc   : > { %1301 = vadd.xlane.f32.xlu1 %v1300_v4  ;;  %v1126_v8 = vpop.f32.mrf.mxu0  ;;  %v1260_v13 = vmul.f32 %v3087_v5, %v3087_v5 }
 0x4dd   : > { %v3093_v14 = vsel %vm1165_vm11, %v1124_v3, %v1197_v7  ;;  %vm1166_vm12 = vcmp.ge.f32.partialorder %v1126_v8, 0.0  ;;  %v1198_v15 = vmul.f32 0.1, %v1126_v8 }
 0x4de   : > { %v1130_v35 = vpop.f32.mrf.mxu0  ;;  %v1303_v47 = vadd.f32 %v1260_v13, %v1259_v10  ;;  %v1261_v29 = vmul.f32 %v3093_v14, %v3093_v14 }
 0x4df   : > { %v3095_v33 = vsel %vm1166_vm12, %v1126_v8, %v1198_v15  ;;  %vm1167_vm13 = vcmp.ge.f32.partialorder %v1130_v35, 0.0  ;;  %v1199_v51 = vmul.f32 0.1, %v1130_v35 }
 0x4e0   : > { %1304 = vadd.xlane.f32.xlu0 %v1303_v47  ;;  %v1132_v27 = vpop.f32.mrf.mxu0  ;;  %v1262_v57 = vmul.f32 %v3095_v33, %v3095_v33 }
 0x4e1   : > { %v3101_v34 = vsel %vm1167_vm13, %v1130_v35, %v1199_v51  ;;  %vm1168_vm14 = vcmp.ge.f32.partialorder %v1132_v27, 0.0  ;;  %v1200_v63 = vmul.f32 0.1, %v1132_v27 }
 0x4e2   : > { %v1134_v31 = vpop.f32.mrf.mxu0  ;;  %v1306_v37 = vadd.f32 %v1262_v57, %v1261_v29  ;;  %v1263_v42 = vmul.f32 %v3101_v34, %v3101_v34 }
 0x4e3   : > { %v3103_v32 = vsel %vm1168_vm14, %v1132_v27, %v1200_v63  ;;  %vm1169_vm15 = vcmp.ge.f32.partialorder %v1134_v31, 0.0  ;;  %v1201_v53 = vmul.f32 0.1, %v1134_v31 }
 0x4e4   : > { %1307 = vadd.xlane.f32.xlu1 %v1306_v37  ;;  %v1136_v39 = vpop.f32.mrf.mxu0  ;;  %v1264_v45 = vmul.f32 %v3103_v32, %v3103_v32  ;;  %v1459_v37 = vlaneseq }
 0x4e5   : > { %v3109_v46 = vsel %vm1169_vm15, %v1134_v31, %v1201_v53  ;;  %vm1170_vm0 = vcmp.ge.f32.partialorder %v1136_v39, 0.0  ;;  %v1202_v54 = vmul.f32 0.1, %v1136_v39 }
 0x4e6   : > { %v1309_v60 = vadd.f32 %v1264_v45, %v1263_v42  ;;  %v1265_v56 = vmul.f32 %v3109_v46, %v3109_v46 }
 0x4e7   : > { %v3111_v50 = vsel %vm1170_vm0, %v1136_v39, %v1202_v54 }
 0x4e8   : > { %v1266_v55 = vmul.f32 %v3111_v50, %v3111_v50  ;;  %1310 = vadd.xlane.f32.xlu0 %v1309_v60 }
 0x4ea   : > { %v1312_v1 = vadd.f32 %v1266_v55, %v1265_v56  ;;  %v1460_v55 = vand.u32 127, %v1459_v37 }
 0x4ec   : > { %1313 = vadd.xlane.f32.xlu1 %v1312_v1 }
 0x539   : > { %v1269_v28 = vpop.xlane.xlu0 %1268 }
 0x53a   : > { %v1315_v40 = vadd.f32 1e-08, %v1269_v28 }
 0x53c   : > { %2272 = vrsqrt.f32 %v1315_v40 }
 0x53d   : > { %v1272_v17 = vpop.xlane.xlu0 %1271 }
 0x53e   : > { %v1316_v24 = vadd.f32 1e-08, %v1272_v17 }
 0x540   : > { %2274 = vrsqrt.f32 %v1316_v24 }
 0x541   : > { %v1275_v26 = vpop.xlane.xlu1 %1274 }
 0x542   : > { %v1317_v19 = vadd.f32 1e-08, %v1275_v26  ;;  %v3125_v26 = vadd.s32 128, %v1460_v55 }
 0x544   : > { %2276 = vrsqrt.f32 %v1317_v19  ;;  %vm1463_vm1 = vcmp.lt.s32.totalorder %v3125_v26, 200 }
 0x545   : > { %v1278_v2 = vpop.xlane.xlu1 %1277 }
 0x546   : > { %v1318_v3 = vadd.f32 1e-08, %v1278_v2 }
 0x548   : > { %2278 = vrsqrt.f32 %v1318_v3 }
 0x549   : > { %v2273_v4 = vpop.eup %2272  ;;  %v1281_v7 = vpop.xlane.xlu0 %1280 }
 0x54a   : > { %v1347_v8 = vmul.f32 6.0, %v2273_v4  ;;  %v1319_v10 = vadd.f32 1e-08, %v1281_v7 }
 0x54c   : > { %v1363_v13 = vmul.f32 %v1347_v8, %v2989_v9  ;;  %v1364_v15 = vmul.f32 %v1347_v8, %v2991_v12  ;;  %2280 = vrsqrt.f32 %v1319_v10 }
 0x54d   : > { %v2275_v35 = vpop.eup %2274  ;;  %v1284_v47 = vpop.xlane.xlu1 %1283 }
 0x54e   : > { %v1395_v51 = vmul.f32 1.442695, %v1363_v13  ;;  %v1397_v27 = vmul.f32 1.442695, %v1364_v15  ;;  %v1348_v29 = vmul.f32 6.0, %v2275_v35 }
 0x54f   : > { %v1320_v57 = vadd.f32 1e-08, %v1284_v47 }
 0x550   : > { %2282 = vpow2.f32 %v1395_v51  ;;  %v1365_v63 = vmul.f32 %v1348_v29, %v2997_v23  ;;  %v1366_v31 = vmul.f32 %v1348_v29, %v2999_v25 }
 0x551   : > { %v2277_v53 = vpop.eup %2276  ;;  %2284 = vpow2.f32 %v1397_v27  ;;  %v1287_v39 = vpop.xlane.xlu0 %1286 }
 0x552   : > { %v1399_v42 = vmul.f32 1.442695, %v1365_v63  ;;  %v1401_v9 = vmul.f32 1.442695, %v1366_v31  ;;  %v1349_v45 = vmul.f32 6.0, %v2277_v53  ;;  %2286 = vrsqrt.f32 %v1320_v57 }
 0x553   : > { %v1321_v12 = vadd.f32 1e-08, %v1287_v39 }
 0x554   : > { %2288 = vpow2.f32 %v1399_v42  ;;  %v1367_v54 = vmul.f32 %v1349_v45, %v3005_v52  ;;  %v1368_v60 = vmul.f32 %v1349_v45, %v3007_v18 }
 0x555   : > { %v2279_v56 = vpop.eup %2278  ;;  %2290 = vpow2.f32 %v1401_v9  ;;  %v1290_v23 = vpop.xlane.xlu1 %1289 }
 0x556   : > { %v1403_v1 = vmul.f32 1.442695, %v1367_v54  ;;  %v1405_v25 = vmul.f32 1.442695, %v1368_v60  ;;  %v1350_v28 = vmul.f32 6.0, %v2279_v56  ;;  %2292 = vrsqrt.f32 %v1321_v12 }
 0x557   : > { %v1322_v40 = vadd.f32 1e-08, %v1290_v23 }
 0x558   : > { %2294 = vpow2.f32 %v1403_v1  ;;  %v1369_v17 = vmul.f32 %v1350_v28, %v3013_v59  ;;  %v1370_v24 = vmul.f32 %v1350_v28, %v3015_v38 }
 0x559   : > { %v2281_v19 = vpop.eup %2280  ;;  %2296 = vpow2.f32 %v1405_v25  ;;  %v1293_v52 = vpop.xlane.xlu0 %1292 }
 0x55a   : > { %v1407_v18 = vmul.f32 1.442695, %v1369_v17  ;;  %v1409_v2 = vmul.f32 1.442695, %v1370_v24  ;;  %v1351_v3 = vmul.f32 6.0, %v2281_v19  ;;  %2298 = vrsqrt.f32 %v1322_v40 }
 0x55b   : > { %v1323_v4 = vadd.f32 1e-08, %v1293_v52 }
 0x55c   : > { %2300 = vpow2.f32 %v1407_v18  ;;  %v1371_v7 = vmul.f32 %v1351_v3, %v3021_v48  ;;  %v1372_v8 = vmul.f32 %v1351_v3, %v3023_v58 }
 0x55d   : > { %v3130_v59 = vpop.eup %2282  ;;  %2302 = vpow2.f32 %v1409_v2  ;;  %v1296_v38 = vpop.xlane.xlu1 %1295 }
 0x55e   : > { %v2285_v10 = vpop.eup %2284  ;;  %v1411_v13 = vmul.f32 1.442695, %v1371_v7  ;;  %v1413_v15 = vmul.f32 1.442695, %v1372_v8  ;;  %2304 = vrsqrt.f32 %v1323_v4  ;;  %v1324_v35 = vadd.f32 1e-08, %v1296_v38 }
 0x55f   : > { %v2287_v47 = vpop.eup %2286  ;;  %v3134_v51 = vsel %vm1463_vm1, %v2285_v10, 0.0 }
 0x560   : > { %2306 = vpow2.f32 %v1411_v13  ;;  %v1352_v48 = vmul.f32 6.0, %v2287_v47  ;;  %v1496_v58 = vadd.f32 %v3130_v59, %v3134_v51 }
 0x561   : > { %v3138_v27 = vpop.eup %2288  ;;  %2308 = vpow2.f32 %v1413_v15  ;;  %v1299_v29 = vpop.xlane.xlu0 %1298 }
 0x562   : > { %v2291_v57 = vpop.eup %2290  ;;  %v1373_v63 = vmul.f32 %v1352_v48, %v3029_v61  ;;  %v1374_v31 = vmul.f32 %v1352_v48, %v3031_v20  ;;  %2310 = vrsqrt.f32 %v1324_v35  ;;  %v1325_v37 = vadd.f32 1e-08, %v1299_v29  ;;  %1497 = vadd.xlane.f32.xlu0 %v1496_v58 }
 0x563   : > { %v2293_v53 = vpop.eup %2292  ;;  %v3144_v39 = vsel %vm1463_vm1, %v2291_v57, 0.0 }
 0x564   : > { %v1415_v42 = vmul.f32 1.442695, %v1373_v63  ;;  %v1417_v9 = vmul.f32 1.442695, %v1374_v31  ;;  %v1353_v45 = vmul.f32 6.0, %v2293_v53  ;;  %2312 = vrsqrt.f32 %v1325_v37 }
 0x565   : > { %v3146_v12 = vpop.eup %2294  ;;  %v1302_v54 = vpop.xlane.xlu1 %1301  ;;  %v1499_v61 = vadd.f32 %v3138_v27, %v3144_v39 }
 0x566   : > { %v2297_v60 = vpop.eup %2296  ;;  %2314 = vpow2.f32 %v1415_v42  ;;  %v1375_v20 = vmul.f32 %v1353_v45, %v3037_v41  ;;  %v1376_v55 = vmul.f32 %v1353_v45, %v3039_v22  ;;  %v1326_v56 = vadd.f32 1e-08, %v1302_v54 }
 0x567   : > { %v2299_v23 = vpop.eup %2298  ;;  %2316 = vpow2.f32 %v1417_v9  ;;  %1500 = vadd.xlane.f32.xlu1 %v1499_v61  ;;  %v3154_v1 = vsel %vm1463_vm1, %v2297_v60, 0.0 }
 0x568   : > { %v1419_v25 = vmul.f32 1.442695, %v1375_v20  ;;  %v1421_v28 = vmul.f32 1.442695, %v1376_v55  ;;  %v1354_v40 = vmul.f32 6.0, %v2299_v23  ;;  %2318 = vrsqrt.f32 %v1326_v56 }
 0x569   : > { %v3156_v17 = vpop.eup %2300  ;;  %v1305_v24 = vpop.xlane.xlu0 %1304  ;;  %v1502_v41 = vadd.f32 %v3146_v12, %v3154_v1 }
 0x56a   : > { %v2303_v19 = vpop.eup %2302  ;;  %2320 = vpow2.f32 %v1419_v25  ;;  %v1377_v22 = vmul.f32 %v1354_v40, %v3045_v6  ;;  %v1378_v52 = vmul.f32 %v1354_v40, %v3047_v11  ;;  %v1327_v18 = vadd.f32 1e-08, %v1305_v24 }
 0x56b   : > { %v2305_v2 = vpop.eup %2304  ;;  %2322 = vpow2.f32 %v1421_v28  ;;  %1503 = vadd.xlane.f32.xlu0 %v1502_v41  ;;  %v3164_v3 = vsel %vm1463_vm1, %v2303_v19, 0.0 }
 0x56c   : > { %v1423_v4 = vmul.f32 1.442695, %v1377_v22  ;;  %v1425_v7 = vmul.f32 1.442695, %v1378_v52  ;;  %v1355_v8 = vmul.f32 6.0, %v2305_v2  ;;  %2324 = vrsqrt.f32 %v1327_v18 }
 0x56d   : > { %v3166_v38 = vpop.eup %2306  ;;  %v1308_v10 = vpop.xlane.xlu1 %1307  ;;  %v1505_v6 = vadd.f32 %v3156_v17, %v3164_v3 }
 0x56e   : > { %v2309_v13 = vpop.eup %2308  ;;  %2326 = vpow2.f32 %v1423_v4  ;;  %v1379_v11 = vmul.f32 %v1355_v8, %v3053_v49  ;;  %v1380_v15 = vmul.f32 %v1355_v8, %v3055_v36  ;;  %v1328_v35 = vadd.f32 1e-08, %v1308_v10 }
 0x56f   : > { %v2311_v47 = vpop.eup %2310  ;;  %2328 = vpow2.f32 %v1425_v7  ;;  %1506 = vadd.xlane.f32.xlu1 %v1505_v6  ;;  %v3174_v48 = vsel %vm1463_vm1, %v2309_v13, 0.0 }
 0x570   : > { %v1427_v58 = vmul.f32 1.442695, %v1379_v11  ;;  %v1429_v29 = vmul.f32 1.442695, %v1380_v15  ;;  %v1356_v57 = vmul.f32 6.0, %v2311_v47  ;;  %2330 = vrsqrt.f32 %v1328_v35 }
 0x571   : > { %v2313_v63 = vpop.eup %2312  ;;  %v1508_v31 = vadd.f32 %v3166_v38, %v3174_v48  ;;  %v1311_v37 = vpop.xlane.xlu0 %1310 }
 0x572   : > { %2332 = vpow2.f32 %v1427_v58  ;;  %v1381_v49 = vmul.f32 %v1356_v57, %v3061_v30  ;;  %v1382_v36 = vmul.f32 %v1356_v57, %v3063_v44  ;;  %v1357_v53 = vmul.f32 6.0, %v2313_v63 }
 0x573   : > { %v3180_v42 = vpop.eup %2314  ;;  %2334 = vpow2.f32 %v1429_v29  ;;  %1509 = vadd.xlane.f32.xlu0 %v1508_v31  ;;  %v1329_v9 = vadd.f32 1e-08, %v1311_v37 }
 0x574   : > { %v2317_v45 = vpop.eup %2316  ;;  %v1431_v54 = vmul.f32 1.442695, %v1381_v49  ;;  %v1433_v61 = vmul.f32 1.442695, %v1382_v36  ;;  %v1383_v60 = vmul.f32 %v1357_v53, %v3069_v43  ;;  %v1384_v20 = vmul.f32 %v1357_v53, %v3071_v62 }
 0x575   : > { %v2319_v55 = vpop.eup %2318  ;;  %2336 = vrsqrt.f32 %v1329_v9  ;;  %v3186_v30 = vsel %vm1463_vm1, %v2317_v45, 0.0  ;;  %v1314_v44 = vpop.xlane.xlu1 %1313 }
 0x576   : > { %2338 = vpow2.f32 %v1431_v54  ;;  %v1435_v56 = vmul.f32 1.442695, %v1383_v60  ;;  %v1437_v23 = vmul.f32 1.442695, %v1384_v20  ;;  %v1358_v25 = vmul.f32 6.0, %v2319_v55 }
 0x577   : > { %v3188_v28 = vpop.eup %2320  ;;  %2340 = vpow2.f32 %v1433_v61  ;;  %v1511_v40 = vadd.f32 %v3180_v42, %v3186_v30  ;;  %v1330_v43 = vadd.f32 1e-08, %v1314_v44 }
 0x578   : > { %v2323_v24 = vpop.eup %2322  ;;  %2342 = vpow2.f32 %v1435_v56  ;;  %v1385_v62 = vmul.f32 %v1358_v25, %v3077_v0  ;;  %v1386_v41 = vmul.f32 %v1358_v25, %v3079_v16 }
 0x579   : > { %v2325_v19 = vpop.eup %2324  ;;  %2344 = vpow2.f32 %v1437_v23  ;;  %1512 = vadd.xlane.f32.xlu1 %v1511_v40  ;;  %v3196_v22 = vsel %vm1463_vm1, %v2323_v24, 0.0 }
 0x57a   : > { %v1439_v52 = vmul.f32 1.442695, %v1385_v62  ;;  %v1441_v18 = vmul.f32 1.442695, %v1386_v41  ;;  %v1359_v2 = vmul.f32 6.0, %v2325_v19  ;;  %2346 = vrsqrt.f32 %v1330_v43 }
 0x57b   : > { %v3198_v4 = vpop.eup %2326  ;;  %v1514_v7 = vadd.f32 %v3188_v28, %v3196_v22 }
 0x57c   : > { %v2329_v8 = vpop.eup %2328  ;;  %2348 = vpow2.f32 %v1439_v52  ;;  %v1387_v0 = vmul.f32 %v1359_v2, %v3085_v21  ;;  %v1388_v16 = vmul.f32 %v1359_v2, %v3087_v5 }
 0x57d   : > { %v2331_v10 = vpop.eup %2330  ;;  %2350 = vpow2.f32 %v1441_v18  ;;  %1515 = vadd.xlane.f32.xlu0 %v1514_v7  ;;  %v3206_v6 = vsel %vm1463_vm1, %v2329_v8, 0.0 }
 0x57e   : > { %v1443_v13 = vmul.f32 1.442695, %v1387_v0  ;;  %v1445_v11 = vmul.f32 1.442695, %v1388_v16  ;;  %v1360_v15 = vmul.f32 6.0, %v2331_v10  ;;  %v1517_v35 = vadd.f32 %v3198_v4, %v3206_v6 }
 0x57f   : > { %v3210_v47 = vpop.eup %2332 }
 0x580   : > { %v2335_v58 = vpop.eup %2334  ;;  %2352 = vpow2.f32 %v1443_v13  ;;  %v1389_v21 = vmul.f32 %v1360_v15, %v3093_v14  ;;  %v1390_v5 = vmul.f32 %v1360_v15, %v3095_v33  ;;  %1518 = vadd.xlane.f32.xlu1 %v1517_v35 }
 0x581   : > { %2354 = vpow2.f32 %v1445_v11  ;;  %v3216_v29 = vsel %vm1463_vm1, %v2335_v58, 0.0 }
 0x582   : > { %v2337_v57 = vpop.eup %2336  ;;  %v1447_v63 = vmul.f32 1.442695, %v1389_v21  ;;  %v1449_v31 = vmul.f32 1.442695, %v1390_v5  ;;  %v1520_v37 = vadd.f32 %v3210_v47, %v3216_v29 }
 0x583   : > { %v3220_v49 = vpop.eup %2338  ;;  %v1361_v36 = vmul.f32 6.0, %v2337_v57 }
 0x584   : > { %v2341_v53 = vpop.eup %2340  ;;  %2356 = vpow2.f32 %v1447_v63  ;;  %1521 = vadd.xlane.f32.xlu0 %v1520_v37 }
 0x585   : > { %v3222_v14 = vpop.eup %2342  ;;  %2358 = vpow2.f32 %v1449_v31  ;;  %v1391_v33 = vmul.f32 %v1361_v36, %v3101_v34  ;;  %v1392_v9 = vmul.f32 %v1361_v36, %v3103_v32  ;;  %v3228_v45 = vsel %vm1463_vm1, %v2341_v53, 0.0 }
 0x586   : > { %v2345_v54 = vpop.eup %2344  ;;  %v1523_v61 = vadd.f32 %v3220_v49, %v3228_v45 }
 0x587   : > { %v2347_v60 = vpop.eup %2346  ;;  %v1451_v20 = vmul.f32 1.442695, %v1391_v33  ;;  %v1453_v55 = vmul.f32 1.442695, %v1392_v9  ;;  %v3234_v44 = vsel %vm1463_vm1, %v2345_v54, 0.0 }
 0x588   : > { %v1362_v56 = vmul.f32 6.0, %v2347_v60  ;;  %1524 = vadd.xlane.f32.xlu1 %v1523_v61  ;;  %v1526_v34 = vadd.f32 %v3222_v14, %v3234_v44 }
 0x589   : > { %v3238_v32 = vpop.eup %2348  ;;  %2360 = vpow2.f32 %v1451_v20 }
 0x58a   : > { %v2351_v23 = vpop.eup %2350  ;;  %2362 = vpow2.f32 %v1453_v55  ;;  %v1393_v25 = vmul.f32 %v1362_v56, %v3109_v46  ;;  %v1394_v40 = vmul.f32 %v1362_v56, %v3111_v50  ;;  %1527 = vadd.xlane.f32.xlu0 %v1526_v34 }
 0x58b   : > { %v3244_v43 = vsel %vm1463_vm1, %v2351_v23, 0.0 }
 0x58c   : > { %v1455_v24 = vmul.f32 1.442695, %v1393_v25  ;;  %v1457_v62 = vmul.f32 1.442695, %v1394_v40  ;;  %v1529_v41 = vadd.f32 %v3238_v32, %v3244_v43 }
 0x58d   : > { %v3248_v19 = vpop.eup %2352 }
 0x58e   : > { %v2355_v52 = vpop.eup %2354  ;;  %2364 = vpow2.f32 %v1455_v24  ;;  %1530 = vadd.xlane.f32.xlu1 %v1529_v41 }
 0x58f   : > { %2366 = vpow2.f32 %v1457_v62  ;;  %v3252_v46 = vsel %vm1463_vm1, %v2355_v52, 0.0 }
 0x590   : > { %v1532_v50 = vadd.f32 %v3248_v19, %v3252_v46 }
 0x591   : > { %v3256_v18 = vpop.eup %2356 }
 0x592   : > { %v2359_v2 = vpop.eup %2358  ;;  %1533 = vadd.xlane.f32.xlu0 %v1532_v50 }
 0x593   : > { %v3260_v7 = vsel %vm1463_vm1, %v2359_v2, 0.0 }
 0x594   : > { %v1535_v8 = vadd.f32 %v3256_v18, %v3260_v7 }
 0x596   : > { %v3264_v0 = vpop.eup %2360  ;;  %1536 = vadd.xlane.f32.xlu1 %v1535_v8 }
 0x597   : > { %v2363_v16 = vpop.eup %2362 }
 0x598   : > { %v3268_v10 = vsel %vm1463_vm1, %v2363_v16, 0.0 }
 0x599   : > { %v1538_v13 = vadd.f32 %v3264_v0, %v3268_v10 }
 0x59b   : > { %v3272_v11 = vpop.eup %2364  ;;  %1539 = vadd.xlane.f32.xlu0 %v1538_v13 }
 0x59c   : > { %v2367_v15 = vpop.eup %2366 }
 0x59d   : > { %v3276_v35 = vsel %vm1463_vm1, %v2367_v15, 0.0 }
 0x59e   : > { %v1541_v58 = vadd.f32 %v3272_v11, %v3276_v35 }
 0x5a0   : > { %1542 = vadd.xlane.f32.xlu1 %v1541_v58 }
 0x5eb   : > { %v1498_v21 = vpop.xlane.xlu0 %1497 }
 0x5ec   : > { %2368 = vrcp.f32 %v1498_v21 }
 0x5f0   : > { %v1501_v5 = vpop.xlane.xlu1 %1500 }
 0x5f1   : > { %2370 = vrcp.f32 %v1501_v5 }
 0x5f4   : > { %v1504_v57 = vpop.xlane.xlu0 %1503 }
 0x5f5   : > { %2372 = vrcp.f32 %v1504_v57 }
 0x5f8   : > { %v1507_v63 = vpop.xlane.xlu1 %1506 }
 0x5f9   : > { %2374 = vrcp.f32 %v1507_v63  ;;  %v2369_v31 = vpop.eup %2368 }
 0x5fa   : > { %v1561_v53 = vmul.f32 %v2369_v31, %v3134_v51  ;;  %v1560_v33 = vmul.f32 %v2369_v31, %v3130_v59 }
 0x5fc   : > { %v1510_v36 = vpop.xlane.xlu0 %1509 }
 0x5fd   : > { %2376 = vrcp.f32 %v1510_v36 }
 0x5fe   : > { %v2371_v37 = vpop.eup %2370 }
 0x5ff   : > { %v1563_v26 = vmul.f32 %v2371_v37, %v3144_v39  ;;  %v1562_v9 = vmul.f32 %v2371_v37, %v3138_v27 }
 0x601   : > { %v1593_v54 = vpack.c.bf16 %v1563_v26, %v1561_v53  ;;  %v1592_v61 = vpack.c.bf16 %v1562_v9, %v1560_v33 }
 0x602   : > { %v1513_v60 = vpop.xlane.xlu1 %1512  ;;  %v2373_v20 = vpop.eup %2372 }
 0x603   : > { %2378 = vrcp.f32 %v1513_v60  ;;  %1640 = vmatprep.mubr.bf16.mxu1 %v1593_v54  ;;  %v1565_v34 = vmul.f32 %v2373_v20, %v3154_v1  ;;  %v1564_v39 = vmul.f32 %v2373_v20, %v3146_v12 }
 0x604   : > { %1641 = vmatmul.mubr.bf16.vlgmr.msra.gmra.mxu1 %v1592_v61 }
 0x606   : > { %v2375_v55 = vpop.eup %2374  ;;  %v1516_v56 = vpop.xlane.xlu0 %1515 }
 0x607   : > { %2380 = vrcp.f32 %v1516_v56  ;;  %v1567_v51 = vmul.f32 %v2375_v55, %v3164_v3  ;;  %v1566_v59 = vmul.f32 %v2375_v55, %v3156_v17 }
 0x609   : > { %v1519_v27 = vpop.xlane.xlu1 %1518  ;;  %v1595_v23 = vpack.c.bf16 %v1567_v51, %v1565_v34  ;;  %v1594_v25 = vpack.c.bf16 %v1566_v59, %v1564_v39 }
 0x60a   : > { %2382 = vrcp.f32 %v1519_v27  ;;  %v2377_v24 = vpop.eup %2376 }
 0x60b   : > { %1648 = vmatprep.mubr.bf16.mxu1 %v1595_v23  ;;  %v1569_v1 = vmul.f32 %v2377_v24, %v3174_v48  ;;  %v1568_v3 = vmul.f32 %v2377_v24, %v3166_v38 }
 0x60c   : > { %1649 = vmatmul.mubr.bf16.gmra.mxu1 %v1594_v25 }
 0x60d   : > { %v1522_v40 = vpop.xlane.xlu0 %1521 }
 0x60e   : > { %2384 = vrcp.f32 %v1522_v40 }
 0x610   : > { %v2379_v62 = vpop.eup %2378 }
 0x611   : > { %v1525_v41 = vpop.xlane.xlu1 %1524  ;;  %v1571_v52 = vmul.f32 %v2379_v62, %v3186_v30  ;;  %v1570_v12 = vmul.f32 %v2379_v62, %v3180_v42 }
 0x612   : > { %2386 = vrcp.f32 %v1525_v41 }
 0x613   : > { %v1597_v17 = vpack.c.bf16 %v1571_v52, %v1569_v1  ;;  %v1528_v50 = vpop.xlane.xlu0 %1527  ;;  %v1596_v2 = vpack.c.bf16 %v1570_v12, %v1568_v3 }
 0x614   : > { %v2381_v8 = vpop.eup %2380  ;;  %2388 = vrcp.f32 %v1528_v50 }
 0x615   : > { %1656 = vmatprep.mubr.bf16.mxu1 %v1597_v17  ;;  %v1573_v15 = vmul.f32 %v2381_v8, %v3196_v22  ;;  %v1572_v30 = vmul.f32 %v2381_v8, %v3188_v28 }
 0x616   : > { %1657 = vmatmul.mubr.bf16.gmra.mxu1 %v1596_v2 }
 0x617   : > { %v2383_v16 = vpop.eup %2382  ;;  %v1531_v13 = vpop.xlane.xlu1 %1530 }
 0x618   : > { %2390 = vrcp.f32 %v1531_v13  ;;  %v1575_v48 = vmul.f32 %v2383_v16, %v3206_v6  ;;  %v1574_v38 = vmul.f32 %v2383_v16, %v3198_v4 }
 0x61a   : > { %v1599_v42 = vpack.c.bf16 %v1575_v48, %v1573_v15  ;;  %v1598_v58 = vpack.c.bf16 %v1574_v38, %v1572_v30 }
 0x61b   : > { %v1534_v21 = vpop.xlane.xlu0 %1533  ;;  %v2385_v5 = vpop.eup %2384 }
 0x61c   : > { %1664 = vmatprep.mubr.bf16.mxu1 %v1599_v42  ;;  %2392 = vrcp.f32 %v1534_v21  ;;  %v1577_v31 = vmul.f32 %v2385_v5, %v3216_v29  ;;  %v1576_v6 = vmul.f32 %v2385_v5, %v3210_v47 }
 0x61e   : > { %1665 = vmatmul.mubr.bf16.gmra.mxu1 %v1598_v58 }
 0x61f   : > { %v2387_v57 = vpop.eup %2386  ;;  %v1537_v63 = vpop.xlane.xlu1 %1536 }
 0x620   : > { %2394 = vrcp.f32 %v1537_v63  ;;  %v1579_v22 = vmul.f32 %v2387_v57, %v3228_v45  ;;  %v1578_v28 = vmul.f32 %v2387_v57, %v3220_v49 }
 0x621   : > { %v2389_v36 = vpop.eup %2388 }
 0x622   : > { %v1601_v37 = vpack.c.bf16 %v1579_v22, %v1577_v31  ;;  %v1600_v4 = vpack.c.bf16 %v1578_v28, %v1576_v6  ;;  %v1581_v33 = vmul.f32 %v2389_v36, %v3234_v44  ;;  %v1580_v45 = vmul.f32 %v2389_v36, %v3222_v14 }
 0x624   : > { %1672 = vmatprep.mubr.bf16.mxu1 %v1601_v37  ;;  %v1540_v26 = vpop.xlane.xlu0 %1539 }
 0x625   : > { %v2391_v53 = vpop.eup %2390  ;;  %2396 = vrcp.f32 %v1540_v26 }
 0x626   : > { %1673 = vmatmul.mubr.bf16.gmra.mxu1 %v1600_v4  ;;  %v1583_v9 = vmul.f32 %v2391_v53, %v3244_v43  ;;  %v1582_v29 = vmul.f32 %v2391_v53, %v3238_v32 }
 0x628   : > { %v1603_v54 = vpack.c.bf16 %v1583_v9, %v1581_v33  ;;  %v1602_v49 = vpack.c.bf16 %v1582_v29, %v1580_v45 }
 0x629   : > { %v1543_v47 = vpop.xlane.xlu1 %1542  ;;  %v2393_v61 = vpop.eup %2392 }
 0x62a   : > { %2398 = vrcp.f32 %v1543_v47  ;;  %1680 = vmatprep.mubr.bf16.mxu1 %v1603_v54  ;;  %v1585_v20 = vmul.f32 %v2393_v61, %v3252_v46  ;;  %v1584_v32 = vmul.f32 %v2393_v61, %v3248_v19 }
 0x62d   : > { %v2395_v60 = vpop.eup %2394 }
 0x62e   : > { %1681 = vmatmul.mubr.bf16.gmra.mxu1 %v1602_v49  ;;  %v1587_v55 = vmul.f32 %v2395_v60, %v3260_v7  ;;  %v1586_v44 = vmul.f32 %v2395_v60, %v3256_v18 }
 0x630   : > { %v1605_v43 = vpack.c.bf16 %v1587_v55, %v1585_v20  ;;  %v1604_v56 = vpack.c.bf16 %v1586_v44, %v1584_v32 }
 0x632   : > { %1688 = vmatprep.mubr.bf16.mxu1 %v1605_v43  ;;  %v2397_v14 = vpop.eup %2396 }
 0x633   : > { %v1589_v51 = vmul.f32 %v2397_v14, %v3268_v10  ;;  %v1588_v46 = vmul.f32 %v2397_v14, %v3264_v0 }
 0x636   : > { %1689 = vmatmul.mubr.bf16.gmra.mxu1 %v1604_v56 }
 0x637   : > { %v2399_v34 = vpop.eup %2398 }
 0x638   : > { %v1591_v39 = vmul.f32 %v2399_v34, %v3276_v35  ;;  %v1590_v7 = vmul.f32 %v2399_v34, %v3272_v11 }
 0x63a   : > { %v1607_v59 = vpack.c.bf16 %v1591_v39, %v1589_v51  ;;  %v1606_v18 = vpack.c.bf16 %v1590_v7, %v1588_v46 }
 0x63c   : > { %1696 = vmatprep.mubr.bf16.mxu1 %v1607_v59 }
 0x63e   : > { %1697 = vmatmul.mubr.bf16.gmra.mxu1 %v1606_v18 }
 0x6c4   : > { %v1969_v19 = vpop.f32.mrf.mxu1 }
 0x6c6   : > { %v1970_v27 = vpop.f32.mrf.mxu1 }
 0x6c7   : > { %v1971_v23 = vadd.f32 %v1970_v27, %v1969_v19 }
 0x6c8   : > { %v1972_v25 = vpop.f32.mrf.mxu1 }
 0x6c9   : > { %1705 = vst [vmem:[%s2758_s18] sm:$0xff] %v1971_v23 }
 0x6ca   : > { %v1973_v10 = vpop.f32.mrf.mxu1 }
 0x6cb   : > { %v1974_v40 = vadd.f32 %v1973_v10, %v1972_v25 }
 0x6cc   : > { %v1975_v24 = vpop.f32.mrf.mxu1 }
 0x6cd   : > { %1706 = vst [vmem:[%s2758_s18 + $0x8] sm:$0xff] %v1974_v40 }
 0x6ce   : > { %v1976_v0 = vpop.f32.mrf.mxu1 }
 0x6cf   : > { %v1977_v35 = vadd.f32 %v1976_v0, %v1975_v24 }
 0x6d0   : > { %v1978_v11 = vpop.f32.mrf.mxu1 }
 0x6d1   : > { %1707 = vst [vmem:[%s2758_s18 + $0x10] sm:$0xff] %v1977_v35 }
 0x6d2   : > { %v1979_v62 = vpop.f32.mrf.mxu1 }
 0x6d3   : > { %v1980_v41 = vadd.f32 %v1979_v62, %v1978_v11 }
 0x6d5   : > { %1708 = vst [vmem:[%s2758_s18 + $0x18] sm:$0xff] %v1980_v41 }
 0x6d6   : > { %v1981_v1 = vpop.f32.mrf.mxu1 }
 0x6d8   : > { %v1982_v52 = vpop.f32.mrf.mxu1 }
 0x6d9   : > { %v1983_v3 = vadd.f32 %v1982_v52, %v1981_v1 }
 0x6da   : > { %v1984_v12 = vpop.f32.mrf.mxu1 }
 0x6db   : > { %1709 = vst [vmem:[%s2758_s18 + $0x20] sm:$0xff] %v1983_v3 }
 0x6dc   : > { %v1985_v17 = vpop.f32.mrf.mxu1 }
 0x6dd   : > { %v1986_v50 = vadd.f32 %v1985_v17, %v1984_v12 }
 0x6de   : > { %v1987_v2 = vpop.f32.mrf.mxu1 }
 0x6df   : > { %1710 = vst [vmem:[%s2758_s18 + $0x28] sm:$0xff] %v1986_v50 }
 0x6e0   : > { %v1988_v8 = vpop.f32.mrf.mxu1 }
 0x6e1   : > { %v1989_v16 = vadd.f32 %v1988_v8, %v1987_v2 }
 0x6e2   : > { %v1990_v13 = vpop.f32.mrf.mxu1 }
 0x6e3   : > { %1711 = vst [vmem:[%s2758_s18 + $0x30] sm:$0xff] %v1989_v16 }
 0x6e4   : > { %v1991_v15 = vpop.f32.mrf.mxu1 }
 0x6e5   : > { %v1992_v48 = vadd.f32 %v1991_v15, %v1990_v13 }
 0x6e6   : > { %v1993_v30 = vpop.f32.mrf.mxu1 }
 0x6e7   : > { %1712 = vst [vmem:[%s2758_s18 + $0x38] sm:$0xff] %v1992_v48 }
 0x6e8   : > { %v1994_v38 = vpop.f32.mrf.mxu1 }
 0x6e9   : > { %v1995_v42 = vadd.f32 %v1994_v38, %v1993_v30 }
 0x6ea   : > { %v1996_v58 = vpop.f32.mrf.mxu1 }
 0x6eb   : > { %1713 = vst [vmem:[%s2758_s18 + $0x40] sm:$0xff] %v1995_v42 }
 0x6ec   : > { %v1997_v21 = vpop.f32.mrf.mxu1 }
 0x6ed   : > { %v1998_v5 = vadd.f32 %v1997_v21, %v1996_v58 }
 0x6ee   : > { %v1999_v57 = vpop.f32.mrf.mxu1 }
 0x6ef   : > { %1714 = vst [vmem:[%s2758_s18 + $0x48] sm:$0xff] %v1998_v5 }
 0x6f0   : > { %v2000_v63 = vpop.f32.mrf.mxu1 }
 0x6f1   : > { %v2001_v31 = vadd.f32 %v2000_v63, %v1999_v57 }
 0x6f2   : > { %v2002_v22 = vpop.f32.mrf.mxu1 }
 0x6f3   : > { %1715 = vst [vmem:[%s2758_s18 + $0x50] sm:$0xff] %v2001_v31 }
 0x6f4   : > { %v2003_v6 = vpop.f32.mrf.mxu1 }
 0x6f5   : > { %v2004_v28 = vadd.f32 %v2003_v6, %v2002_v22 }
 0x6f6   : > { %v2005_v37 = vpop.f32.mrf.mxu1 }
 0x6f7   : > { %1716 = vst [vmem:[%s2758_s18 + $0x58] sm:$0xff] %v2004_v28 }
 0x6f8   : > { %v2006_v4 = vpop.f32.mrf.mxu1 }
 0x6f9   : > { %v2007_v36 = vadd.f32 %v2006_v4, %v2005_v37 }
 0x6fa   : > { %v2008_v53 = vpop.f32.mrf.mxu1 }
 0x6fb   : > { %1717 = vst [vmem:[%s2758_s18 + $0x60] sm:$0xff] %v2007_v36 }
 0x6fc   : > { %v2009_v26 = vpop.f32.mrf.mxu1 }
 0x6fd   : > { %v2010_v33 = vadd.f32 %v2009_v26, %v2008_v53 }
 0x6fe   : > { %v2011_v9 = vpop.f32.mrf.mxu1 }
 0x6ff   : > { %1718 = vst [vmem:[%s2758_s18 + $0x68] sm:$0xff] %v2010_v33 }
 0x700   : > { %v2012_v29 = vpop.f32.mrf.mxu1 }
 0x701   : > { %v2013_v54 = vadd.f32 %v2012_v29, %v2011_v9 }
 0x702   : > { %v2014_v45 = vpop.f32.mrf.mxu1 }
 0x703   : > { %1719 = vst [vmem:[%s2758_s18 + $0x70] sm:$0xff] %v2013_v54 }
 0x704   : > { %v2015_v47 = vpop.f32.mrf.mxu1 }
 0x705   : > { %v2016_v49 = vadd.f32 %v2015_v47, %v2014_v45 }
 0x707   : > { %1720 = vst [vmem:[%s2758_s18 + $0x78] sm:$0xff] %v2016_v49 }
 0x708 PF: > { %s1888_s27 = sshll.u32 %s2599_s16, 11  ;;  %s1735_s30 = sshll.u32 %s2758_s18, 4  ;;  %s3335_s30 = int_to_ptr.vmem [resolvable:$true] %s1735_s30 }
 0x709   : > { %s3332_s29 = scalar_lea.hbm %s3380_s3, %s1888_s27  ;;  %s1722_s4 = scalar_lea.sflag [#allocation4], %s2713_s5 }
 0x70a   : > { %s2480_s21 = scalar_lea.vmem %s3335_s30, 2048  ;;  %p3395_p11 = scmp.ne.s32.totalorder %s3389_s10, 0 }
 0x70b   : > { %p2481_p7 = scmp.ne.s32.totalorder %s3335_s30, %s2480_s21  ;;  %s2555_s22 = smov [#allocation8]  }
 0x70c   : > { %s2484_s17 = sshll.u32 %s2555_s22, 4  ;;  %s2485_s17 = int_to_ptr.vmem [resolvable:$false] %s2484_s17 }
 0x70d   : > { %p2482_p12 = pnand %p2481_p7, %p3395_p11  ;;  %s2486_s16 = scalar_lea.vmem %s2485_s17, 4096 }
 0x70e   : > { %p2487_p0 = scmp.lt.s32.totalorder %s3335_s30, %s2485_s17  ;;  %p2488_p5 = scmp.lt.s32.totalorder %s2486_s16, %s2480_s21 }
 0x70f   : > { %p2483_p13 = pneg %p2482_p12 }
 0x710   : > { %p2489_p10 = por %p2488_p5, %p2487_p0 }
 0x712   : > { %p2490_p9 = pnand %p2489_p10, %p2483_p13 }
 0x714   : > { %2493 = shalt.err (!%p2490_p9)
}
 0x715   : > { %s2494_s23 = scalar_lea.hbm %s3332_s29, 2048  ;;  %s2498_s6 = scalar_lea.hbm %s3380_s3, 6144 }
 0x716   : > { %p2495_p1 = scmp.ne.s32.totalorder %s3332_s29, %s2494_s23  ;;  %p2499_p8 = scmp.lt.s32.totalorder %s3332_s29, %s3380_s3 }
 0x717   : > { %p2500_p3 = scmp.lt.s32.totalorder %s2498_s6, %s2494_s23 }
 0x718   : > { %p2496_p4 = pnand %p2495_p1, %p3395_p11 }
 0x719   : > { %p2501_p2 = por %p2500_p3, %p2499_p8 }
 0x71a   : > { %p2497_p6 = pneg %p2496_p4 }
 0x71c   : > { %p2502_p7 = pnand %p2501_p2, %p2497_p6 }
 0x71e   : > { %2505 = shalt.err (!%p2502_p7)
}
 0x71f   : > { %s2556_s20 = smov 128   ;;  %s2557_s18 = smov 8  }
 0x720   : > { %2091 = dma.vmem_to_hbm [thread:$0]  (%p3395_p11), %s3335_s30, 2048, %s3332_s29, %s1722_s4, %s2556_s20, %s2556_s20, %s2557_s18  }
 0x721 PF: > { %p2113_p12 = scmp.ge.s32.totalorder %s2548_s15, 2  ;;  %s1750_s27 = sand.u32 1, %s2536_s12  }
 0x722   : > { %p3396_p13 = scmp.ne.s32.totalorder %s3386_s19, 0  ;;  %s1751_s28 = scalar_lea.sflag [#allocation4], %s1750_s27 }
 0x724   : > { %p2105_p0 = pnand %p2113_p12, %p3396_p13 }
 0x726   : > { %p2106_p5 = pneg %p2105_p0 }
 0x728   : > { %2531 = dma.done.wait (%p2106_p5), %s1751_s28, 2048  }
 0x729   : > { %2533 = vsyncadd (%p2106_p5), %s1751_s28, 4294965248  ;;  %p17_p10 = scmp.ge.s32.totalorder %s2655_s7, 5   ;;  %s3397_s12 = smov %s2540_s13 }
 0x72a   : > { %s3398_s13 = smov %s2544_s14  ;;  %s3399_s14 = smov %s2671_s11 }
 0x72b   : > { %s3400_s15 = smov %s2655_s7  ;;  %19 = sbr.rel (!%p17_p10) target bundleno = 6 (0x6), region = 93 }
 0x730   :  { %1756 = vsyncpa [#allocation3], 1 }
 0x731   :  { %1758 = vsyncpa [#allocation3 + $0x1], 1 }
 0x732   :  { %1759 = vsyncpa [#allocation6], 1 }
 0x733   :  { %1760 = vsyncpa [#allocation4], 1 }
 0x734   :  { %1762 = vsyncpa [#allocation4 + $0x1], 1 }

</bundles_post_ra>
